<compile_context>
chip_gen: v7x
topology: tpu7x:2x2x1
jax: 0.10.0
libtpu: 0.0.40
codegen_flags: <defaults>
</compile_context>

<pallas_src>
import functools

import jax
import jax.numpy as jnp
from jax.experimental import pallas as pl
from jax.experimental.pallas import tpu as pltpu


def _round_up(n, m):
    return ((n + m - 1) // m) * m


# ---------------------------------------------------------------------------
# Pallas kernel: whole sequence in one invocation, recurrence unrolled over T.
# ---------------------------------------------------------------------------
def _forecast_grpo_kernel(
    x_ref,                                      # (B, T, D)   whole sequence
    wih0_ref, whh0_ref, bih0_ref, bhh0_ref,     # GRU layer 0 (gate-padded)
    wih1_ref, whh1_ref, bih1_ref, bhh1_ref,     # GRU layer 1 (gate-padded)
    whead_ref, bhead_ref,                       # fused forecast+policy head
    out_ref,                                    # (B, OUT_PAD)
    *, seq_len, gate_dim,
):
    B = x_ref.shape[0]
    D = x_ref.shape[2]
    T = seq_len
    G = gate_dim

    # ---- prologue: layer-0 input projection for ALL time steps at once ----
    # (bih0 folded in here once instead of per step)
    x_flat = x_ref[...].reshape(B * T, D)
    gi0_all = (
        jnp.dot(x_flat, wih0_ref[...], preferred_element_type=jnp.float32)
        + bih0_ref[...]
    ).reshape(B, T, 3 * G)

    whh0 = whh0_ref[...]
    bhh0 = bhh0_ref[...]
    wih1 = wih1_ref[...]
    bih1 = bih1_ref[...]
    whh1 = whh1_ref[...]
    bhh1 = bhh1_ref[...]

    def gru_gates(gi, gh, h):
        # PyTorch gate order (r, z, n); each gate is a lane-aligned G-wide slab.
        r = jax.nn.sigmoid(gi[:, 0:G] + gh[:, 0:G])
        z = jax.nn.sigmoid(gi[:, G:2 * G] + gh[:, G:2 * G])
        n = jnp.tanh(gi[:, 2 * G:3 * G] + r * gh[:, 2 * G:3 * G])
        return (1.0 - z) * n + z * h

    h0 = jnp.zeros((B, G), jnp.float32)
    h1 = jnp.zeros((B, G), jnp.float32)

    # Fully unrolled recurrence: T is a compile-time constant, so all time
    # slices are static and the LLO scheduler can overlap consecutive steps.
    for t in range(T):
        gi0 = gi0_all[:, t, :]                                        # (B, 3G)
        gh0 = jnp.dot(h0, whh0, preferred_element_type=jnp.float32) + bhh0
        h0 = gru_gates(gi0, gh0, h0)

        gi1 = jnp.dot(h0, wih1, preferred_element_type=jnp.float32) + bih1
        gh1 = jnp.dot(h1, whh1, preferred_element_type=jnp.float32) + bhh1
        h1 = gru_gates(gi1, gh1, h1)

    # ---- fused heads (forecast | policy), single lane-dense store ----
    out_ref[...] = (
        jnp.dot(h1, whead_ref[...], preferred_element_type=jnp.float32)
        + bhead_ref[...]
    )


# ---------------------------------------------------------------------------
# Wrapper: pads weights to lane-aligned gate slabs, fuses heads, calls kernel.
# ---------------------------------------------------------------------------
def _pad_gate_cols(w, H, G):
    """(in, 3H) -> (in, 3G): zero-pad each of the r/z/n gate column blocks."""
    parts = []
    for g in range(3):
        chunk = w[:, g * H:(g + 1) * H]
        parts.append(jnp.pad(chunk, ((0, 0), (0, G - H))))
    return jnp.concatenate(parts, axis=1)


def forecasting_grpo_forward(x, params):
    """x: (B, T, input_dim) float32.  Returns (forecast (B, P), policy (B, 1))."""
    B, T, D = x.shape
    H = params["whh0"].shape[0]
    P = params["wfc"].shape[1]

    G = _round_up(H, 128)            # lane-aligned hidden / gate width
    OUT_PAD = _round_up(P + 1, 128)  # fused (forecast | policy) head width

    # --- GRU weights: pad hidden rows and each gate column block to G ---
    wih0 = _pad_gate_cols(params["wih0"], H, G)                              # (D, 3G)
    whh0 = _pad_gate_cols(jnp.pad(params["whh0"], ((0, G - H), (0, 0))), H, G)
    bih0 = _pad_gate_cols(params["bih0"], H, G)
    bhh0 = _pad_gate_cols(params["bhh0"], H, G)
    wih1 = _pad_gate_cols(jnp.pad(params["wih1"], ((0, G - H), (0, 0))), H, G)
    whh1 = _pad_gate_cols(jnp.pad(params["whh1"], ((0, G - H), (0, 0))), H, G)
    bih1 = _pad_gate_cols(params["bih1"], H, G)
    bhh1 = _pad_gate_cols(params["bhh1"], H, G)

    # --- fuse + pad the two heads into one (G, OUT_PAD) weight ---
    whead = jnp.concatenate([params["wfc"], params["wpol"]], axis=1)         # (H, P+1)
    whead = jnp.pad(whead, ((0, G - H), (0, OUT_PAD - (P + 1))))
    bhead = jnp.concatenate([params["bfc"], params["bpol"]], axis=1)         # (1, P+1)
    bhead = jnp.pad(bhead, ((0, 0), (0, OUT_PAD - (P + 1))))

    weights = [wih0, whh0, bih0, bhh0, wih1, whh1, bih1, bhh1, whead, bhead]

    def full_spec(arr):
        rank = arr.ndim
        return pl.BlockSpec(arr.shape, lambda i, _r=rank: (0,) * _r)

    kernel = functools.partial(_forecast_grpo_kernel, seq_len=T, gate_dim=G)

    out = pl.pallas_call(
        kernel,
        out_shape=jax.ShapeDtypeStruct((B, OUT_PAD), jnp.float32),
        grid_spec=pltpu.PrefetchScalarGridSpec(
            num_scalar_prefetch=0,
            grid=(1,),
            in_specs=[full_spec(x)] + [full_spec(w) for w in weights],
            out_specs=pl.BlockSpec((B, OUT_PAD), lambda i: (0, 0)),
        ),
        compiler_params=pltpu.CompilerParams(
            dimension_semantics=("arbitrary",),
        ),
    )(x, *weights)

    forecast = out[:, :P]
    policy = out[:, P:P + 1]
    return forecast, policy


# ---------------------------------------------------------------------------
# Deterministic parameter init (PyTorch-style uniform(-1/sqrt(H), 1/sqrt(H)))
# ---------------------------------------------------------------------------
def init_params(key, input_dim, hidden_dim, num_products):
    H = hidden_dim
    scale = 1.0 / jnp.sqrt(jnp.float32(H))
    shapes = {
        "wih0": (input_dim, 3 * H),
        "whh0": (H, 3 * H),
        "bih0": (1, 3 * H),
        "bhh0": (1, 3 * H),
        "wih1": (H, 3 * H),
        "whh1": (H, 3 * H),
        "bih1": (1, 3 * H),
        "bhh1": (1, 3 * H),
        "wfc": (H, num_products),
        "bfc": (1, num_products),
        "wpol": (H, 1),
        "bpol": (1, 1),
    }
    params = {}
    keys = jax.random.split(key, len(shapes))
    for (name, shp), k in zip(shapes.items(), keys):
        params[name] = jax.random.uniform(
            k, shp, dtype=jnp.float32, minval=-scale, maxval=scale
        )
    return params


# ---------------------------------------------------------------------------
# Pure-JAX reference (same math, unpadded) for validation
# ---------------------------------------------------------------------------
def _gru_cell_ref(x, h, w_ih, w_hh, b_ih, b_hh, H):
    gi = x @ w_ih + b_ih
    gh = h @ w_hh + b_hh
    r = jax.nn.sigmoid(gi[:, 0:H] + gh[:, 0:H])
    z = jax.nn.sigmoid(gi[:, H:2 * H] + gh[:, H:2 * H])
    n = jnp.tanh(gi[:, 2 * H:3 * H] + r * gh[:, 2 * H:3 * H])
    return (1.0 - z) * n + z * h


def reference_forward(x, params):
    B, T, D = x.shape
    H = params["whh0"].shape[0]
    h0 = jnp.zeros((B, H), jnp.float32)
    h1 = jnp.zeros((B, H), jnp.float32)
    for t in range(T):
        h0 = _gru_cell_ref(x[:, t, :], h0, params["wih0"], params["whh0"],
                           params["bih0"], params["bhh0"], H)
        h1 = _gru_cell_ref(h0, h1, params["wih1"], params["whh1"],
                           params["bih1"], params["bhh1"], H)
    forecast = h1 @ params["wfc"] + params["bfc"]
    policy = h1 @ params["wpol"] + params["bpol"]
    return forecast, policy


if __name__ == "__main__":
    # Small shapes consistent with the module's forward pass.
    B, T = 2, 8
    input_dim, hidden_dim, num_products = 4, 32, 8
    # forecast_horizon / lambda_policy / dropout are unused in inference forward.

    key = jax.random.PRNGKey(0)
    k_x, k_p = jax.random.split(key)
    x = jax.random.normal(k_x, (B, T, input_dim), dtype=jnp.float32)
    params = init_params(k_p, input_dim, hidden_dim, num_products)

    forecast, policy = forecasting_grpo_forward(x, params)
    forecast = jax.block_until_ready(forecast)
    policy = jax.block_until_ready(policy)

    f_ref, p_ref = reference_forward(x, params)
    assert forecast.shape == (B, num_products)
    assert policy.shape == (B, 1)
    assert jnp.allclose(forecast, f_ref, atol=1e-4, rtol=1e-4)
    assert jnp.allclose(policy, p_ref, atol=1e-4, rtol=1e-4)

    print("KERNEL_OK")
</pallas_src>

<mosaic_0001>
module attributes {stable_mosaic.version = 11 : i64} {
  func.func @_forecast_grpo_kernel(%arg0: i32, %arg1: memref<2x8x4xf32, #tpu.memory_space<vmem>>, %arg2: memref<4x384xf32, #tpu.memory_space<vmem>>, %arg3: memref<128x384xf32, #tpu.memory_space<vmem>>, %arg4: memref<1x384xf32, #tpu.memory_space<vmem>>, %arg5: memref<1x384xf32, #tpu.memory_space<vmem>>, %arg6: memref<128x384xf32, #tpu.memory_space<vmem>>, %arg7: memref<128x384xf32, #tpu.memory_space<vmem>>, %arg8: memref<1x384xf32, #tpu.memory_space<vmem>>, %arg9: memref<1x384xf32, #tpu.memory_space<vmem>>, %arg10: memref<128x128xf32, #tpu.memory_space<vmem>>, %arg11: memref<1x128xf32, #tpu.memory_space<vmem>>, %arg12: memref<2x128xf32, #tpu.memory_space<vmem>>) attributes {dimension_semantics = [#tpu.dimension_semantics<arbitrary>], iteration_bounds = array<i64: 1>, scalar_prefetch = 0 : i64, scratch_operands = 0 : i64, tpu.core_type = #tpu.core_type<tc>, window_params = [{pipeline_mode = #tpu.pipeline_mode<synchronous>, transform_indices = @transform_0, window_bounds = array<i64: 2, 8, 4>}, {pipeline_mode = #tpu.pipeline_mode<synchronous>, transform_indices = @transform_1, window_bounds = array<i64: 4, 384>}, {pipeline_mode = #tpu.pipeline_mode<synchronous>, transform_indices = @transform_2, window_bounds = array<i64: 128, 384>}, {pipeline_mode = #tpu.pipeline_mode<synchronous>, transform_indices = @transform_3, window_bounds = array<i64: 1, 384>}, {pipeline_mode = #tpu.pipeline_mode<synchronous>, transform_indices = @transform_4, window_bounds = array<i64: 1, 384>}, {pipeline_mode = #tpu.pipeline_mode<synchronous>, transform_indices = @transform_5, window_bounds = array<i64: 128, 384>}, {pipeline_mode = #tpu.pipeline_mode<synchronous>, transform_indices = @transform_6, window_bounds = array<i64: 128, 384>}, {pipeline_mode = #tpu.pipeline_mode<synchronous>, transform_indices = @transform_7, window_bounds = array<i64: 1, 384>}, {pipeline_mode = #tpu.pipeline_mode<synchronous>, transform_indices = @transform_8, window_bounds = array<i64: 1, 384>}, {pipeline_mode = #tpu.pipeline_mode<synchronous>, transform_indices = @transform_9, window_bounds = array<i64: 128, 128>}, {pipeline_mode = #tpu.pipeline_mode<synchronous>, transform_indices = @transform_10, window_bounds = array<i64: 1, 128>}, {pipeline_mode = #tpu.pipeline_mode<synchronous>, transform_indices = @transform_11, window_bounds = array<i64: 2, 128>}]} {
    %c0 = arith.constant 0 : index
    %c0_0 = arith.constant 0 : index
    %c0_1 = arith.constant 0 : index
    %0 = vector.load %arg1[%c0, %c0_0, %c0_1] : memref<2x8x4xf32, #tpu.memory_space<vmem>>, vector<2x8x4xf32>
    %1 = vector.shape_cast %0 : vector<2x8x4xf32> to vector<16x4xf32>
    %c0_2 = arith.constant 0 : index
    %c0_3 = arith.constant 0 : index
    %2 = vector.load %arg2[%c0_2, %c0_3] : memref<4x384xf32, #tpu.memory_space<vmem>>, vector<4x384xf32>
    %cst = arith.constant dense<0.000000e+00> : vector<16x384xf32>
    %3 = tpu.matmul %1, %2, %cst {dimension_numbers = #tpu.dot_dimension_numbers<[1], [0], [0], [1], [0, 0, 1, 1], [], []>} : vector<16x4xf32>, vector<4x384xf32>, vector<16x384xf32> -> vector<16x384xf32>
    %c0_4 = arith.constant 0 : index
    %c0_5 = arith.constant 0 : index
    %4 = vector.load %arg4[%c0_4, %c0_5] : memref<1x384xf32, #tpu.memory_space<vmem>>, vector<1x384xf32>
    %5 = vector.broadcast %4 : vector<1x384xf32> to vector<16x384xf32>
    %6 = arith.addf %3, %5 : vector<16x384xf32>
    %7 = vector.shape_cast %6 : vector<16x384xf32> to vector<2x8x384xf32>
    %c0_6 = arith.constant 0 : index
    %c0_7 = arith.constant 0 : index
    %8 = vector.load %arg3[%c0_6, %c0_7] : memref<128x384xf32, #tpu.memory_space<vmem>>, vector<128x384xf32>
    %c0_8 = arith.constant 0 : index
    %c0_9 = arith.constant 0 : index
    %9 = vector.load %arg5[%c0_8, %c0_9] : memref<1x384xf32, #tpu.memory_space<vmem>>, vector<1x384xf32>
    %c0_10 = arith.constant 0 : index
    %c0_11 = arith.constant 0 : index
    %10 = vector.load %arg6[%c0_10, %c0_11] : memref<128x384xf32, #tpu.memory_space<vmem>>, vector<128x384xf32>
    %c0_12 = arith.constant 0 : index
    %c0_13 = arith.constant 0 : index
    %11 = vector.load %arg8[%c0_12, %c0_13] : memref<1x384xf32, #tpu.memory_space<vmem>>, vector<1x384xf32>
    %c0_14 = arith.constant 0 : index
    %c0_15 = arith.constant 0 : index
    %12 = vector.load %arg7[%c0_14, %c0_15] : memref<128x384xf32, #tpu.memory_space<vmem>>, vector<128x384xf32>
    %c0_16 = arith.constant 0 : index
    %c0_17 = arith.constant 0 : index
    %13 = vector.load %arg9[%c0_16, %c0_17] : memref<1x384xf32, #tpu.memory_space<vmem>>, vector<1x384xf32>
    %cst_18 = arith.constant 0.000000e+00 : f32
    %14 = vector.broadcast %cst_18 : f32 to vector<2x128xf32>
    %cst_19 = arith.constant 0.000000e+00 : f32
    %15 = vector.broadcast %cst_19 : f32 to vector<2x128xf32>
    %16 = vector.extract_strided_slice %7 {offsets = [0, 0, 0], sizes = [2, 1, 384], strides = [1, 1, 1]} : vector<2x8x384xf32> to vector<2x1x384xf32>
    %17 = vector.shape_cast %16 : vector<2x1x384xf32> to vector<2x384xf32>
    %cst_20 = arith.constant dense<0.000000e+00> : vector<2x384xf32>
    %18 = tpu.matmul %14, %8, %cst_20 {dimension_numbers = #tpu.dot_dimension_numbers<[1], [0], [0], [1], [0, 0, 1, 1], [], []>} : vector<2x128xf32>, vector<128x384xf32>, vector<2x384xf32> -> vector<2x384xf32>
    %19 = vector.broadcast %9 : vector<1x384xf32> to vector<2x384xf32>
    %20 = arith.addf %18, %19 : vector<2x384xf32>
    %21 = vector.extract_strided_slice %17 {offsets = [0, 0], sizes = [2, 128], strides = [1, 1]} : vector<2x384xf32> to vector<2x128xf32>
    %22 = vector.extract_strided_slice %20 {offsets = [0, 0], sizes = [2, 128], strides = [1, 1]} : vector<2x384xf32> to vector<2x128xf32>
    %23 = arith.addf %21, %22 : vector<2x128xf32>
    %24 = arith.negf %23 : vector<2x128xf32>
    %25 = math.exp %24 : vector<2x128xf32>
    %cst_21 = arith.constant 1.000000e+00 : f32
    %26 = vector.broadcast %cst_21 : f32 to vector<2x128xf32>
    %27 = arith.addf %26, %25 : vector<2x128xf32>
    %28 = arith.divf %26, %27 : vector<2x128xf32>
    %29 = vector.extract_strided_slice %17 {offsets = [0, 128], sizes = [2, 128], strides = [1, 1]} : vector<2x384xf32> to vector<2x128xf32>
    %30 = vector.extract_strided_slice %20 {offsets = [0, 128], sizes = [2, 128], strides = [1, 1]} : vector<2x384xf32> to vector<2x128xf32>
    %31 = arith.addf %29, %30 : vector<2x128xf32>
    %32 = arith.negf %31 : vector<2x128xf32>
    %33 = math.exp %32 : vector<2x128xf32>
    %cst_22 = arith.constant 1.000000e+00 : f32
    %34 = vector.broadcast %cst_22 : f32 to vector<2x128xf32>
    %35 = arith.addf %34, %33 : vector<2x128xf32>
    %36 = arith.divf %34, %35 : vector<2x128xf32>
    %37 = vector.extract_strided_slice %17 {offsets = [0, 256], sizes = [2, 128], strides = [1, 1]} : vector<2x384xf32> to vector<2x128xf32>
    %38 = vector.extract_strided_slice %20 {offsets = [0, 256], sizes = [2, 128], strides = [1, 1]} : vector<2x384xf32> to vector<2x128xf32>
    %39 = arith.mulf %28, %38 : vector<2x128xf32>
    %40 = arith.addf %37, %39 : vector<2x128xf32>
    %41 = math.tanh %40 : vector<2x128xf32>
    %cst_23 = arith.constant 1.000000e+00 : f32
    %42 = vector.broadcast %cst_23 : f32 to vector<2x128xf32>
    %43 = arith.subf %42, %36 : vector<2x128xf32>
    %44 = arith.mulf %43, %41 : vector<2x128xf32>
    %45 = arith.mulf %36, %14 : vector<2x128xf32>
    %46 = arith.addf %44, %45 : vector<2x128xf32>
    %cst_24 = arith.constant dense<0.000000e+00> : vector<2x384xf32>
    %47 = tpu.matmul %46, %10, %cst_24 {dimension_numbers = #tpu.dot_dimension_numbers<[1], [0], [0], [1], [0, 0, 1, 1], [], []>} : vector<2x128xf32>, vector<128x384xf32>, vector<2x384xf32> -> vector<2x384xf32>
    %48 = vector.broadcast %11 : vector<1x384xf32> to vector<2x384xf32>
    %49 = arith.addf %47, %48 : vector<2x384xf32>
    %cst_25 = arith.constant dense<0.000000e+00> : vector<2x384xf32>
    %50 = tpu.matmul %15, %12, %cst_25 {dimension_numbers = #tpu.dot_dimension_numbers<[1], [0], [0], [1], [0, 0, 1, 1], [], []>} : vector<2x128xf32>, vector<128x384xf32>, vector<2x384xf32> -> vector<2x384xf32>
    %51 = vector.broadcast %13 : vector<1x384xf32> to vector<2x384xf32>
    %52 = arith.addf %50, %51 : vector<2x384xf32>
    %53 = vector.extract_strided_slice %49 {offsets = [0, 0], sizes = [2, 128], strides = [1, 1]} : vector<2x384xf32> to vector<2x128xf32>
    %54 = vector.extract_strided_slice %52 {offsets = [0, 0], sizes = [2, 128], strides = [1, 1]} : vector<2x384xf32> to vector<2x128xf32>
    %55 = arith.addf %53, %54 : vector<2x128xf32>
    %56 = arith.negf %55 : vector<2x128xf32>
    %57 = math.exp %56 : vector<2x128xf32>
    %cst_26 = arith.constant 1.000000e+00 : f32
    %58 = vector.broadcast %cst_26 : f32 to vector<2x128xf32>
    %59 = arith.addf %58, %57 : vector<2x128xf32>
    %60 = arith.divf %58, %59 : vector<2x128xf32>
    %61 = vector.extract_strided_slice %49 {offsets = [0, 128], sizes = [2, 128], strides = [1, 1]} : vector<2x384xf32> to vector<2x128xf32>
    %62 = vector.extract_strided_slice %52 {offsets = [0, 128], sizes = [2, 128], strides = [1, 1]} : vector<2x384xf32> to vector<2x128xf32>
    %63 = arith.addf %61, %62 : vector<2x128xf32>
    %64 = arith.negf %63 : vector<2x128xf32>
    %65 = math.exp %64 : vector<2x128xf32>
    %cst_27 = arith.constant 1.000000e+00 : f32
    %66 = vector.broadcast %cst_27 : f32 to vector<2x128xf32>
    %67 = arith.addf %66, %65 : vector<2x128xf32>
    %68 = arith.divf %66, %67 : vector<2x128xf32>
    %69 = vector.extract_strided_slice %49 {offsets = [0, 256], sizes = [2, 128], strides = [1, 1]} : vector<2x384xf32> to vector<2x128xf32>
    %70 = vector.extract_strided_slice %52 {offsets = [0, 256], sizes = [2, 128], strides = [1, 1]} : vector<2x384xf32> to vector<2x128xf32>
    %71 = arith.mulf %60, %70 : vector<2x128xf32>
    %72 = arith.addf %69, %71 : vector<2x128xf32>
    %73 = math.tanh %72 : vector<2x128xf32>
    %cst_28 = arith.constant 1.000000e+00 : f32
    %74 = vector.broadcast %cst_28 : f32 to vector<2x128xf32>
    %75 = arith.subf %74, %68 : vector<2x128xf32>
    %76 = arith.mulf %75, %73 : vector<2x128xf32>
    %77 = arith.mulf %68, %15 : vector<2x128xf32>
    %78 = arith.addf %76, %77 : vector<2x128xf32>
    %79 = vector.extract_strided_slice %7 {offsets = [0, 1, 0], sizes = [2, 1, 384], strides = [1, 1, 1]} : vector<2x8x384xf32> to vector<2x1x384xf32>
    %80 = vector.shape_cast %79 : vector<2x1x384xf32> to vector<2x384xf32>
    %cst_29 = arith.constant dense<0.000000e+00> : vector<2x384xf32>
    %81 = tpu.matmul %46, %8, %cst_29 {dimension_numbers = #tpu.dot_dimension_numbers<[1], [0], [0], [1], [0, 0, 1, 1], [], []>} : vector<2x128xf32>, vector<128x384xf32>, vector<2x384xf32> -> vector<2x384xf32>
    %82 = vector.broadcast %9 : vector<1x384xf32> to vector<2x384xf32>
    %83 = arith.addf %81, %82 : vector<2x384xf32>
    %84 = vector.extract_strided_slice %80 {offsets = [0, 0], sizes = [2, 128], strides = [1, 1]} : vector<2x384xf32> to vector<2x128xf32>
    %85 = vector.extract_strided_slice %83 {offsets = [0, 0], sizes = [2, 128], strides = [1, 1]} : vector<2x384xf32> to vector<2x128xf32>
    %86 = arith.addf %84, %85 : vector<2x128xf32>
    %87 = arith.negf %86 : vector<2x128xf32>
    %88 = math.exp %87 : vector<2x128xf32>
    %cst_30 = arith.constant 1.000000e+00 : f32
    %89 = vector.broadcast %cst_30 : f32 to vector<2x128xf32>
    %90 = arith.addf %89, %88 : vector<2x128xf32>
    %91 = arith.divf %89, %90 : vector<2x128xf32>
    %92 = vector.extract_strided_slice %80 {offsets = [0, 128], sizes = [2, 128], strides = [1, 1]} : vector<2x384xf32> to vector<2x128xf32>
    %93 = vector.extract_strided_slice %83 {offsets = [0, 128], sizes = [2, 128], strides = [1, 1]} : vector<2x384xf32> to vector<2x128xf32>
    %94 = arith.addf %92, %93 : vector<2x128xf32>
    %95 = arith.negf %94 : vector<2x128xf32>
    %96 = math.exp %95 : vector<2x128xf32>
    %cst_31 = arith.constant 1.000000e+00 : f32
    %97 = vector.broadcast %cst_31 : f32 to vector<2x128xf32>
    %98 = arith.addf %97, %96 : vector<2x128xf32>
    %99 = arith.divf %97, %98 : vector<2x128xf32>
    %100 = vector.extract_strided_slice %80 {offsets = [0, 256], sizes = [2, 128], strides = [1, 1]} : vector<2x384xf32> to vector<2x128xf32>
    %101 = vector.extract_strided_slice %83 {offsets = [0, 256], sizes = [2, 128], strides = [1, 1]} : vector<2x384xf32> to vector<2x128xf32>
    %102 = arith.mulf %91, %101 : vector<2x128xf32>
    %103 = arith.addf %100, %102 : vector<2x128xf32>
    %104 = math.tanh %103 : vector<2x128xf32>
    %cst_32 = arith.constant 1.000000e+00 : f32
    %105 = vector.broadcast %cst_32 : f32 to vector<2x128xf32>
    %106 = arith.subf %105, %99 : vector<2x128xf32>
    %107 = arith.mulf %106, %104 : vector<2x128xf32>
    %108 = arith.mulf %99, %46 : vector<2x128xf32>
    %109 = arith.addf %107, %108 : vector<2x128xf32>
    %cst_33 = arith.constant dense<0.000000e+00> : vector<2x384xf32>
    %110 = tpu.matmul %109, %10, %cst_33 {dimension_numbers = #tpu.dot_dimension_numbers<[1], [0], [0], [1], [0, 0, 1, 1], [], []>} : vector<2x128xf32>, vector<128x384xf32>, vector<2x384xf32> -> vector<2x384xf32>
    %111 = vector.broadcast %11 : vector<1x384xf32> to vector<2x384xf32>
    %112 = arith.addf %110, %111 : vector<2x384xf32>
    %cst_34 = arith.constant dense<0.000000e+00> : vector<2x384xf32>
    %113 = tpu.matmul %78, %12, %cst_34 {dimension_numbers = #tpu.dot_dimension_numbers<[1], [0], [0], [1], [0, 0, 1, 1], [], []>} : vector<2x128xf32>, vector<128x384xf32>, vector<2x384xf32> -> vector<2x384xf32>
    %114 = vector.broadcast %13 : vector<1x384xf32> to vector<2x384xf32>
    %115 = arith.addf %113, %114 : vector<2x384xf32>
    %116 = vector.extract_strided_slice %112 {offsets = [0, 0], sizes = [2, 128], strides = [1, 1]} : vector<2x384xf32> to vector<2x128xf32>
    %117 = vector.extract_strided_slice %115 {offsets = [0, 0], sizes = [2, 128], strides = [1, 1]} : vector<2x384xf32> to vector<2x128xf32>
    %118 = arith.addf %116, %117 : vector<2x128xf32>
    %119 = arith.negf %118 : vector<2x128xf32>
    %120 = math.exp %119 : vector<2x128xf32>
    %cst_35 = arith.constant 1.000000e+00 : f32
    %121 = vector.broadcast %cst_35 : f32 to vector<2x128xf32>
    %122 = arith.addf %121, %120 : vector<2x128xf32>
    %123 = arith.divf %121, %122 : vector<2x128xf32>
    %124 = vector.extract_strided_slice %112 {offsets = [0, 128], sizes = [2, 128], strides = [1, 1]} : vector<2x384xf32> to vector<2x128xf32>
    %125 = vector.extract_strided_slice %115 {offsets = [0, 128], sizes = [2, 128], strides = [1, 1]} : vector<2x384xf32> to vector<2x128xf32>
    %126 = arith.addf %124, %125 : vector<2x128xf32>
    %127 = arith.negf %126 : vector<2x128xf32>
    %128 = math.exp %127 : vector<2x128xf32>
    %cst_36 = arith.constant 1.000000e+00 : f32
    %129 = vector.broadcast %cst_36 : f32 to vector<2x128xf32>
    %130 = arith.addf %129, %128 : vector<2x128xf32>
    %131 = arith.divf %129, %130 : vector<2x128xf32>
    %132 = vector.extract_strided_slice %112 {offsets = [0, 256], sizes = [2, 128], strides = [1, 1]} : vector<2x384xf32> to vector<2x128xf32>
    %133 = vector.extract_strided_slice %115 {offsets = [0, 256], sizes = [2, 128], strides = [1, 1]} : vector<2x384xf32> to vector<2x128xf32>
    %134 = arith.mulf %123, %133 : vector<2x128xf32>
    %135 = arith.addf %132, %134 : vector<2x128xf32>
    %136 = math.tanh %135 : vector<2x128xf32>
    %cst_37 = arith.constant 1.000000e+00 : f32
    %137 = vector.broadcast %cst_37 : f32 to vector<2x128xf32>
    %138 = arith.subf %137, %131 : vector<2x128xf32>
    %139 = arith.mulf %138, %136 : vector<2x128xf32>
    %140 = arith.mulf %131, %78 : vector<2x128xf32>
    %141 = arith.addf %139, %140 : vector<2x128xf32>
    %142 = vector.extract_strided_slice %7 {offsets = [0, 2, 0], sizes = [2, 1, 384], strides = [1, 1, 1]} : vector<2x8x384xf32> to vector<2x1x384xf32>
    %143 = vector.shape_cast %142 : vector<2x1x384xf32> to vector<2x384xf32>
    %cst_38 = arith.constant dense<0.000000e+00> : vector<2x384xf32>
    %144 = tpu.matmul %109, %8, %cst_38 {dimension_numbers = #tpu.dot_dimension_numbers<[1], [0], [0], [1], [0, 0, 1, 1], [], []>} : vector<2x128xf32>, vector<128x384xf32>, vector<2x384xf32> -> vector<2x384xf32>
    %145 = vector.broadcast %9 : vector<1x384xf32> to vector<2x384xf32>
    %146 = arith.addf %144, %145 : vector<2x384xf32>
    %147 = vector.extract_strided_slice %143 {offsets = [0, 0], sizes = [2, 128], strides = [1, 1]} : vector<2x384xf32> to vector<2x128xf32>
    %148 = vector.extract_strided_slice %146 {offsets = [0, 0], sizes = [2, 128], strides = [1, 1]} : vector<2x384xf32> to vector<2x128xf32>
    %149 = arith.addf %147, %148 : vector<2x128xf32>
    %150 = arith.negf %149 : vector<2x128xf32>
    %151 = math.exp %150 : vector<2x128xf32>
    %cst_39 = arith.constant 1.000000e+00 : f32
    %152 = vector.broadcast %cst_39 : f32 to vector<2x128xf32>
    %153 = arith.addf %152, %151 : vector<2x128xf32>
    %154 = arith.divf %152, %153 : vector<2x128xf32>
    %155 = vector.extract_strided_slice %143 {offsets = [0, 128], sizes = [2, 128], strides = [1, 1]} : vector<2x384xf32> to vector<2x128xf32>
    %156 = vector.extract_strided_slice %146 {offsets = [0, 128], sizes = [2, 128], strides = [1, 1]} : vector<2x384xf32> to vector<2x128xf32>
    %157 = arith.addf %155, %156 : vector<2x128xf32>
    %158 = arith.negf %157 : vector<2x128xf32>
    %159 = math.exp %158 : vector<2x128xf32>
    %cst_40 = arith.constant 1.000000e+00 : f32
    %160 = vector.broadcast %cst_40 : f32 to vector<2x128xf32>
    %161 = arith.addf %160, %159 : vector<2x128xf32>
    %162 = arith.divf %160, %161 : vector<2x128xf32>
    %163 = vector.extract_strided_slice %143 {offsets = [0, 256], sizes = [2, 128], strides = [1, 1]} : vector<2x384xf32> to vector<2x128xf32>
    %164 = vector.extract_strided_slice %146 {offsets = [0, 256], sizes = [2, 128], strides = [1, 1]} : vector<2x384xf32> to vector<2x128xf32>
    %165 = arith.mulf %154, %164 : vector<2x128xf32>
    %166 = arith.addf %163, %165 : vector<2x128xf32>
    %167 = math.tanh %166 : vector<2x128xf32>
    %cst_41 = arith.constant 1.000000e+00 : f32
    %168 = vector.broadcast %cst_41 : f32 to vector<2x128xf32>
    %169 = arith.subf %168, %162 : vector<2x128xf32>
    %170 = arith.mulf %169, %167 : vector<2x128xf32>
    %171 = arith.mulf %162, %109 : vector<2x128xf32>
    %172 = arith.addf %170, %171 : vector<2x128xf32>
    %cst_42 = arith.constant dense<0.000000e+00> : vector<2x384xf32>
    %173 = tpu.matmul %172, %10, %cst_42 {dimension_numbers = #tpu.dot_dimension_numbers<[1], [0], [0], [1], [0, 0, 1, 1], [], []>} : vector<2x128xf32>, vector<128x384xf32>, vector<2x384xf32> -> vector<2x384xf32>
    %174 = vector.broadcast %11 : vector<1x384xf32> to vector<2x384xf32>
    %175 = arith.addf %173, %174 : vector<2x384xf32>
    %cst_43 = arith.constant dense<0.000000e+00> : vector<2x384xf32>
    %176 = tpu.matmul %141, %12, %cst_43 {dimension_numbers = #tpu.dot_dimension_numbers<[1], [0], [0], [1], [0, 0, 1, 1], [], []>} : vector<2x128xf32>, vector<128x384xf32>, vector<2x384xf32> -> vector<2x384xf32>
    %177 = vector.broadcast %13 : vector<1x384xf32> to vector<2x384xf32>
    %178 = arith.addf %176, %177 : vector<2x384xf32>
    %179 = vector.extract_strided_slice %175 {offsets = [0, 0], sizes = [2, 128], strides = [1, 1]} : vector<2x384xf32> to vector<2x128xf32>
    %180 = vector.extract_strided_slice %178 {offsets = [0, 0], sizes = [2, 128], strides = [1, 1]} : vector<2x384xf32> to vector<2x128xf32>
    %181 = arith.addf %179, %180 : vector<2x128xf32>
    %182 = arith.negf %181 : vector<2x128xf32>
    %183 = math.exp %182 : vector<2x128xf32>
    %cst_44 = arith.constant 1.000000e+00 : f32
    %184 = vector.broadcast %cst_44 : f32 to vector<2x128xf32>
    %185 = arith.addf %184, %183 : vector<2x128xf32>
    %186 = arith.divf %184, %185 : vector<2x128xf32>
    %187 = vector.extract_strided_slice %175 {offsets = [0, 128], sizes = [2, 128], strides = [1, 1]} : vector<2x384xf32> to vector<2x128xf32>
    %188 = vector.extract_strided_slice %178 {offsets = [0, 128], sizes = [2, 128], strides = [1, 1]} : vector<2x384xf32> to vector<2x128xf32>
    %189 = arith.addf %187, %188 : vector<2x128xf32>
    %190 = arith.negf %189 : vector<2x128xf32>
    %191 = math.exp %190 : vector<2x128xf32>
    %cst_45 = arith.constant 1.000000e+00 : f32
    %192 = vector.broadcast %cst_45 : f32 to vector<2x128xf32>
    %193 = arith.addf %192, %191 : vector<2x128xf32>
    %194 = arith.divf %192, %193 : vector<2x128xf32>
    %195 = vector.extract_strided_slice %175 {offsets = [0, 256], sizes = [2, 128], strides = [1, 1]} : vector<2x384xf32> to vector<2x128xf32>
    %196 = vector.extract_strided_slice %178 {offsets = [0, 256], sizes = [2, 128], strides = [1, 1]} : vector<2x384xf32> to vector<2x128xf32>
    %197 = arith.mulf %186, %196 : vector<2x128xf32>
    %198 = arith.addf %195, %197 : vector<2x128xf32>
    %199 = math.tanh %198 : vector<2x128xf32>
    %cst_46 = arith.constant 1.000000e+00 : f32
    %200 = vector.broadcast %cst_46 : f32 to vector<2x128xf32>
    %201 = arith.subf %200, %194 : vector<2x128xf32>
    %202 = arith.mulf %201, %199 : vector<2x128xf32>
    %203 = arith.mulf %194, %141 : vector<2x128xf32>
    %204 = arith.addf %202, %203 : vector<2x128xf32>
    %205 = vector.extract_strided_slice %7 {offsets = [0, 3, 0], sizes = [2, 1, 384], strides = [1, 1, 1]} : vector<2x8x384xf32> to vector<2x1x384xf32>
    %206 = vector.shape_cast %205 : vector<2x1x384xf32> to vector<2x384xf32>
    %cst_47 = arith.constant dense<0.000000e+00> : vector<2x384xf32>
    %207 = tpu.matmul %172, %8, %cst_47 {dimension_numbers = #tpu.dot_dimension_numbers<[1], [0], [0], [1], [0, 0, 1, 1], [], []>} : vector<2x128xf32>, vector<128x384xf32>, vector<2x384xf32> -> vector<2x384xf32>
    %208 = vector.broadcast %9 : vector<1x384xf32> to vector<2x384xf32>
    %209 = arith.addf %207, %208 : vector<2x384xf32>
    %210 = vector.extract_strided_slice %206 {offsets = [0, 0], sizes = [2, 128], strides = [1, 1]} : vector<2x384xf32> to vector<2x128xf32>
    %211 = vector.extract_strided_slice %209 {offsets = [0, 0], sizes = [2, 128], strides = [1, 1]} : vector<2x384xf32> to vector<2x128xf32>
    %212 = arith.addf %210, %211 : vector<2x128xf32>
    %213 = arith.negf %212 : vector<2x128xf32>
    %214 = math.exp %213 : vector<2x128xf32>
    %cst_48 = arith.constant 1.000000e+00 : f32
    %215 = vector.broadcast %cst_48 : f32 to vector<2x128xf32>
    %216 = arith.addf %215, %214 : vector<2x128xf32>
    %217 = arith.divf %215, %216 : vector<2x128xf32>
    %218 = vector.extract_strided_slice %206 {offsets = [0, 128], sizes = [2, 128], strides = [1, 1]} : vector<2x384xf32> to vector<2x128xf32>
    %219 = vector.extract_strided_slice %209 {offsets = [0, 128], sizes = [2, 128], strides = [1, 1]} : vector<2x384xf32> to vector<2x128xf32>
    %220 = arith.addf %218, %219 : vector<2x128xf32>
    %221 = arith.negf %220 : vector<2x128xf32>
    %222 = math.exp %221 : vector<2x128xf32>
    %cst_49 = arith.constant 1.000000e+00 : f32
    %223 = vector.broadcast %cst_49 : f32 to vector<2x128xf32>
    %224 = arith.addf %223, %222 : vector<2x128xf32>
    %225 = arith.divf %223, %224 : vector<2x128xf32>
    %226 = vector.extract_strided_slice %206 {offsets = [0, 256], sizes = [2, 128], strides = [1, 1]} : vector<2x384xf32> to vector<2x128xf32>
    %227 = vector.extract_strided_slice %209 {offsets = [0, 256], sizes = [2, 128], strides = [1, 1]} : vector<2x384xf32> to vector<2x128xf32>
    %228 = arith.mulf %217, %227 : vector<2x128xf32>
    %229 = arith.addf %226, %228 : vector<2x128xf32>
    %230 = math.tanh %229 : vector<2x128xf32>
    %cst_50 = arith.constant 1.000000e+00 : f32
    %231 = vector.broadcast %cst_50 : f32 to vector<2x128xf32>
    %232 = arith.subf %231, %225 : vector<2x128xf32>
    %233 = arith.mulf %232, %230 : vector<2x128xf32>
    %234 = arith.mulf %225, %172 : vector<2x128xf32>
    %235 = arith.addf %233, %234 : vector<2x128xf32>
    %cst_51 = arith.constant dense<0.000000e+00> : vector<2x384xf32>
    %236 = tpu.matmul %235, %10, %cst_51 {dimension_numbers = #tpu.dot_dimension_numbers<[1], [0], [0], [1], [0, 0, 1, 1], [], []>} : vector<2x128xf32>, vector<128x384xf32>, vector<2x384xf32> -> vector<2x384xf32>
    %237 = vector.broadcast %11 : vector<1x384xf32> to vector<2x384xf32>
    %238 = arith.addf %236, %237 : vector<2x384xf32>
    %cst_52 = arith.constant dense<0.000000e+00> : vector<2x384xf32>
    %239 = tpu.matmul %204, %12, %cst_52 {dimension_numbers = #tpu.dot_dimension_numbers<[1], [0], [0], [1], [0, 0, 1, 1], [], []>} : vector<2x128xf32>, vector<128x384xf32>, vector<2x384xf32> -> vector<2x384xf32>
    %240 = vector.broadcast %13 : vector<1x384xf32> to vector<2x384xf32>
    %241 = arith.addf %239, %240 : vector<2x384xf32>
    %242 = vector.extract_strided_slice %238 {offsets = [0, 0], sizes = [2, 128], strides = [1, 1]} : vector<2x384xf32> to vector<2x128xf32>
    %243 = vector.extract_strided_slice %241 {offsets = [0, 0], sizes = [2, 128], strides = [1, 1]} : vector<2x384xf32> to vector<2x128xf32>
    %244 = arith.addf %242, %243 : vector<2x128xf32>
    %245 = arith.negf %244 : vector<2x128xf32>
    %246 = math.exp %245 : vector<2x128xf32>
    %cst_53 = arith.constant 1.000000e+00 : f32
    %247 = vector.broadcast %cst_53 : f32 to vector<2x128xf32>
    %248 = arith.addf %247, %246 : vector<2x128xf32>
    %249 = arith.divf %247, %248 : vector<2x128xf32>
    %250 = vector.extract_strided_slice %238 {offsets = [0, 128], sizes = [2, 128], strides = [1, 1]} : vector<2x384xf32> to vector<2x128xf32>
    %251 = vector.extract_strided_slice %241 {offsets = [0, 128], sizes = [2, 128], strides = [1, 1]} : vector<2x384xf32> to vector<2x128xf32>
    %252 = arith.addf %250, %251 : vector<2x128xf32>
    %253 = arith.negf %252 : vector<2x128xf32>
    %254 = math.exp %253 : vector<2x128xf32>
    %cst_54 = arith.constant 1.000000e+00 : f32
    %255 = vector.broadcast %cst_54 : f32 to vector<2x128xf32>
    %256 = arith.addf %255, %254 : vector<2x128xf32>
    %257 = arith.divf %255, %256 : vector<2x128xf32>
    %258 = vector.extract_strided_slice %238 {offsets = [0, 256], sizes = [2, 128], strides = [1, 1]} : vector<2x384xf32> to vector<2x128xf32>
    %259 = vector.extract_strided_slice %241 {offsets = [0, 256], sizes = [2, 128], strides = [1, 1]} : vector<2x384xf32> to vector<2x128xf32>
    %260 = arith.mulf %249, %259 : vector<2x128xf32>
    %261 = arith.addf %258, %260 : vector<2x128xf32>
    %262 = math.tanh %261 : vector<2x128xf32>
    %cst_55 = arith.constant 1.000000e+00 : f32
    %263 = vector.broadcast %cst_55 : f32 to vector<2x128xf32>
    %264 = arith.subf %263, %257 : vector<2x128xf32>
    %265 = arith.mulf %264, %262 : vector<2x128xf32>
    %266 = arith.mulf %257, %204 : vector<2x128xf32>
    %267 = arith.addf %265, %266 : vector<2x128xf32>
    %268 = vector.extract_strided_slice %7 {offsets = [0, 4, 0], sizes = [2, 1, 384], strides = [1, 1, 1]} : vector<2x8x384xf32> to vector<2x1x384xf32>
    %269 = vector.shape_cast %268 : vector<2x1x384xf32> to vector<2x384xf32>
    %cst_56 = arith.constant dense<0.000000e+00> : vector<2x384xf32>
    %270 = tpu.matmul %235, %8, %cst_56 {dimension_numbers = #tpu.dot_dimension_numbers<[1], [0], [0], [1], [0, 0, 1, 1], [], []>} : vector<2x128xf32>, vector<128x384xf32>, vector<2x384xf32> -> vector<2x384xf32>
    %271 = vector.broadcast %9 : vector<1x384xf32> to vector<2x384xf32>
    %272 = arith.addf %270, %271 : vector<2x384xf32>
    %273 = vector.extract_strided_slice %269 {offsets = [0, 0], sizes = [2, 128], strides = [1, 1]} : vector<2x384xf32> to vector<2x128xf32>
    %274 = vector.extract_strided_slice %272 {offsets = [0, 0], sizes = [2, 128], strides = [1, 1]} : vector<2x384xf32> to vector<2x128xf32>
    %275 = arith.addf %273, %274 : vector<2x128xf32>
    %276 = arith.negf %275 : vector<2x128xf32>
    %277 = math.exp %276 : vector<2x128xf32>
    %cst_57 = arith.constant 1.000000e+00 : f32
    %278 = vector.broadcast %cst_57 : f32 to vector<2x128xf32>
    %279 = arith.addf %278, %277 : vector<2x128xf32>
    %280 = arith.divf %278, %279 : vector<2x128xf32>
    %281 = vector.extract_strided_slice %269 {offsets = [0, 128], sizes = [2, 128], strides = [1, 1]} : vector<2x384xf32> to vector<2x128xf32>
    %282 = vector.extract_strided_slice %272 {offsets = [0, 128], sizes = [2, 128], strides = [1, 1]} : vector<2x384xf32> to vector<2x128xf32>
    %283 = arith.addf %281, %282 : vector<2x128xf32>
    %284 = arith.negf %283 : vector<2x128xf32>
    %285 = math.exp %284 : vector<2x128xf32>
    %cst_58 = arith.constant 1.000000e+00 : f32
    %286 = vector.broadcast %cst_58 : f32 to vector<2x128xf32>
    %287 = arith.addf %286, %285 : vector<2x128xf32>
    %288 = arith.divf %286, %287 : vector<2x128xf32>
    %289 = vector.extract_strided_slice %269 {offsets = [0, 256], sizes = [2, 128], strides = [1, 1]} : vector<2x384xf32> to vector<2x128xf32>
    %290 = vector.extract_strided_slice %272 {offsets = [0, 256], sizes = [2, 128], strides = [1, 1]} : vector<2x384xf32> to vector<2x128xf32>
    %291 = arith.mulf %280, %290 : vector<2x128xf32>
    %292 = arith.addf %289, %291 : vector<2x128xf32>
    %293 = math.tanh %292 : vector<2x128xf32>
    %cst_59 = arith.constant 1.000000e+00 : f32
    %294 = vector.broadcast %cst_59 : f32 to vector<2x128xf32>
    %295 = arith.subf %294, %288 : vector<2x128xf32>
    %296 = arith.mulf %295, %293 : vector<2x128xf32>
    %297 = arith.mulf %288, %235 : vector<2x128xf32>
    %298 = arith.addf %296, %297 : vector<2x128xf32>
    %cst_60 = arith.constant dense<0.000000e+00> : vector<2x384xf32>
    %299 = tpu.matmul %298, %10, %cst_60 {dimension_numbers = #tpu.dot_dimension_numbers<[1], [0], [0], [1], [0, 0, 1, 1], [], []>} : vector<2x128xf32>, vector<128x384xf32>, vector<2x384xf32> -> vector<2x384xf32>
    %300 = vector.broadcast %11 : vector<1x384xf32> to vector<2x384xf32>
    %301 = arith.addf %299, %300 : vector<2x384xf32>
    %cst_61 = arith.constant dense<0.000000e+00> : vector<2x384xf32>
    %302 = tpu.matmul %267, %12, %cst_61 {dimension_numbers = #tpu.dot_dimension_numbers<[1], [0], [0], [1], [0, 0, 1, 1], [], []>} : vector<2x128xf32>, vector<128x384xf32>, vector<2x384xf32> -> vector<2x384xf32>
    %303 = vector.broadcast %13 : vector<1x384xf32> to vector<2x384xf32>
    %304 = arith.addf %302, %303 : vector<2x384xf32>
    %305 = vector.extract_strided_slice %301 {offsets = [0, 0], sizes = [2, 128], strides = [1, 1]} : vector<2x384xf32> to vector<2x128xf32>
    %306 = vector.extract_strided_slice %304 {offsets = [0, 0], sizes = [2, 128], strides = [1, 1]} : vector<2x384xf32> to vector<2x128xf32>
    %307 = arith.addf %305, %306 : vector<2x128xf32>
    %308 = arith.negf %307 : vector<2x128xf32>
    %309 = math.exp %308 : vector<2x128xf32>
    %cst_62 = arith.constant 1.000000e+00 : f32
    %310 = vector.broadcast %cst_62 : f32 to vector<2x128xf32>
    %311 = arith.addf %310, %309 : vector<2x128xf32>
    %312 = arith.divf %310, %311 : vector<2x128xf32>
    %313 = vector.extract_strided_slice %301 {offsets = [0, 128], sizes = [2, 128], strides = [1, 1]} : vector<2x384xf32> to vector<2x128xf32>
    %314 = vector.extract_strided_slice %304 {offsets = [0, 128], sizes = [2, 128], strides = [1, 1]} : vector<2x384xf32> to vector<2x128xf32>
    %315 = arith.addf %313, %314 : vector<2x128xf32>
    %316 = arith.negf %315 : vector<2x128xf32>
    %317 = math.exp %316 : vector<2x128xf32>
    %cst_63 = arith.constant 1.000000e+00 : f32
    %318 = vector.broadcast %cst_63 : f32 to vector<2x128xf32>
    %319 = arith.addf %318, %317 : vector<2x128xf32>
    %320 = arith.divf %318, %319 : vector<2x128xf32>
    %321 = vector.extract_strided_slice %301 {offsets = [0, 256], sizes = [2, 128], strides = [1, 1]} : vector<2x384xf32> to vector<2x128xf32>
    %322 = vector.extract_strided_slice %304 {offsets = [0, 256], sizes = [2, 128], strides = [1, 1]} : vector<2x384xf32> to vector<2x128xf32>
    %323 = arith.mulf %312, %322 : vector<2x128xf32>
    %324 = arith.addf %321, %323 : vector<2x128xf32>
    %325 = math.tanh %324 : vector<2x128xf32>
    %cst_64 = arith.constant 1.000000e+00 : f32
    %326 = vector.broadcast %cst_64 : f32 to vector<2x128xf32>
    %327 = arith.subf %326, %320 : vector<2x128xf32>
    %328 = arith.mulf %327, %325 : vector<2x128xf32>
    %329 = arith.mulf %320, %267 : vector<2x128xf32>
    %330 = arith.addf %328, %329 : vector<2x128xf32>
    %331 = vector.extract_strided_slice %7 {offsets = [0, 5, 0], sizes = [2, 1, 384], strides = [1, 1, 1]} : vector<2x8x384xf32> to vector<2x1x384xf32>
    %332 = vector.shape_cast %331 : vector<2x1x384xf32> to vector<2x384xf32>
    %cst_65 = arith.constant dense<0.000000e+00> : vector<2x384xf32>
    %333 = tpu.matmul %298, %8, %cst_65 {dimension_numbers = #tpu.dot_dimension_numbers<[1], [0], [0], [1], [0, 0, 1, 1], [], []>} : vector<2x128xf32>, vector<128x384xf32>, vector<2x384xf32> -> vector<2x384xf32>
    %334 = vector.broadcast %9 : vector<1x384xf32> to vector<2x384xf32>
    %335 = arith.addf %333, %334 : vector<2x384xf32>
    %336 = vector.extract_strided_slice %332 {offsets = [0, 0], sizes = [2, 128], strides = [1, 1]} : vector<2x384xf32> to vector<2x128xf32>
    %337 = vector.extract_strided_slice %335 {offsets = [0, 0], sizes = [2, 128], strides = [1, 1]} : vector<2x384xf32> to vector<2x128xf32>
    %338 = arith.addf %336, %337 : vector<2x128xf32>
    %339 = arith.negf %338 : vector<2x128xf32>
    %340 = math.exp %339 : vector<2x128xf32>
    %cst_66 = arith.constant 1.000000e+00 : f32
    %341 = vector.broadcast %cst_66 : f32 to vector<2x128xf32>
    %342 = arith.addf %341, %340 : vector<2x128xf32>
    %343 = arith.divf %341, %342 : vector<2x128xf32>
    %344 = vector.extract_strided_slice %332 {offsets = [0, 128], sizes = [2, 128], strides = [1, 1]} : vector<2x384xf32> to vector<2x128xf32>
    %345 = vector.extract_strided_slice %335 {offsets = [0, 128], sizes = [2, 128], strides = [1, 1]} : vector<2x384xf32> to vector<2x128xf32>
    %346 = arith.addf %344, %345 : vector<2x128xf32>
    %347 = arith.negf %346 : vector<2x128xf32>
    %348 = math.exp %347 : vector<2x128xf32>
    %cst_67 = arith.constant 1.000000e+00 : f32
    %349 = vector.broadcast %cst_67 : f32 to vector<2x128xf32>
    %350 = arith.addf %349, %348 : vector<2x128xf32>
    %351 = arith.divf %349, %350 : vector<2x128xf32>
    %352 = vector.extract_strided_slice %332 {offsets = [0, 256], sizes = [2, 128], strides = [1, 1]} : vector<2x384xf32> to vector<2x128xf32>
    %353 = vector.extract_strided_slice %335 {offsets = [0, 256], sizes = [2, 128], strides = [1, 1]} : vector<2x384xf32> to vector<2x128xf32>
    %354 = arith.mulf %343, %353 : vector<2x128xf32>
    %355 = arith.addf %352, %354 : vector<2x128xf32>
    %356 = math.tanh %355 : vector<2x128xf32>
    %cst_68 = arith.constant 1.000000e+00 : f32
    %357 = vector.broadcast %cst_68 : f32 to vector<2x128xf32>
    %358 = arith.subf %357, %351 : vector<2x128xf32>
    %359 = arith.mulf %358, %356 : vector<2x128xf32>
    %360 = arith.mulf %351, %298 : vector<2x128xf32>
    %361 = arith.addf %359, %360 : vector<2x128xf32>
    %cst_69 = arith.constant dense<0.000000e+00> : vector<2x384xf32>
    %362 = tpu.matmul %361, %10, %cst_69 {dimension_numbers = #tpu.dot_dimension_numbers<[1], [0], [0], [1], [0, 0, 1, 1], [], []>} : vector<2x128xf32>, vector<128x384xf32>, vector<2x384xf32> -> vector<2x384xf32>
    %363 = vector.broadcast %11 : vector<1x384xf32> to vector<2x384xf32>
    %364 = arith.addf %362, %363 : vector<2x384xf32>
    %cst_70 = arith.constant dense<0.000000e+00> : vector<2x384xf32>
    %365 = tpu.matmul %330, %12, %cst_70 {dimension_numbers = #tpu.dot_dimension_numbers<[1], [0], [0], [1], [0, 0, 1, 1], [], []>} : vector<2x128xf32>, vector<128x384xf32>, vector<2x384xf32> -> vector<2x384xf32>
    %366 = vector.broadcast %13 : vector<1x384xf32> to vector<2x384xf32>
    %367 = arith.addf %365, %366 : vector<2x384xf32>
    %368 = vector.extract_strided_slice %364 {offsets = [0, 0], sizes = [2, 128], strides = [1, 1]} : vector<2x384xf32> to vector<2x128xf32>
    %369 = vector.extract_strided_slice %367 {offsets = [0, 0], sizes = [2, 128], strides = [1, 1]} : vector<2x384xf32> to vector<2x128xf32>
    %370 = arith.addf %368, %369 : vector<2x128xf32>
    %371 = arith.negf %370 : vector<2x128xf32>
    %372 = math.exp %371 : vector<2x128xf32>
    %cst_71 = arith.constant 1.000000e+00 : f32
    %373 = vector.broadcast %cst_71 : f32 to vector<2x128xf32>
    %374 = arith.addf %373, %372 : vector<2x128xf32>
    %375 = arith.divf %373, %374 : vector<2x128xf32>
    %376 = vector.extract_strided_slice %364 {offsets = [0, 128], sizes = [2, 128], strides = [1, 1]} : vector<2x384xf32> to vector<2x128xf32>
    %377 = vector.extract_strided_slice %367 {offsets = [0, 128], sizes = [2, 128], strides = [1, 1]} : vector<2x384xf32> to vector<2x128xf32>
    %378 = arith.addf %376, %377 : vector<2x128xf32>
    %379 = arith.negf %378 : vector<2x128xf32>
    %380 = math.exp %379 : vector<2x128xf32>
    %cst_72 = arith.constant 1.000000e+00 : f32
    %381 = vector.broadcast %cst_72 : f32 to vector<2x128xf32>
    %382 = arith.addf %381, %380 : vector<2x128xf32>
    %383 = arith.divf %381, %382 : vector<2x128xf32>
    %384 = vector.extract_strided_slice %364 {offsets = [0, 256], sizes = [2, 128], strides = [1, 1]} : vector<2x384xf32> to vector<2x128xf32>
    %385 = vector.extract_strided_slice %367 {offsets = [0, 256], sizes = [2, 128], strides = [1, 1]} : vector<2x384xf32> to vector<2x128xf32>
    %386 = arith.mulf %375, %385 : vector<2x128xf32>
    %387 = arith.addf %384, %386 : vector<2x128xf32>
    %388 = math.tanh %387 : vector<2x128xf32>
    %cst_73 = arith.constant 1.000000e+00 : f32
    %389 = vector.broadcast %cst_73 : f32 to vector<2x128xf32>
    %390 = arith.subf %389, %383 : vector<2x128xf32>
    %391 = arith.mulf %390, %388 : vector<2x128xf32>
    %392 = arith.mulf %383, %330 : vector<2x128xf32>
    %393 = arith.addf %391, %392 : vector<2x128xf32>
    %394 = vector.extract_strided_slice %7 {offsets = [0, 6, 0], sizes = [2, 1, 384], strides = [1, 1, 1]} : vector<2x8x384xf32> to vector<2x1x384xf32>
    %395 = vector.shape_cast %394 : vector<2x1x384xf32> to vector<2x384xf32>
    %cst_74 = arith.constant dense<0.000000e+00> : vector<2x384xf32>
    %396 = tpu.matmul %361, %8, %cst_74 {dimension_numbers = #tpu.dot_dimension_numbers<[1], [0], [0], [1], [0, 0, 1, 1], [], []>} : vector<2x128xf32>, vector<128x384xf32>, vector<2x384xf32> -> vector<2x384xf32>
    %397 = vector.broadcast %9 : vector<1x384xf32> to vector<2x384xf32>
    %398 = arith.addf %396, %397 : vector<2x384xf32>
    %399 = vector.extract_strided_slice %395 {offsets = [0, 0], sizes = [2, 128], strides = [1, 1]} : vector<2x384xf32> to vector<2x128xf32>
    %400 = vector.extract_strided_slice %398 {offsets = [0, 0], sizes = [2, 128], strides = [1, 1]} : vector<2x384xf32> to vector<2x128xf32>
    %401 = arith.addf %399, %400 : vector<2x128xf32>
    %402 = arith.negf %401 : vector<2x128xf32>
    %403 = math.exp %402 : vector<2x128xf32>
    %cst_75 = arith.constant 1.000000e+00 : f32
    %404 = vector.broadcast %cst_75 : f32 to vector<2x128xf32>
    %405 = arith.addf %404, %403 : vector<2x128xf32>
    %406 = arith.divf %404, %405 : vector<2x128xf32>
    %407 = vector.extract_strided_slice %395 {offsets = [0, 128], sizes = [2, 128], strides = [1, 1]} : vector<2x384xf32> to vector<2x128xf32>
    %408 = vector.extract_strided_slice %398 {offsets = [0, 128], sizes = [2, 128], strides = [1, 1]} : vector<2x384xf32> to vector<2x128xf32>
    %409 = arith.addf %407, %408 : vector<2x128xf32>
    %410 = arith.negf %409 : vector<2x128xf32>
    %411 = math.exp %410 : vector<2x128xf32>
    %cst_76 = arith.constant 1.000000e+00 : f32
    %412 = vector.broadcast %cst_76 : f32 to vector<2x128xf32>
    %413 = arith.addf %412, %411 : vector<2x128xf32>
    %414 = arith.divf %412, %413 : vector<2x128xf32>
    %415 = vector.extract_strided_slice %395 {offsets = [0, 256], sizes = [2, 128], strides = [1, 1]} : vector<2x384xf32> to vector<2x128xf32>
    %416 = vector.extract_strided_slice %398 {offsets = [0, 256], sizes = [2, 128], strides = [1, 1]} : vector<2x384xf32> to vector<2x128xf32>
    %417 = arith.mulf %406, %416 : vector<2x128xf32>
    %418 = arith.addf %415, %417 : vector<2x128xf32>
    %419 = math.tanh %418 : vector<2x128xf32>
    %cst_77 = arith.constant 1.000000e+00 : f32
    %420 = vector.broadcast %cst_77 : f32 to vector<2x128xf32>
    %421 = arith.subf %420, %414 : vector<2x128xf32>
    %422 = arith.mulf %421, %419 : vector<2x128xf32>
    %423 = arith.mulf %414, %361 : vector<2x128xf32>
    %424 = arith.addf %422, %423 : vector<2x128xf32>
    %cst_78 = arith.constant dense<0.000000e+00> : vector<2x384xf32>
    %425 = tpu.matmul %424, %10, %cst_78 {dimension_numbers = #tpu.dot_dimension_numbers<[1], [0], [0], [1], [0, 0, 1, 1], [], []>} : vector<2x128xf32>, vector<128x384xf32>, vector<2x384xf32> -> vector<2x384xf32>
    %426 = vector.broadcast %11 : vector<1x384xf32> to vector<2x384xf32>
    %427 = arith.addf %425, %426 : vector<2x384xf32>
    %cst_79 = arith.constant dense<0.000000e+00> : vector<2x384xf32>
    %428 = tpu.matmul %393, %12, %cst_79 {dimension_numbers = #tpu.dot_dimension_numbers<[1], [0], [0], [1], [0, 0, 1, 1], [], []>} : vector<2x128xf32>, vector<128x384xf32>, vector<2x384xf32> -> vector<2x384xf32>
    %429 = vector.broadcast %13 : vector<1x384xf32> to vector<2x384xf32>
    %430 = arith.addf %428, %429 : vector<2x384xf32>
    %431 = vector.extract_strided_slice %427 {offsets = [0, 0], sizes = [2, 128], strides = [1, 1]} : vector<2x384xf32> to vector<2x128xf32>
    %432 = vector.extract_strided_slice %430 {offsets = [0, 0], sizes = [2, 128], strides = [1, 1]} : vector<2x384xf32> to vector<2x128xf32>
    %433 = arith.addf %431, %432 : vector<2x128xf32>
    %434 = arith.negf %433 : vector<2x128xf32>
    %435 = math.exp %434 : vector<2x128xf32>
    %cst_80 = arith.constant 1.000000e+00 : f32
    %436 = vector.broadcast %cst_80 : f32 to vector<2x128xf32>
    %437 = arith.addf %436, %435 : vector<2x128xf32>
    %438 = arith.divf %436, %437 : vector<2x128xf32>
    %439 = vector.extract_strided_slice %427 {offsets = [0, 128], sizes = [2, 128], strides = [1, 1]} : vector<2x384xf32> to vector<2x128xf32>
    %440 = vector.extract_strided_slice %430 {offsets = [0, 128], sizes = [2, 128], strides = [1, 1]} : vector<2x384xf32> to vector<2x128xf32>
    %441 = arith.addf %439, %440 : vector<2x128xf32>
    %442 = arith.negf %441 : vector<2x128xf32>
    %443 = math.exp %442 : vector<2x128xf32>
    %cst_81 = arith.constant 1.000000e+00 : f32
    %444 = vector.broadcast %cst_81 : f32 to vector<2x128xf32>
    %445 = arith.addf %444, %443 : vector<2x128xf32>
    %446 = arith.divf %444, %445 : vector<2x128xf32>
    %447 = vector.extract_strided_slice %427 {offsets = [0, 256], sizes = [2, 128], strides = [1, 1]} : vector<2x384xf32> to vector<2x128xf32>
    %448 = vector.extract_strided_slice %430 {offsets = [0, 256], sizes = [2, 128], strides = [1, 1]} : vector<2x384xf32> to vector<2x128xf32>
    %449 = arith.mulf %438, %448 : vector<2x128xf32>
    %450 = arith.addf %447, %449 : vector<2x128xf32>
    %451 = math.tanh %450 : vector<2x128xf32>
    %cst_82 = arith.constant 1.000000e+00 : f32
    %452 = vector.broadcast %cst_82 : f32 to vector<2x128xf32>
    %453 = arith.subf %452, %446 : vector<2x128xf32>
    %454 = arith.mulf %453, %451 : vector<2x128xf32>
    %455 = arith.mulf %446, %393 : vector<2x128xf32>
    %456 = arith.addf %454, %455 : vector<2x128xf32>
    %457 = vector.extract_strided_slice %7 {offsets = [0, 7, 0], sizes = [2, 1, 384], strides = [1, 1, 1]} : vector<2x8x384xf32> to vector<2x1x384xf32>
    %458 = vector.shape_cast %457 : vector<2x1x384xf32> to vector<2x384xf32>
    %cst_83 = arith.constant dense<0.000000e+00> : vector<2x384xf32>
    %459 = tpu.matmul %424, %8, %cst_83 {dimension_numbers = #tpu.dot_dimension_numbers<[1], [0], [0], [1], [0, 0, 1, 1], [], []>} : vector<2x128xf32>, vector<128x384xf32>, vector<2x384xf32> -> vector<2x384xf32>
    %460 = vector.broadcast %9 : vector<1x384xf32> to vector<2x384xf32>
    %461 = arith.addf %459, %460 : vector<2x384xf32>
    %462 = vector.extract_strided_slice %458 {offsets = [0, 0], sizes = [2, 128], strides = [1, 1]} : vector<2x384xf32> to vector<2x128xf32>
    %463 = vector.extract_strided_slice %461 {offsets = [0, 0], sizes = [2, 128], strides = [1, 1]} : vector<2x384xf32> to vector<2x128xf32>
    %464 = arith.addf %462, %463 : vector<2x128xf32>
    %465 = arith.negf %464 : vector<2x128xf32>
    %466 = math.exp %465 : vector<2x128xf32>
    %cst_84 = arith.constant 1.000000e+00 : f32
    %467 = vector.broadcast %cst_84 : f32 to vector<2x128xf32>
    %468 = arith.addf %467, %466 : vector<2x128xf32>
    %469 = arith.divf %467, %468 : vector<2x128xf32>
    %470 = vector.extract_strided_slice %458 {offsets = [0, 128], sizes = [2, 128], strides = [1, 1]} : vector<2x384xf32> to vector<2x128xf32>
    %471 = vector.extract_strided_slice %461 {offsets = [0, 128], sizes = [2, 128], strides = [1, 1]} : vector<2x384xf32> to vector<2x128xf32>
    %472 = arith.addf %470, %471 : vector<2x128xf32>
    %473 = arith.negf %472 : vector<2x128xf32>
    %474 = math.exp %473 : vector<2x128xf32>
    %cst_85 = arith.constant 1.000000e+00 : f32
    %475 = vector.broadcast %cst_85 : f32 to vector<2x128xf32>
    %476 = arith.addf %475, %474 : vector<2x128xf32>
    %477 = arith.divf %475, %476 : vector<2x128xf32>
    %478 = vector.extract_strided_slice %458 {offsets = [0, 256], sizes = [2, 128], strides = [1, 1]} : vector<2x384xf32> to vector<2x128xf32>
    %479 = vector.extract_strided_slice %461 {offsets = [0, 256], sizes = [2, 128], strides = [1, 1]} : vector<2x384xf32> to vector<2x128xf32>
    %480 = arith.mulf %469, %479 : vector<2x128xf32>
    %481 = arith.addf %478, %480 : vector<2x128xf32>
    %482 = math.tanh %481 : vector<2x128xf32>
    %cst_86 = arith.constant 1.000000e+00 : f32
    %483 = vector.broadcast %cst_86 : f32 to vector<2x128xf32>
    %484 = arith.subf %483, %477 : vector<2x128xf32>
    %485 = arith.mulf %484, %482 : vector<2x128xf32>
    %486 = arith.mulf %477, %424 : vector<2x128xf32>
    %487 = arith.addf %485, %486 : vector<2x128xf32>
    %cst_87 = arith.constant dense<0.000000e+00> : vector<2x384xf32>
    %488 = tpu.matmul %487, %10, %cst_87 {dimension_numbers = #tpu.dot_dimension_numbers<[1], [0], [0], [1], [0, 0, 1, 1], [], []>} : vector<2x128xf32>, vector<128x384xf32>, vector<2x384xf32> -> vector<2x384xf32>
    %489 = vector.broadcast %11 : vector<1x384xf32> to vector<2x384xf32>
    %490 = arith.addf %488, %489 : vector<2x384xf32>
    %cst_88 = arith.constant dense<0.000000e+00> : vector<2x384xf32>
    %491 = tpu.matmul %456, %12, %cst_88 {dimension_numbers = #tpu.dot_dimension_numbers<[1], [0], [0], [1], [0, 0, 1, 1], [], []>} : vector<2x128xf32>, vector<128x384xf32>, vector<2x384xf32> -> vector<2x384xf32>
    %492 = vector.broadcast %13 : vector<1x384xf32> to vector<2x384xf32>
    %493 = arith.addf %491, %492 : vector<2x384xf32>
    %494 = vector.extract_strided_slice %490 {offsets = [0, 0], sizes = [2, 128], strides = [1, 1]} : vector<2x384xf32> to vector<2x128xf32>
    %495 = vector.extract_strided_slice %493 {offsets = [0, 0], sizes = [2, 128], strides = [1, 1]} : vector<2x384xf32> to vector<2x128xf32>
    %496 = arith.addf %494, %495 : vector<2x128xf32>
    %497 = arith.negf %496 : vector<2x128xf32>
    %498 = math.exp %497 : vector<2x128xf32>
    %cst_89 = arith.constant 1.000000e+00 : f32
    %499 = vector.broadcast %cst_89 : f32 to vector<2x128xf32>
    %500 = arith.addf %499, %498 : vector<2x128xf32>
    %501 = arith.divf %499, %500 : vector<2x128xf32>
    %502 = vector.extract_strided_slice %490 {offsets = [0, 128], sizes = [2, 128], strides = [1, 1]} : vector<2x384xf32> to vector<2x128xf32>
    %503 = vector.extract_strided_slice %493 {offsets = [0, 128], sizes = [2, 128], strides = [1, 1]} : vector<2x384xf32> to vector<2x128xf32>
    %504 = arith.addf %502, %503 : vector<2x128xf32>
    %505 = arith.negf %504 : vector<2x128xf32>
    %506 = math.exp %505 : vector<2x128xf32>
    %cst_90 = arith.constant 1.000000e+00 : f32
    %507 = vector.broadcast %cst_90 : f32 to vector<2x128xf32>
    %508 = arith.addf %507, %506 : vector<2x128xf32>
    %509 = arith.divf %507, %508 : vector<2x128xf32>
    %510 = vector.extract_strided_slice %490 {offsets = [0, 256], sizes = [2, 128], strides = [1, 1]} : vector<2x384xf32> to vector<2x128xf32>
    %511 = vector.extract_strided_slice %493 {offsets = [0, 256], sizes = [2, 128], strides = [1, 1]} : vector<2x384xf32> to vector<2x128xf32>
    %512 = arith.mulf %501, %511 : vector<2x128xf32>
    %513 = arith.addf %510, %512 : vector<2x128xf32>
    %514 = math.tanh %513 : vector<2x128xf32>
    %cst_91 = arith.constant 1.000000e+00 : f32
    %515 = vector.broadcast %cst_91 : f32 to vector<2x128xf32>
    %516 = arith.subf %515, %509 : vector<2x128xf32>
    %517 = arith.mulf %516, %514 : vector<2x128xf32>
    %518 = arith.mulf %509, %456 : vector<2x128xf32>
    %519 = arith.addf %517, %518 : vector<2x128xf32>
    %c0_92 = arith.constant 0 : index
    %c0_93 = arith.constant 0 : index
    %520 = vector.load %arg10[%c0_92, %c0_93] : memref<128x128xf32, #tpu.memory_space<vmem>>, vector<128x128xf32>
    %cst_94 = arith.constant dense<0.000000e+00> : vector<2x128xf32>
    %521 = tpu.matmul %519, %520, %cst_94 {dimension_numbers = #tpu.dot_dimension_numbers<[1], [0], [0], [1], [0, 0, 1, 1], [], []>} : vector<2x128xf32>, vector<128x128xf32>, vector<2x128xf32> -> vector<2x128xf32>
    %c0_95 = arith.constant 0 : index
    %c0_96 = arith.constant 0 : index
    %522 = vector.load %arg11[%c0_95, %c0_96] : memref<1x128xf32, #tpu.memory_space<vmem>>, vector<1x128xf32>
    %523 = vector.broadcast %522 : vector<1x128xf32> to vector<2x128xf32>
    %524 = arith.addf %521, %523 : vector<2x128xf32>
    %c0_97 = arith.constant 0 : index
    %c0_98 = arith.constant 0 : index
    %525 = vector.load %arg12[%c0_97, %c0_98] : memref<2x128xf32, #tpu.memory_space<vmem>>, vector<2x128xf32>
    tpu.vector_store %arg12[%c0_97, %c0_98], %524 {strides = array<i32>} : memref<2x128xf32, #tpu.memory_space<vmem>>, vector<2x128xf32>,
    return
  }
  func.func @transform_0(%arg0: i32) -> (i32, i32, i32) {
    %c0_i32 = arith.constant 0 : i32
    %c0_i32_0 = arith.constant 0 : i32
    %c0_i32_1 = arith.constant 0 : i32
    %c0_i32_2 = arith.constant 0 : i32
    return %c0_i32, %c0_i32_0, %c0_i32_1 : i32, i32, i32
  }
  func.func @transform_1(%arg0: i32) -> (i32, i32) {
    %c0_i32 = arith.constant 0 : i32
    %c0_i32_0 = arith.constant 0 : i32
    %c0_i32_1 = arith.constant 0 : i32
    return %c0_i32, %c0_i32_0 : i32, i32
  }
  func.func @transform_2(%arg0: i32) -> (i32, i32) {
    %c0_i32 = arith.constant 0 : i32
    %c0_i32_0 = arith.constant 0 : i32
    %c0_i32_1 = arith.constant 0 : i32
    return %c0_i32, %c0_i32_0 : i32, i32
  }
  func.func @transform_3(%arg0: i32) -> (i32, i32) {
    %c0_i32 = arith.constant 0 : i32
    %c0_i32_0 = arith.constant 0 : i32
    %c0_i32_1 = arith.constant 0 : i32
    return %c0_i32, %c0_i32_0 : i32, i32
  }
  func.func @transform_4(%arg0: i32) -> (i32, i32) {
    %c0_i32 = arith.constant 0 : i32
    %c0_i32_0 = arith.constant 0 : i32
    %c0_i32_1 = arith.constant 0 : i32
    return %c0_i32, %c0_i32_0 : i32, i32
  }
  func.func @transform_5(%arg0: i32) -> (i32, i32) {
    %c0_i32 = arith.constant 0 : i32
    %c0_i32_0 = arith.constant 0 : i32
    %c0_i32_1 = arith.constant 0 : i32
    return %c0_i32, %c0_i32_0 : i32, i32
  }
  func.func @transform_6(%arg0: i32) -> (i32, i32) {
    %c0_i32 = arith.constant 0 : i32
    %c0_i32_0 = arith.constant 0 : i32
    %c0_i32_1 = arith.constant 0 : i32
    return %c0_i32, %c0_i32_0 : i32, i32
  }
  func.func @transform_7(%arg0: i32) -> (i32, i32) {
    %c0_i32 = arith.constant 0 : i32
    %c0_i32_0 = arith.constant 0 : i32
    %c0_i32_1 = arith.constant 0 : i32
    return %c0_i32, %c0_i32_0 : i32, i32
  }
  func.func @transform_8(%arg0: i32) -> (i32, i32) {
    %c0_i32 = arith.constant 0 : i32
    %c0_i32_0 = arith.constant 0 : i32
    %c0_i32_1 = arith.constant 0 : i32
    return %c0_i32, %c0_i32_0 : i32, i32
  }
  func.func @transform_9(%arg0: i32) -> (i32, i32) {
    %c0_i32 = arith.constant 0 : i32
    %c0_i32_0 = arith.constant 0 : i32
    %c0_i32_1 = arith.constant 0 : i32
    return %c0_i32, %c0_i32_0 : i32, i32
  }
  func.func @transform_10(%arg0: i32) -> (i32, i32) {
    %c0_i32 = arith.constant 0 : i32
    %c0_i32_0 = arith.constant 0 : i32
    %c0_i32_1 = arith.constant 0 : i32
    return %c0_i32, %c0_i32_0 : i32, i32
  }
  func.func @transform_11(%arg0: i32) -> (i32, i32) {
    %c0_i32 = arith.constant 0 : i32
    %c0_i32_0 = arith.constant 0 : i32
    %c0_i32_1 = arith.constant 0 : i32
    return %c0_i32, %c0_i32_0 : i32, i32
  }
}

</mosaic_0001>

<bundles_post_ra>
// kernel: tpu_custom_call.1
= control target key start
LH: loop header
LB: loop body
LE: loop exit
PB: predicated region body
PF: predicated region fallthrough
CT: control target
= control target key end

     0   :  { %16 = vsyncpa [#allocation3], 0  ;;  %s9299_s0 = inlined_call_operand.vmem [shape: f32[2,8,4], index: 0, kind: input, shape index: {}]   ;;  %s9300_s1 = inlined_call_operand.vmem [shape: f32[4,384], index: 1, kind: input, shape index: {}]   ;;  %s9301_s2 = inlined_call_operand.hbm [shape: f32[128,384], index: 2, kind: input, shape index: {}]   ;;  %s9302_s3 = inlined_call_operand.vmem [shape: f32[1,384], index: 3, kind: input, shape index: {}]   ;;  %s9303_s4 = inlined_call_operand.vmem [shape: f32[1,384], index: 4, kind: input, shape index: {}]   ;;  %s9304_s5 = inlined_call_operand.hbm [shape: f32[128,384], index: 5, kind: input, shape index: {}]   ;;  %s9305_s6 = inlined_call_operand.hbm [shape: f32[128,384], index: 6, kind: input, shape index: {}]   ;;  %s9306_s7 = inlined_call_operand.vmem [shape: f32[1,384], index: 7, kind: input, shape index: {}]   ;;  %s9307_s8 = inlined_call_operand.vmem [shape: f32[1,384], index: 8, kind: input, shape index: {}]   ;;  %s9308_s9 = inlined_call_operand.hbm [shape: f32[128,128], index: 9, kind: input, shape index: {}]   ;;  %s9309_s10 = inlined_call_operand.vmem [shape: f32[1,128], index: 10, kind: input, shape index: {}]   ;;  %s9310_s11 = inlined_call_operand.hbm [shape: f32[2,128], index: 11, kind: output, shape index: {}]  }
   0x1   :  { %17 = vsyncpa [#allocation6], 0 }
   0x2   :  { %18 = vsyncpa [#allocation9], 0 }
   0x3   :  { %19 = vsyncpa [#allocation4], 0  ;;  %s7817_s17 = smov [#allocation5]   ;;  %s7818_s19 = smov [#allocation2]  }
   0x4   :  { %s45_s18 = sshll.u32 %s7817_s17, 4  ;;  %s29_s20 = sshll.u32 %s7818_s19, 4  ;;  %s46_s18 = int_to_ptr.vmem [resolvable:$true] %s45_s18  ;;  %s7889_s20 = int_to_ptr.vmem [resolvable:$true] %s29_s20 }
   0x5   :  { %s7699_s23 = scalar_lea.hbm %s9304_s5, 6144 }
   0x6   :  { %p7700_p0 = scmp.ne.s32.totalorder %s9304_s5, %s7699_s23  ;;  %p7703_p1 = scmp.lt.u32.totalorder %s7699_s23, %s9304_s5 }
   0x8   :  { %p7705_p2 = pnand %p7703_p1, %p7700_p0 }
   0xa   :  { %7708 = shalt.err (!%p7705_p2)
}
   0xb   :  { %s7709_s28 = scalar_lea.vmem %s46_s18, 6144  ;;  %p7714_p4 = scmp.lt.s32.totalorder %s46_s18, %s46_s18 }
   0xc   :  { %p7710_p3 = scmp.ne.s32.totalorder %s46_s18, %s7709_s28  ;;  %p7715_p5 = scmp.lt.s32.totalorder %s7709_s28, %s7709_s28 }
   0xe   :  { %p7716_p6 = por %p7715_p5, %p7714_p4 }
  0x10   :  { %p7717_p7 = pnand %p7716_p6, %p7710_p3 }
  0x12   :  { %7720 = shalt.err (!%p7717_p7)
}
  0x13   :  { %s7819_s29 = smov 384   ;;  %s7820_s30 = smov 24  }
  0x14   :  { %51 = dma.hbm_to_vmem [thread:$0]  %s9304_s5, 6144, %s46_s18, [#allocation6], %s7819_s29, %s7819_s29, %s7820_s30  }
  0x15   :  { %s7721_s16 = scalar_lea.hbm %s9301_s2, 6144 }
  0x16   :  { %p7722_p8 = scmp.ne.s32.totalorder %s9301_s2, %s7721_s16  ;;  %p7725_p9 = scmp.lt.u32.totalorder %s7721_s16, %s9301_s2 }
  0x18   :  { %p7727_p10 = pnand %p7725_p9, %p7722_p8 }
  0x1a   :  { %7730 = shalt.err (!%p7727_p10)
}
  0x1b   :  { %s7731_s23 = scalar_lea.vmem %s7889_s20, 6144  ;;  %p7736_p12 = scmp.lt.s32.totalorder %s7889_s20, %s7889_s20 }
  0x1c   :  { %p7732_p11 = scmp.ne.s32.totalorder %s7889_s20, %s7731_s23  ;;  %p7737_p13 = scmp.lt.s32.totalorder %s7731_s23, %s7731_s23 }
  0x1e   :  { %p7738_p0 = por %p7737_p13, %p7736_p12 }
  0x20   :  { %p7739_p1 = pnand %p7738_p0, %p7732_p11 }
  0x22   :  { %7742 = shalt.err (!%p7739_p1)
}
  0x23   :  { %35 = dma.hbm_to_vmem [thread:$0]  %s9301_s2, 6144, %s7889_s20, [#allocation3], %s7819_s29, %s7819_s29, %s7820_s30  }
  0x24   :  { %s7821_s24 = smov [#allocation7]   ;;  %s7822_s26 = smov [#allocation8]  }
  0x25   :  { %s57_s25 = sshll.u32 %s7821_s24, 4  ;;  %s73_s27 = sshll.u32 %s7822_s26, 4  ;;  %s58_s25 = int_to_ptr.vmem [resolvable:$true] %s57_s25  ;;  %s7926_s27 = int_to_ptr.vmem [resolvable:$true] %s73_s27 }
  0x26   :  { %s7743_s13 = scalar_lea.hbm %s9305_s6, 6144 }
  0x27   :  { %p7744_p2 = scmp.ne.s32.totalorder %s9305_s6, %s7743_s13  ;;  %p7747_p3 = scmp.lt.u32.totalorder %s7743_s13, %s9305_s6 }
  0x29   :  { %p7749_p4 = pnand %p7747_p3, %p7744_p2 }
  0x2b   :  { %7752 = shalt.err (!%p7749_p4)
}
  0x2c   :  { %s7753_s2 = scalar_lea.vmem %s58_s25, 6144  ;;  %p7758_p6 = scmp.lt.s32.totalorder %s58_s25, %s58_s25 }
  0x2d   :  { %p7754_p5 = scmp.ne.s32.totalorder %s58_s25, %s7753_s2  ;;  %p7759_p7 = scmp.lt.s32.totalorder %s7753_s2, %s7753_s2 }
  0x2f   :  { %p7760_p8 = por %p7759_p7, %p7758_p6 }
  0x31   :  { %p7761_p9 = pnand %p7760_p8, %p7754_p5 }
  0x33   :  { %7764 = shalt.err (!%p7761_p9)
}
  0x34   :  { %63 = dma.hbm_to_vmem [thread:$0]  %s9305_s6, 6144, %s58_s25, [#allocation6], %s7819_s29, %s7819_s29, %s7820_s30  }
  0x35   :  { %s7765_s23 = scalar_lea.hbm %s9308_s9, 2048 }
  0x36   :  { %p7766_p10 = scmp.ne.s32.totalorder %s9308_s9, %s7765_s23  ;;  %p7769_p11 = scmp.lt.u32.totalorder %s7765_s23, %s9308_s9 }
  0x38   :  { %p7771_p12 = pnand %p7769_p11, %p7766_p10 }
  0x3a   :  { %7774 = shalt.err (!%p7771_p12)
}
  0x3b   :  { %s7775_s28 = scalar_lea.vmem %s7926_s27, 2048  ;;  %p7780_p0 = scmp.lt.s32.totalorder %s7926_s27, %s7926_s27 }
  0x3c   :  { %p7776_p13 = scmp.ne.s32.totalorder %s7926_s27, %s7775_s28  ;;  %p7781_p1 = scmp.lt.s32.totalorder %s7775_s28, %s7775_s28 }
  0x3e   :  { %p7782_p2 = por %p7781_p1, %p7780_p0 }
  0x40   :  { %p7783_p3 = pnand %p7782_p2, %p7776_p13 }
  0x42   :  { %7786 = shalt.err (!%p7783_p3)
}
  0x43   :  { %s7823_s6 = smov 128   ;;  %s7824_s29 = smov 8  }
  0x44   :  { %79 = dma.hbm_to_vmem [thread:$0]  %s9308_s9, 2048, %s7926_s27, [#allocation9], %s7823_s6, %s7823_s6, %s7824_s29  }
  0x45   :  { %7809 = dma.done.wait [#allocation3], 6144  }
  0x46   :  { %7810 = vsyncadd [#allocation3], 4294961152 }
  0x47   :  { %7811 = dma.done.wait [#allocation6], 12288  }
  0x48   :  { %7812 = vsyncadd [#allocation6], 4294955008 }
  0x49   :  { %7813 = dma.done.wait [#allocation9], 2048  }
  0x4a   :  { %7814 = vsyncadd [#allocation9], 4294965248  ;;  %v9311_v0 = vmov 0.0   ;;  %v285_v1 = vld [vmem:[#allocation2 + $0x8] sm:$0xff]  ;;  %v288_v2 = vld [vmem:[#allocation2 + $0x20] sm:$0xff]  ;;  %vm125_vm0 = vcmask 1043456  }
  0x4b   :  { %196 = vmatprep.mubr.f32.mxu1 %v9311_v0  ;;  %511 = vmatprep.mubr.f32.mxu0 %v9311_v0  ;;  %v284_v3 = vld [vmem:[#allocation2] sm:$0xff]  ;;  %v7962_v4 = vpack.c.bf16 %v288_v2, %v285_v1  ;;  %v287_v5 = vld [vmem:[#allocation2 + $0x18] sm:$0xff]  ;;  %v294_v7 = vld [vmem:[#allocation2 + $0x50] sm:$0xff]  ;;  %vm118_vm1 = vcmask 31744   ;;  %v9313_v39 = vmov 0.0|0.0   ;;  %vm7827_vm2 = vmmov 0  }
  0x4c   :  { %v291_v6 = vld [vmem:[#allocation2 + $0x38] sm:$0xff]  ;;  %v7964_v8 = vpack.c.bf16 %v287_v5, %v284_v3  ;;  %v290_v10 = vld [vmem:[#allocation2 + $0x30] sm:$0xff]  ;;  %v293_v11 = vld [vmem:[#allocation2 + $0x48] sm:$0xff]  ;;  %vm661_vm3 = vcmask 1041409   ;;  %s7828_s22 = smov [#allocation10]  }
  0x4d   :  { %v7966_v9 = vpack.c.bf16 %v294_v7, %v291_v6  ;;  %v297_v12 = vld [vmem:[#allocation2 + $0x68] sm:$0xff]  ;;  %6031 = vmatprep.subr.bf16.mxu0 %v7962_v4  ;;  %v300_v13 = vld [vmem:[#allocation2 + $0x80] sm:$0xff]  ;;  %v7970_v14 = vpack.c.bf16 %v293_v11, %v290_v10  ;;  %v299_v17 = vld [vmem:[#allocation2 + $0x78] sm:$0xff]  ;;  %s4655_s23 = sshll.u32 %s7828_s22, 4  ;;  %s4656_s23 = int_to_ptr.vmem [resolvable:$true] %s4655_s23 }
  0x4e   :  { %6033 = vmatpush1.bf16.msra.mxu0 %v7964_v8  ;;  %v7973_v15 = vpack.c.bf16 %v300_v13, %v297_v12  ;;  %v296_v16 = vld [vmem:[#allocation2 + $0x60] sm:$0xff]  ;;  %v303_v18 = vld [vmem:[#allocation2 + $0x98] sm:$0xff]  ;;  %v306_v19 = vld [vmem:[#allocation2 + $0xb0] sm:$0xff]  ;;  %s7787_s5 = scalar_lea.vmem %s4656_s23, 32  ;;  %p7792_p5 = scmp.lt.s32.totalorder %s4656_s23, %s4656_s23 }
  0x4f   :  { %6035 = vmatprep.subr.bf16.mxu0 %v7966_v9  ;;  %v96_v20 = vld [vmem:[%s9300_s1] sm:$0xff]  ;;  %v7979_v22 = vpack.c.bf16 %v299_v17, %v296_v16  ;;  %v97_v24 = vld [vmem:[%s9300_s1 + $0x8] sm:$0xf]  ;;  %v7988_v25 = vpack.c.bf16 %v306_v19, %v303_v18  ;;  %v302_v26 = vld [vmem:[#allocation2 + $0x90] sm:$0xff]  ;;  %p7788_p4 = scmp.ne.s32.totalorder %s4656_s23, %s7787_s5  ;;  %p7793_p6 = scmp.lt.s32.totalorder %s7787_s5, %s7787_s5 }
  0x50   :  { %v117_v21 = vcombine.high %v96_v20, %v96_v20  ;;  %v94_v23 = vld [vmem:[%s9299_s0] sm:$0xff]  ;;  %v305_v27 = vld [vmem:[#allocation2 + $0xa8] sm:$0xff]  ;;  %v311_v34 = vld [vmem:[#allocation2 + $0xd8] sm:$0xff] }
  0x51   :  { %9457 = vst [vmem:[#allocation15_spill] sm:$0xff] %v7988_v25  ;;  %v309_v28 = vld [vmem:[#allocation2 + $0xc8] sm:$0xff]  ;;  %v312_v29 = vld [vmem:[#allocation2 + $0xe0] sm:$0xff]  ;;  %v7995_v30 = vpack.c.bf16 %v305_v27, %v302_v26  ;;  %v286_v35 = vld [vmem:[#allocation2 + $0x10] sm:$0xff]  ;;  %p7794_p7 = por %p7793_p6, %p7792_p5 }
  0x52   :  { %6037 = vmatpush1.bf16.msra.mxu0 %v7970_v14  ;;  %4666 = vmatprep.subr.msk.mxu1 %vm125_vm0, %v117_v21  ;;  %v308_v31 = vld [vmem:[#allocation2 + $0xc0] sm:$0xff]  ;;  %v95_v32 = vld [vmem:[%s9299_s0 + $0x8] sm:$0xff]  ;;  %v8002_v33 = vpack.c.bf16 %v312_v29, %v309_v28  ;;  %v315_v37 = vld [vmem:[#allocation2 + $0xf8] sm:$0xff] }
  0x53   :  { %6039 = vmatprep.subr.bf16.mxu0 %v7973_v15  ;;  %4667 = vmatpush1.msk.msra.mxu1 %vm125_vm0, %v96_v20  ;;  %9458 = vst [vmem:[#allocation16_spill] sm:$0xff] %v7995_v30  ;;  %v289_v36 = vld [vmem:[#allocation2 + $0x28] sm:$0xff]  ;;  %v318_v38 = vld [vmem:[#allocation2 + $0x110] sm:$0xff]  ;;  %v8008_v40 = vpack.c.bf16 %v311_v34, %v308_v31  ;;  %v292_v45 = vld [vmem:[#allocation2 + $0x40] sm:$0xff]  ;;  %p7795_p8 = pnand %p7794_p7, %p7788_p4 }
  0x54   :  { %4668 = vmatmul.mubr.msk.f32.vlgmr.msra.gmra.mrb[0].mxu1 %vm118_vm1, %v94_v23  ;;  %5150 = vmatprep.subr.msk.mxu1 %vm125_vm0, %v97_v24  ;;  %9459 = vst [vmem:[#allocation17_spill] sm:$0xff] %v8002_v33  ;;  %v314_v41 = vld [vmem:[#allocation2 + $0xf0] sm:$0xff]  ;;  %v8011_v42 = vpack.c.bf16 %v289_v36, %v286_v35  ;;  %v8014_v43 = vpack.c.bf16 %v318_v38, %v315_v37  ;;  %v317_v44 = vld [vmem:[#allocation2 + $0x108] sm:$0xff]  ;;  %v295_v46 = vld [vmem:[#allocation2 + $0x58] sm:$0xff] }
  0x55   :  { %5151 = vmatpush3.msk.msra.mxu1 %vm125_vm0, %v97_v24  ;;  %202 = vmatprep.mubr.f32.mxu1 %v9311_v0  ;;  %9460 = vst [vmem:[#allocation18_spill] sm:$0xff] %v8008_v40  ;;  %v321_v47 = vld [vmem:[#allocation2 + $0x128] sm:$0xff]  ;;  %v324_v48 = vld [vmem:[#allocation2 + $0x140] sm:$0xff]  ;;  %v8018_v49 = vpack.c.bf16 %v317_v44, %v314_v41  ;;  %v8021_v51 = vpack.c.bf16 %v295_v46, %v292_v45  ;;  %v323_v53 = vld [vmem:[#allocation2 + $0x138] sm:$0xff] }
  0x56   :  { %6041 = vmatpush1.bf16.msra.mxu0 %v7979_v22  ;;  %6062 = vmatprep.subr.bf16.mxu1 %v9313_v39  ;;  %9461 = vst [vmem:[#allocation19_spill] sm:$0xff] %v8014_v43  ;;  %v320_v50 = vld [vmem:[#allocation2 + $0x120] sm:$0xff]  ;;  %v8024_v52 = vpack.c.bf16 %v324_v48, %v321_v47  ;;  %v298_v54 = vld [vmem:[#allocation2 + $0x70] sm:$0xff]  ;;  %v301_v55 = vld [vmem:[#allocation2 + $0x88] sm:$0xff] }
  0x57   :  { %6043 = vmatprep.subr.bf16.mxu0 %v7988_v25  ;;  %9462 = vst [vmem:[#allocation20_spill] sm:$0xff] %v8018_v49  ;;  %v327_v56 = vld [vmem:[#allocation2 + $0x158] sm:$0xff]  ;;  %v330_v57 = vld [vmem:[#allocation2 + $0x170] sm:$0xff]  ;;  %v8030_v58 = vpack.c.bf16 %v323_v53, %v320_v50  ;;  %v8033_v60 = vpack.c.bf16 %v301_v55, %v298_v54  ;;  %v329_v62 = vld [vmem:[#allocation2 + $0x168] sm:$0xff] }
  0x58   :  { %4669 = vmatmul.mubr.msk.f32.gmra.mrb[2].mxu1 %vm118_vm1, %v95_v32  ;;  %9463 = vst [vmem:[#allocation21_spill] sm:$0xff] %v8024_v52  ;;  %v326_v59 = vld [vmem:[#allocation2 + $0x150] sm:$0xff]  ;;  %v8036_v61 = vpack.c.bf16 %v330_v57, %v327_v56  ;;  %v304_v63 = vld [vmem:[#allocation2 + $0xa0] sm:$0xff]  ;;  %v307_v1 = vld [vmem:[#allocation2 + $0xb8] sm:$0xff] }
  0x59   :  { %5152 = vmatprep.mubr.msk.f32.mxu1 %vm118_vm1, %v94_v23  ;;  %9464 = vst [vmem:[#allocation22_spill] sm:$0xff] %v8030_v58  ;;  %v8040_v2 = vpack.c.bf16 %v329_v62, %v326_v59  ;;  %v8043_v3 = vpack.c.bf16 %v307_v1, %v304_v63  ;;  %v310_v5 = vld [vmem:[#allocation2 + $0xd0] sm:$0xff]  ;;  %v313_v6 = vld [vmem:[#allocation2 + $0xe8] sm:$0xff]  ;;  %v316_v10 = vld [vmem:[#allocation2 + $0x100] sm:$0xff] }
  0x5a   :  { %6045 = vmatpush1.bf16.msra.mxu0 %v7995_v30  ;;  %9465 = vst [vmem:[#allocation23_spill] sm:$0xff] %v8036_v61  ;;  %v8049_v7 = vpack.c.bf16 %v313_v6, %v310_v5  ;;  %v319_v11 = vld [vmem:[#allocation2 + $0x118] sm:$0xff]  ;;  %v322_v13 = vld [vmem:[#allocation2 + $0x130] sm:$0xff]  ;;  %v325_v16 = vld [vmem:[#allocation2 + $0x148] sm:$0xff] }
  0x5b   :  { %6047 = vmatprep.subr.bf16.mxu0 %v8002_v33  ;;  %9466 = vst [vmem:[#allocation24_spill] sm:$0xff] %v8040_v2  ;;  %9467 = vst [vmem:[#allocation25_spill] sm:$0xff] %v8043_v3  ;;  %v8054_v12 = vpack.c.bf16 %v319_v11, %v316_v10  ;;  %v8059_v17 = vpack.c.bf16 %v325_v16, %v322_v13  ;;  %v328_v18 = vld [vmem:[#allocation2 + $0x160] sm:$0xff]  ;;  %v331_v19 = vld [vmem:[#allocation2 + $0x178] sm:$0xff] }
  0x5c   :  { %5153 = vmatmul.mubr.msk.f32.vlgmr.msra.gmra.mrb[4].mxu1 %vm118_vm1, %v95_v32  ;;  %9468 = vst [vmem:[#allocation26_spill] sm:$0xff] %v8049_v7  ;;  %v8063_v20 = vpack.c.bf16 %v331_v19, %v328_v18  ;;  %v334_v21 = vld [vmem:[#allocation5 + $0x8] sm:$0xff]  ;;  %v337_v23 = vld [vmem:[#allocation5 + $0x20] sm:$0xff]  ;;  %v336_v27 = vld [vmem:[#allocation5 + $0x18] sm:$0xff] }
  0x5d   :  { %6064 = vmatpush3.bf16.msra.mxu1 %v8011_v42  ;;  %5187 = vmatprep.mubr.msk.f32.mxu1 %vm7827_vm2, %v9311_v0  ;;  %9469 = vst [vmem:[#allocation27_spill] sm:$0xff] %v8054_v12  ;;  %9470 = vst [vmem:[#allocation28_spill] sm:$0xff] %v8059_v17  ;;  %v8071_v24 = vpack.c.bf16 %v337_v23, %v334_v21  ;;  %v333_v26 = vld [vmem:[#allocation5] sm:$0xff]  ;;  %v335_v28 = vld [vmem:[#allocation5 + $0x10] sm:$0xff] }
  0x5e   :  { %6049 = vmatpush1.bf16.msra.mxu0 %v8008_v40  ;;  %6065 = vmatprep.subr.bf16.mxu1 %v9313_v39  ;;  %9471 = vst [vmem:[#allocation29_spill] sm:$0xff] %v8063_v20  ;;  %v8073_v29 = vpack.c.bf16 %v336_v27, %v333_v26  ;;  %v338_v31 = vld [vmem:[#allocation5 + $0x28] sm:$0xff]  ;;  %v340_v34 = vld [vmem:[#allocation5 + $0x38] sm:$0xff]  ;;  %v343_v35 = vld [vmem:[#allocation5 + $0x50] sm:$0xff] }
  0x5f   :  { %6051 = vmatprep.subr.bf16.mxu0 %v8014_v43  ;;  %9472 = vst [vmem:[#allocation30_spill] sm:$0xff] %v8071_v24  ;;  %v8076_v32 = vpack.c.bf16 %v338_v31, %v335_v28  ;;  %v8080_v36 = vpack.c.bf16 %v343_v35, %v340_v34  ;;  %v339_v37 = vld [vmem:[#allocation5 + $0x30] sm:$0xff]  ;;  %v342_v38 = vld [vmem:[#allocation5 + $0x48] sm:$0xff]  ;;  %v341_v41 = vld [vmem:[#allocation5 + $0x40] sm:$0xff] }
  0x60   :  { %9473 = vst [vmem:[#allocation31_spill] sm:$0xff] %v8073_v29  ;;  %v8083_v44 = vpack.c.bf16 %v342_v38, %v339_v37  ;;  %v344_v45 = vld [vmem:[#allocation5 + $0x58] sm:$0xff]  ;;  %v346_v47 = vld [vmem:[#allocation5 + $0x68] sm:$0xff]  ;;  %v349_v48 = vld [vmem:[#allocation5 + $0x80] sm:$0xff] }
  0x61   :  { %6067 = vmatpush3.bf16.msra.mxu1 %v8021_v51  ;;  %9474 = vst [vmem:[#allocation32_spill] sm:$0xff] %v8076_v32  ;;  %9475 = vst [vmem:[#allocation33_spill] sm:$0xff] %v8080_v36  ;;  %v8086_v46 = vpack.c.bf16 %v344_v45, %v341_v41  ;;  %v8090_v50 = vpack.c.bf16 %v349_v48, %v346_v47  ;;  %v345_v53 = vld [vmem:[#allocation5 + $0x60] sm:$0xff]  ;;  %v348_v54 = vld [vmem:[#allocation5 + $0x78] sm:$0xff] }
  0x62   :  { %6053 = vmatpush1.bf16.msra.mxu0 %v8018_v49  ;;  %6068 = vmatprep.subr.bf16.mxu1 %v9313_v39  ;;  %9476 = vst [vmem:[#allocation34_spill] sm:$0xff] %v8083_v44  ;;  %v347_v55 = vld [vmem:[#allocation5 + $0x70] sm:$0xff]  ;;  %v8093_v56 = vpack.c.bf16 %v348_v54, %v345_v53  ;;  %v350_v57 = vld [vmem:[#allocation5 + $0x88] sm:$0xff]  ;;  %v352_v62 = vld [vmem:[#allocation5 + $0x98] sm:$0xff] }
  0x63   :  { %6055 = vmatprep.subr.bf16.mxu0 %v8024_v52  ;;  %9477 = vst [vmem:[#allocation35_spill] sm:$0xff] %v8086_v46  ;;  %9478 = vst [vmem:[#allocation36_spill] sm:$0xff] %v8090_v50  ;;  %v8096_v59 = vpack.c.bf16 %v350_v57, %v347_v55  ;;  %v355_v63 = vld [vmem:[#allocation5 + $0xb0] sm:$0xff]  ;;  %v354_v6 = vld [vmem:[#allocation5 + $0xa8] sm:$0xff] }
  0x64   :  { %9479 = vst [vmem:[#allocation37_spill] sm:$0xff] %v8093_v56  ;;  %v8100_v1 = vpack.c.bf16 %v355_v63, %v352_v62  ;;  %v351_v5 = vld [vmem:[#allocation5 + $0x90] sm:$0xff]  ;;  %v353_v10 = vld [vmem:[#allocation5 + $0xa0] sm:$0xff]  ;;  %v356_v13 = vld [vmem:[#allocation5 + $0xb8] sm:$0xff] }
  0x65   :  { %6070 = vmatpush3.bf16.msra.mxu1 %v8033_v60  ;;  %9480 = vst [vmem:[#allocation38_spill] sm:$0xff] %v8096_v59  ;;  %v8103_v11 = vpack.c.bf16 %v354_v6, %v351_v5  ;;  %v8106_v16 = vpack.c.bf16 %v356_v13, %v353_v10  ;;  %v358_v18 = vld [vmem:[#allocation5 + $0xc8] sm:$0xff]  ;;  %v361_v19 = vld [vmem:[#allocation5 + $0xe0] sm:$0xff]  ;;  %v360_v26 = vld [vmem:[#allocation5 + $0xd8] sm:$0xff] }
  0x66   :  { %6057 = vmatpush1.bf16.msra.mxu0 %v8030_v58  ;;  %6071 = vmatprep.subr.bf16.mxu1 %v9313_v39  ;;  %9481 = vst [vmem:[#allocation39_spill] sm:$0xff] %v8100_v1  ;;  %v8110_v21 = vpack.c.bf16 %v361_v19, %v358_v18  ;;  %v357_v23 = vld [vmem:[#allocation5 + $0xc0] sm:$0xff]  ;;  %v359_v27 = vld [vmem:[#allocation5 + $0xd0] sm:$0xff]  ;;  %v362_v31 = vld [vmem:[#allocation5 + $0xe8] sm:$0xff] }
  0x67   :  { %6059 = vmatprep.subr.bf16.mxu0 %v8036_v61  ;;  %9482 = vst [vmem:[#allocation40_spill] sm:$0xff] %v8103_v11  ;;  %9483 = vst [vmem:[#allocation41_spill] sm:$0xff] %v8106_v16  ;;  %v8113_v28 = vpack.c.bf16 %v360_v26, %v357_v23  ;;  %v364_v34 = vld [vmem:[#allocation5 + $0xf8] sm:$0xff]  ;;  %v367_v35 = vld [vmem:[#allocation5 + $0x110] sm:$0xff]  ;;  %v8116_v37 = vpack.c.bf16 %v362_v31, %v359_v27 }
  0x68   :  { %9484 = vst [vmem:[#allocation42_spill] sm:$0xff] %v8110_v21  ;;  %v8118_v38 = vpack.c.bf16 %v367_v35, %v364_v34  ;;  %v363_v41 = vld [vmem:[#allocation5 + $0xf0] sm:$0xff]  ;;  %v366_v45 = vld [vmem:[#allocation5 + $0x108] sm:$0xff]  ;;  %v365_v47 = vld [vmem:[#allocation5 + $0x100] sm:$0xff] }
  0x69   :  { %6073 = vmatpush3.bf16.msra.mxu1 %v8043_v3  ;;  %9485 = vst [vmem:[#allocation43_spill] sm:$0xff] %v8113_v28  ;;  %9486 = vst [vmem:[#allocation44_spill] sm:$0xff] %v8116_v37  ;;  %v8121_v48 = vpack.c.bf16 %v366_v45, %v363_v41  ;;  %v368_v53 = vld [vmem:[#allocation5 + $0x118] sm:$0xff]  ;;  %v370_v54 = vld [vmem:[#allocation5 + $0x128] sm:$0xff] }
  0x6a   :  { %6061 = vmatpush1.bf16.msra.mxu0 %v8040_v2  ;;  %6074 = vmatprep.subr.bf16.mxu1 %v9313_v39  ;;  %9487 = vst [vmem:[#allocation45_spill] sm:$0xff] %v8118_v38  ;;  %v373_v55 = vld [vmem:[#allocation5 + $0x140] sm:$0xff]  ;;  %v8125_v57 = vpack.c.bf16 %v368_v53, %v365_v47  ;;  %v372_v5 = vld [vmem:[#allocation5 + $0x138] sm:$0xff]  ;;  %v371_v6 = vld [vmem:[#allocation5 + $0x130] sm:$0xff] }
  0x6b   :  { %6087 = vmatprep.subr.bf16.mxu0 %v8071_v24  ;;  %9488 = vst [vmem:[#allocation46_spill] sm:$0xff] %v8121_v48  ;;  %v8127_v62 = vpack.c.bf16 %v373_v55, %v370_v54  ;;  %v369_v63 = vld [vmem:[#allocation5 + $0x120] sm:$0xff]  ;;  %v374_v10 = vld [vmem:[#allocation5 + $0x148] sm:$0xff]  ;;  %v376_v13 = vld [vmem:[#allocation5 + $0x158] sm:$0xff] }
  0x6c   :  { %9489 = vst [vmem:[#allocation47_spill] sm:$0xff] %v8125_v57  ;;  %v379_v18 = vld [vmem:[#allocation5 + $0x170] sm:$0xff]  ;;  %v8131_v19 = vpack.c.bf16 %v372_v5, %v369_v63  ;;  %v8135_v23 = vpack.c.bf16 %v374_v10, %v371_v6  ;;  %v378_v31 = vld [vmem:[#allocation5 + $0x168] sm:$0xff]  ;;  %v377_v34 = vld [vmem:[#allocation5 + $0x160] sm:$0xff] }
  0x6d   :  { %512 = vmatmul.mubr.f32.vlgmr.msra.gmra.mrb[0].mxu0 %v9311_v0  ;;  %6076 = vmatpush3.bf16.msra.mxu1 %v8049_v7  ;;  %9490 = vst [vmem:[#allocation48_spill] sm:$0xff] %v8127_v62  ;;  %v8137_v26 = vpack.c.bf16 %v379_v18, %v376_v13  ;;  %v375_v27 = vld [vmem:[#allocation5 + $0x150] sm:$0xff]  ;;  %v380_v35 = vld [vmem:[#allocation5 + $0x178] sm:$0xff]  ;;  %v383_v41 = vld [vmem:[#allocation7 + $0x8] sm:$0xff]  ;;  %v100_v13 = vlaneseq }
  0x6e   :  { %728 = vmatprep.mubr.f32.mxu0 %v9311_v0  ;;  %6077 = vmatprep.subr.bf16.mxu1 %v9313_v39  ;;  %9491 = vst [vmem:[#allocation49_spill] sm:$0xff] %v8131_v19  ;;  %9492 = vst [vmem:[#allocation50_spill] sm:$0xff] %v8135_v23  ;;  %v386_v45 = vld [vmem:[#allocation7 + $0x20] sm:$0xff]  ;;  %v8141_v47 = vpack.c.bf16 %v378_v31, %v375_v27  ;;  %v8145_v53 = vpack.c.bf16 %v380_v35, %v377_v34 }
  0x6f   :  { %6089 = vmatpush1.bf16.msra.mxu0 %v8073_v29  ;;  %9493 = vst [vmem:[#allocation51_spill] sm:$0xff] %v8137_v26  ;;  %v8147_v54 = vpack.c.bf16 %v386_v45, %v383_v41  ;;  %v101_v27 = vshrl.u32 %v100_v13, 7  ;;  %v98_v34 = vld [vmem:[%s9302_s3] sm:$0x7] }
  0x70   :  { %6091 = vmatprep.subr.bf16.mxu0 %v8080_v36  ;;  %9494 = vst [vmem:[#allocation52_spill] sm:$0xff] %v8141_v47  ;;  %9495 = vst [vmem:[#allocation53_spill] sm:$0xff] %v8145_v53  ;;  %v332_v35 = vld [vmem:[%s9303_s4] sm:$0x7] }
  0x71   :  { %6079 = vmatpush3.bf16.msra.mxu1 %v8054_v12  ;;  %9496 = vst [vmem:[#allocation54_spill] sm:$0xff] %v8147_v54  ;;  %v8154_v31 = vsub.s32 0, %v101_v27  ;;  %v8162_v41 = vsub.s32 1, %v101_v27 }
  0x72   :  { %6080 = vmatprep.subr.bf16.mxu1 %v9313_v39 }
  0x73   :  { %6093 = vmatpush1.bf16.msra.mxu0 %v8083_v44  ;;  %9497 = vst [vmem:[#allocation55_spill] sm:$0xff] %v8154_v31  ;;  %9498 = vst [vmem:[#allocation56_spill] sm:$0xff] %v8162_v41  ;;  %v103_v45 = vrot.slane %v98_v34, %v8154_v31  ;;  %v107_v13 = vrot.slane %v98_v34, %v8162_v41 }
  0x74   :  { %6095 = vmatprep.subr.bf16.mxu0 %v8090_v50 }
  0x75   :  { %6082 = vmatpush3.bf16.msra.mxu1 %v8059_v17 }
  0x76   :  { %6083 = vmatprep.subr.bf16.mxu1 %v9313_v39 }
  0x77   :  { %6097 = vmatpush1.bf16.msra.mxu0 %v8093_v56 }
  0x78   :  { %6099 = vmatprep.subr.bf16.mxu0 %v8100_v1 }
  0x79   :  { %6085 = vmatpush3.bf16.msra.mxu1 %v8063_v20 }
  0x7a   :  { %6118 = vmatprep.subr.bf16.mxu1 %v9313_v39 }
  0x7b   :  { %6101 = vmatpush1.bf16.msra.mxu0 %v8103_v11 }
  0x7c   :  { %5188 = vmatmul.mubr.f32.vlgmr.msra.gmra.mrb[6].mxu1 %v9311_v0  ;;  %6103 = vmatprep.subr.bf16.mxu0 %v8110_v21 }
  0x7d   :  { %5222 = vmatprep.mubr.msk.f32.mxu1 %vm7827_vm2, %v9311_v0  ;;  %6120 = vmatpush3.bf16.msra.mxu1 %v8076_v32  ;;  %v8166_v0 = vrot.slane %v332_v35, %v8154_v31 }
  0x7e   :  { %6121 = vmatprep.subr.bf16.mxu1 %v9313_v39 }
  0x7f   :  { %6105 = vmatpush1.bf16.msra.mxu0 %v8113_v28  ;;  %9499 = vst [vmem:[#allocation57_spill] sm:$0xff] %v8166_v0 }
  0x80   :  { %6107 = vmatprep.subr.bf16.mxu0 %v8118_v38 }
  0x81   :  { %6123 = vmatpush3.bf16.msra.mxu1 %v8086_v46 }
  0x82   :  { %6124 = vmatprep.subr.bf16.mxu1 %v9313_v39 }
  0x83   :  { %6109 = vmatpush1.bf16.msra.mxu0 %v8121_v48 }
  0x84   :  { %6111 = vmatprep.subr.bf16.mxu0 %v8127_v62 }
  0x85   :  { %6126 = vmatpush3.bf16.msra.mxu1 %v8096_v59 }
  0x86   :  { %6127 = vmatprep.subr.bf16.mxu1 %v9313_v39 }
  0x87   :  { %6113 = vmatpush1.bf16.msra.mxu0 %v8131_v19 }
  0x88   :  { %6115 = vmatprep.subr.bf16.mxu0 %v8137_v26 }
  0x89   :  { %6129 = vmatpush3.bf16.msra.mxu1 %v8106_v16 }
  0x8a   :  { %6130 = vmatprep.subr.bf16.mxu1 %v9313_v39 }
  0x8b   :  { %6117 = vmatpush1.bf16.msra.mxu0 %v8141_v47 }
  0x8c   :  { %6143 = vmatprep.subr.bf16.mxu0 %v8147_v54 }
  0x8d   :  { %6132 = vmatpush3.bf16.msra.mxu1 %v8116_v37 }
  0x8e   :  { %6133 = vmatprep.subr.bf16.mxu1 %v9313_v39 }
  0x91   :  { %6135 = vmatpush3.bf16.msra.mxu1 %v8125_v57 }
  0x92   :  { %6136 = vmatprep.subr.bf16.mxu1 %v9313_v39 }
  0x95   :  { %6138 = vmatpush3.bf16.msra.mxu1 %v8135_v23 }
  0x96   :  { %6139 = vmatprep.subr.bf16.mxu1 %v9313_v39 }
  0x99   :  { %6141 = vmatpush3.bf16.msra.mxu1 %v8145_v53 }
  0x9a   :  { %6174 = vmatprep.subr.bf16.mxu1 %v9313_v39  ;;  %v8169_v39 = vrot.slane %v332_v35, %v8162_v41 }
  0x9c   :  { %9500 = vst [vmem:[#allocation58_spill] sm:$0xff] %v8169_v39 }
 0x127   :  { %v198_v55 = vpop.f32.mrb[0].mxu1 }
 0x128   :  { %v200_v63 = vpop.f32.mrb[1].mxu1  ;;  %v8172_v53 = vadd.f32 %v198_v55, %v103_v45 }
 0x129   :  { %v8179_v31 = vadd.f32 %v200_v63, %v107_v13 }
 0x12a   :  { %9501 = vst [vmem:[#allocation59_spill] sm:$0xff] %v8172_v53 }
 0x12b   :  { %v204_v5 = vpop.f32.mrb[2].mxu1  ;;  %9503 = vst [vmem:[#allocation61_spill] sm:$0xff] %v8179_v31 }
 0x12c   :  { %v206_v6 = vpop.f32.mrb[3].mxu1  ;;  %v8176_v19 = vadd.f32 %v204_v5, %v103_v45 }
 0x12d   :  { %v8182_v41 = vadd.f32 %v206_v6, %v107_v13 }
 0x12e   :  { %9502 = vst [vmem:[#allocation60_spill] sm:$0xff] %v8176_v19 }
 0x12f   :  { %v5154_v10 = vpop.f32.mrb[4].mxu1  ;;  %9504 = vst [vmem:[#allocation62_spill] sm:$0xff] %v8182_v41 }
 0x130   :  { %v275_v18 = vpop.f32.mrb[5].mxu1 }
 0x140   :  { %v513_v54 = vpop.f32.mrb[0].mxu0 }
 0x141   :  { %v514_v47 = vadd.f32 %v513_v54, %v8166_v0  ;;  %v515_v26 = vpop.f32.mrb[1].mxu0 }
 0x142   :  { %v516_v23 = vadd.f32 %v515_v26, %v8169_v39 }
 0x143   :  { %v589_v62 = vrot.slane %v514_v47, 1  ;;  %v592_v57 = vadd.f32 %v514_v47, %v8172_v53 }
 0x144   :  { %v607_v48 = vrot.slane %v516_v23, 1  ;;  %v610_v55 = vadd.f32 %v516_v23, %v8179_v31 }
 0x145   :  { %v593_v38 = vadd.f32 %v589_v62, %v8176_v19  ;;  %v4673_v37 = vmul.f32 -1.442695, %v592_v57  ;;  %v8186_v62 = vsub.s32 2, %v101_v27 }
 0x146   :  { %v611_v0 = vadd.f32 %v607_v48, %v8182_v41  ;;  %v4675_v26 = vmul.f32 -1.442695, %v610_v55 }
 0x147   :  { %7459 = vpow2.f32 %v4673_v37  ;;  %v4674_v54 = vmul.f32 -1.442695, %v593_v38  ;;  %v8189_v23 = vrot.slane %v332_v35, %v8186_v62 }
 0x148   :  { %v4676_v5 = vmul.f32 -1.442695, %v611_v0  ;;  %v111_v0 = vrot.slane %v98_v34, %v8186_v62 }
 0x149   :  { %7461 = vpow2.f32 %v4674_v54  ;;  %9505 = vst [vmem:[#allocation63_spill] sm:$0xff] %v8189_v23 }
 0x14a   :  { %7463 = vpow2.f32 %v4675_v26  ;;  %v8193_v26 = vadd.f32 %v275_v18, %v111_v0 }
 0x14b   :  { %7465 = vpow2.f32 %v4676_v5 }
 0x14c   :  { %9506 = vst [vmem:[#allocation64_spill] sm:$0xff] %v8193_v26 }
 0x14f   :  { %v584_v47 = vpop.f32.mrb[6].mxu1 }
 0x150   :  { %v5189_v45 = vpop.f32.mrb[7].mxu1  ;;  %v585_v38 = vadd.f32 %v584_v47, %v8189_v23 }
 0x151   :  { %v7460_v63 = vpop.eup %7459 }
 0x152   :  { %v600_v53 = vadd.f32 1.0, %v7460_v63  ;;  %v625_v55 = vrot.slane %v585_v38, 1 }
 0x153   :  { %v7462_v39 = vpop.eup %7461 }
 0x154   :  { %v601_v57 = vadd.f32 1.0, %v7462_v39  ;;  %7467 = vrcp.f32 %v600_v53  ;;  %v7464_v37 = vpop.eup %7463  ;;  %v8195_v53 = vadd.f32 %v5154_v10, %v111_v0  ;;  %v382_v0 = vld [vmem:[#allocation7] sm:$0xff] }
 0x155   :  { %v7466_v48 = vpop.eup %7465  ;;  %v618_v6 = vadd.f32 1.0, %v7464_v37 }
 0x156   :  { %7469 = vrcp.f32 %v601_v57  ;;  %v619_v13 = vadd.f32 1.0, %v7466_v48  ;;  %9507 = vst [vmem:[#allocation65_spill] sm:$0xff] %v8195_v53 }
 0x157   :  { %7471 = vrcp.f32 %v618_v6 }
 0x158   :  { %7473 = vrcp.f32 %v619_v13  ;;  %v385_v13 = vld [vmem:[#allocation7 + $0x18] sm:$0xff] }
 0x15e   :  { %v7468_v54 = vpop.eup %7467 }
 0x15f   :  { %v628_v27 = vmul.f32 %v7468_v54, %v585_v38 }
 0x160   :  { %v7470_v39 = vpop.eup %7469 }
 0x161   :  { %v629_v35 = vmul.f32 %v7470_v39, %v625_v55  ;;  %v630_v5 = vadd.f32 %v628_v27, %v8193_v26  ;;  %v7472_v34 = vpop.eup %7471  ;;  %v384_v55 = vld [vmem:[#allocation7 + $0x10] sm:$0xff]  ;;  %v387_v27 = vld [vmem:[#allocation7 + $0x28] sm:$0xff]  ;;  %v8204_v26 = vpack.c.bf16 %v385_v13, %v382_v0  ;;  %v394_v13 = vld [vmem:[#allocation7 + $0x60] sm:$0xff] }
 0x162   :  { %v7474_v63 = vpop.eup %7473  ;;  %v634_v45 = vsub.f32 1.0, %v7472_v34  ;;  %v638_v48 = vmul.f32 0.0, %v7472_v34  ;;  %v388_v34 = vld [vmem:[#allocation7 + $0x30] sm:$0xff] }
 0x163   :  { %v631_v47 = vadd.f32 %v629_v35, %v8195_v53  ;;  %7475 = vtanh.f32 %v630_v5  ;;  %v635_v37 = vsub.f32 1.0, %v7474_v63  ;;  %v639_v54 = vmul.f32 0.0, %v7474_v63  ;;  %v389_v35 = vld [vmem:[#allocation7 + $0x38] sm:$0xff]  ;;  %v392_v5 = vld [vmem:[#allocation7 + $0x50] sm:$0xff]  ;;  %9510 = vst [vmem:[#allocation68_spill] sm:$0xff] %v8204_v26  ;;  %v391_v63 = vld [vmem:[#allocation7 + $0x48] sm:$0xff] }
 0x164   :  { %v404_v53 = vld [vmem:[#allocation7 + $0xb0] sm:$0xff] }
 0x165   :  { %7477 = vtanh.f32 %v631_v47 }
 0x16d   :  { %v7476_v57 = vpop.eup %7475 }
 0x16e   :  { %v636_v18 = vmul.f32 %v7476_v57, %v634_v45  ;;  %v8206_v45 = vpack.c.bf16 %v387_v27, %v384_v55  ;;  %v8208_v57 = vpack.c.bf16 %v392_v5, %v389_v35  ;;  %v9515_v55 = vmov 0.0|0.0   ;;  %v397_v35 = vld [vmem:[#allocation7 + $0x78] sm:$0xff]  ;;  %v396_v5 = vld [vmem:[#allocation7 + $0x70] sm:$0xff] }
 0x16f   :  { %v7478_v6 = vpop.eup %7477 }
 0x170   :  { %v637_v38 = vmul.f32 %v7478_v6, %v635_v37  ;;  %v8199_v10 = vadd.f32 %v638_v48, %v636_v18  ;;  %9511 = vst [vmem:[#allocation69_spill] sm:$0xff] %v8206_v45  ;;  %9512 = vst [vmem:[#allocation70_spill] sm:$0xff] %v8208_v57  ;;  %v390_v37 = vld [vmem:[#allocation7 + $0x40] sm:$0xff]  ;;  %v393_v18 = vld [vmem:[#allocation7 + $0x58] sm:$0xff] }
 0x171   :  { %v395_v6 = vld [vmem:[#allocation7 + $0x68] sm:$0xff]  ;;  %v8222_v0 = vpack.c.bf16 %v393_v18, %v390_v37  ;;  %v400_v37 = vld [vmem:[#allocation7 + $0x90] sm:$0xff] }
 0x172   :  { %9508 = vst [vmem:[#allocation66_spill] sm:$0xff] %v8199_v10  ;;  %v8201_v39 = vadd.f32 %v639_v54, %v637_v38  ;;  %v398_v38 = vld [vmem:[#allocation7 + $0x80] sm:$0xff]  ;;  %v8220_v54 = vpack.c.bf16 %v391_v63, %v388_v34  ;;  %v8233_v34 = vpack.c.bf16 %v397_v35, %v394_v13 }
 0x173   :  { %9514 = vst [vmem:[#allocation72_spill] sm:$0xff] %v8222_v0  ;;  %v8226_v27 = vpack.c.bf16 %v398_v38, %v395_v6  ;;  %v403_v6 = vld [vmem:[#allocation7 + $0xa8] sm:$0xff]  ;;  %v402_v38 = vld [vmem:[#allocation7 + $0xa0] sm:$0xff] }
 0x174   :  { %9509 = vst [vmem:[#allocation67_spill] sm:$0xff] %v8201_v39  ;;  %v9349_v47 = vrot.slane %v8201_v39, 7  ;;  %9513 = vst [vmem:[#allocation71_spill] sm:$0xff] %v8220_v54  ;;  %v401_v39 = vld [vmem:[#allocation7 + $0x98] sm:$0xff]  ;;  %v8243_v13 = vpack.c.bf16 %v403_v6, %v400_v37  ;;  %v406_v35 = vld [vmem:[#allocation7 + $0xc0] sm:$0xff] }
 0x175   :  { %9516 = vst [vmem:[#allocation73_spill] sm:$0xff] %v8226_v27  ;;  %9518 = vst [vmem:[#allocation74_spill] sm:$0xff] %v8233_v34  ;;  %v8239_v18 = vpack.c.bf16 %v404_v53, %v401_v39  ;;  %v409_v39 = vld [vmem:[#allocation7 + $0xd8] sm:$0xff]  ;;  %v412_v6 = vld [vmem:[#allocation7 + $0xf0] sm:$0xff] }
 0x176   :  { %v8214_v48 = vsel %vm661_vm3, %v9349_v47, %v8199_v10  ;;  %v399_v47 = vld [vmem:[#allocation7 + $0x88] sm:$0xff]  ;;  %v9517_v10 = vmov 0.0   ;;  %9521 = vst [vmem:[#allocation77_spill] sm:$0xff] %v8243_v13  ;;  %v8253_v37 = vpack.c.bf16 %v409_v39, %v406_v35  ;;  %v418_v39 = vld [vmem:[#allocation7 + $0x120] sm:$0xff] }
 0x177   :  { %729 = vmatmul.mubr.f32.vlgmr.msra.gmra.mrb[2].mxu0 %v8214_v48  ;;  %5223 = vmatmul.mubr.f32.vlgmr.msra.gmra.mrb[8].mxu1 %v8214_v48  ;;  %v8235_v63 = vpack.c.bf16 %v399_v47, %v396_v5  ;;  %9520 = vst [vmem:[#allocation76_spill] sm:$0xff] %v8239_v18  ;;  %v408_v5 = vld [vmem:[#allocation7 + $0xd0] sm:$0xff] }
 0x178   :  { %6145 = vmatpush1.bf16.msra.mxu0 %v8204_v26  ;;  %6176 = vmatpush3.bf16.msra.mxu1 %v8206_v45  ;;  %v407_v45 = vld [vmem:[#allocation7 + $0xc8] sm:$0xff]  ;;  %v410_v26 = vld [vmem:[#allocation7 + $0xe0] sm:$0xff] }
 0x179   :  { %6147 = vmatprep.subr.bf16.mxu0 %v8208_v57  ;;  %6177 = vmatprep.subr.bf16.mxu1 %v9515_v55  ;;  %9519 = vst [vmem:[#allocation75_spill] sm:$0xff] %v8235_v63  ;;  %v405_v57 = vld [vmem:[#allocation7 + $0xb8] sm:$0xff]  ;;  %v8249_v53 = vpack.c.bf16 %v410_v26, %v407_v45  ;;  %v415_v45 = vld [vmem:[#allocation7 + $0x108] sm:$0xff] }
 0x17a   :  { %885 = vmatprep.mubr.f32.mxu0 %v9517_v10  ;;  %5257 = vmatprep.mubr.msk.f32.mxu1 %vm7827_vm2, %v9517_v10  ;;  %v8245_v47 = vpack.c.bf16 %v405_v57, %v402_v38  ;;  %v414_v38 = vld [vmem:[#allocation7 + $0x100] sm:$0xff]  ;;  %v8263_v35 = vpack.c.bf16 %v415_v45, %v412_v6  ;;  %v424_v45 = vld [vmem:[#allocation7 + $0x150] sm:$0xff] }
 0x17b   :  { %9523 = vst [vmem:[#allocation79_spill] sm:$0xff] %v8249_v53 }
 0x17c   :  { %6149 = vmatpush1.bf16.msra.mxu0 %v8220_v54  ;;  %6179 = vmatpush3.bf16.msra.mxu1 %v8222_v0  ;;  %9522 = vst [vmem:[#allocation78_spill] sm:$0xff] %v8245_v47  ;;  %v413_v0 = vld [vmem:[#allocation7 + $0xf8] sm:$0xff]  ;;  %v416_v54 = vld [vmem:[#allocation7 + $0x110] sm:$0xff]  ;;  %9525 = vst [vmem:[#allocation81_spill] sm:$0xff] %v8263_v35 }
 0x17d   :  { %6151 = vmatprep.subr.bf16.mxu0 %v8226_v27  ;;  %6180 = vmatprep.subr.bf16.mxu1 %v9515_v55  ;;  %v411_v27 = vld [vmem:[#allocation7 + $0xe8] sm:$0xff]  ;;  %v8259_v26 = vpack.c.bf16 %v416_v54, %v413_v0  ;;  %v421_v0 = vld [vmem:[#allocation7 + $0x138] sm:$0xff] }
 0x17e   :  { %v8255_v57 = vpack.c.bf16 %v411_v27, %v408_v5  ;;  %v420_v5 = vld [vmem:[#allocation7 + $0x130] sm:$0xff]  ;;  %v8273_v6 = vpack.c.bf16 %v421_v0, %v418_v39 }
 0x17f   :  { %9524 = vst [vmem:[#allocation80_spill] sm:$0xff] %v8259_v26  ;;  %v9531_v0 = vld [vmem:[#allocation49_spill] sm:$0xff] }
 0x180   :  { %6153 = vmatpush1.bf16.msra.mxu0 %v8233_v34  ;;  %6182 = vmatpush3.bf16.msra.mxu1 %v8235_v63  ;;  %v419_v63 = vld [vmem:[#allocation7 + $0x128] sm:$0xff]  ;;  %v422_v34 = vld [vmem:[#allocation7 + $0x140] sm:$0xff] }
 0x181   :  { %6155 = vmatprep.subr.bf16.mxu0 %v8239_v18  ;;  %6183 = vmatprep.subr.bf16.mxu1 %v9515_v55  ;;  %v417_v18 = vld [vmem:[#allocation7 + $0x118] sm:$0xff]  ;;  %v8269_v54 = vpack.c.bf16 %v422_v34, %v419_v63  ;;  %v427_v63 = vld [vmem:[#allocation7 + $0x168] sm:$0xff] }
 0x182   :  { %v8265_v27 = vpack.c.bf16 %v417_v18, %v414_v38  ;;  %v426_v38 = vld [vmem:[#allocation7 + $0x160] sm:$0xff] }
 0x184   :  { %6157 = vmatpush1.bf16.msra.mxu0 %v8243_v13  ;;  %6185 = vmatpush3.bf16.msra.mxu1 %v8245_v47  ;;  %v425_v47 = vld [vmem:[#allocation7 + $0x158] sm:$0xff]  ;;  %v428_v13 = vld [vmem:[#allocation7 + $0x170] sm:$0xff] }
 0x185   :  { %6159 = vmatprep.subr.bf16.mxu0 %v8249_v53  ;;  %6186 = vmatprep.subr.bf16.mxu1 %v9515_v55  ;;  %v423_v53 = vld [vmem:[#allocation7 + $0x148] sm:$0xff]  ;;  %v8279_v34 = vpack.c.bf16 %v428_v13, %v425_v47  ;;  %v9527_v13 = vld [vmem:[#allocation45_spill] sm:$0xff]  ;;  %v9528_v47 = vld [vmem:[#allocation46_spill] sm:$0xff] }
 0x186   :  { %v8275_v18 = vpack.c.bf16 %v423_v53, %v420_v5  ;;  %v9529_v53 = vld [vmem:[#allocation47_spill] sm:$0xff]  ;;  %v9532_v5 = vld [vmem:[#allocation50_spill] sm:$0xff] }
 0x188   :  { %6161 = vmatpush1.bf16.msra.mxu0 %v8253_v37  ;;  %6188 = vmatpush3.bf16.msra.mxu1 %v8255_v57 }
 0x189   :  { %6163 = vmatprep.subr.bf16.mxu0 %v8259_v26  ;;  %6189 = vmatprep.subr.bf16.mxu1 %v9515_v55  ;;  %v429_v26 = vld [vmem:[#allocation7 + $0x178] sm:$0xff] }
 0x18a   :  { %v8285_v39 = vpack.c.bf16 %v429_v26, %v426_v38  ;;  %v9530_v26 = vld [vmem:[#allocation48_spill] sm:$0xff]  ;;  %v9535_v38 = vld [vmem:[#allocation53_spill] sm:$0xff] }
 0x18c   :  { %6165 = vmatpush1.bf16.msra.mxu0 %v8263_v35  ;;  %6191 = vmatpush3.bf16.msra.mxu1 %v8265_v27  ;;  %v8283_v35 = vpack.c.bf16 %v427_v63, %v424_v45  ;;  %v9533_v45 = vld [vmem:[#allocation51_spill] sm:$0xff]  ;;  %v9534_v63 = vld [vmem:[#allocation52_spill] sm:$0xff] }
 0x18d   :  { %6167 = vmatprep.subr.bf16.mxu0 %v8269_v54  ;;  %6192 = vmatprep.subr.bf16.mxu1 %v9515_v55 }
 0x190   :  { %6169 = vmatpush1.bf16.msra.mxu0 %v8273_v6  ;;  %6194 = vmatpush3.bf16.msra.mxu1 %v8275_v18 }
 0x191   :  { %6171 = vmatprep.subr.bf16.mxu0 %v8279_v34  ;;  %6195 = vmatprep.subr.bf16.mxu1 %v9515_v55 }
 0x194   :  { %6173 = vmatpush1.bf16.msra.mxu0 %v8283_v35  ;;  %6197 = vmatpush3.bf16.msra.mxu1 %v8285_v39 }
 0x195   :  { %6199 = vmatprep.subr.bf16.mxu0 %v7962_v4  ;;  %6230 = vmatprep.subr.bf16.mxu1 %v9515_v55 }
 0x197   :  { %886 = vmatmul.mubr.f32.vlgmr.msra.gmra.mrb[2].mxu0 %v9517_v10  ;;  %5258 = vmatmul.mubr.f32.vlgmr.msra.gmra.mrb[10].mxu1 %v9517_v10 }
 0x198   :  { %6201 = vmatpush1.bf16.msra.mxu0 %v7964_v8  ;;  %6232 = vmatpush3.bf16.msra.mxu1 %v8011_v42 }
 0x199   :  { %6203 = vmatprep.subr.bf16.mxu0 %v7966_v9  ;;  %6233 = vmatprep.subr.bf16.mxu1 %v9515_v55 }
 0x19a   :  { %1047 = vmatprep.mubr.f32.mxu0 %v9517_v10  ;;  %5292 = vmatprep.mubr.msk.f32.mxu1 %vm7827_vm2, %v9517_v10 }
 0x19c   :  { %6205 = vmatpush1.bf16.msra.mxu0 %v7970_v14  ;;  %6235 = vmatpush3.bf16.msra.mxu1 %v8021_v51 }
 0x19d   :  { %6207 = vmatprep.subr.bf16.mxu0 %v7973_v15  ;;  %6236 = vmatprep.subr.bf16.mxu1 %v9515_v55 }
 0x1a0   :  { %6209 = vmatpush1.bf16.msra.mxu0 %v7979_v22  ;;  %6238 = vmatpush3.bf16.msra.mxu1 %v8033_v60 }
 0x1a1   :  { %6211 = vmatprep.subr.bf16.mxu0 %v7988_v25  ;;  %6239 = vmatprep.subr.bf16.mxu1 %v9515_v55 }
 0x1a4   :  { %6213 = vmatpush1.bf16.msra.mxu0 %v7995_v30  ;;  %6241 = vmatpush3.bf16.msra.mxu1 %v8043_v3 }
 0x1a5   :  { %6215 = vmatprep.subr.bf16.mxu0 %v8002_v33  ;;  %6242 = vmatprep.subr.bf16.mxu1 %v9515_v55 }
 0x1a8   :  { %6217 = vmatpush1.bf16.msra.mxu0 %v8008_v40  ;;  %6244 = vmatpush3.bf16.msra.mxu1 %v8049_v7 }
 0x1a9   :  { %6219 = vmatprep.subr.bf16.mxu0 %v8014_v43  ;;  %6245 = vmatprep.subr.bf16.mxu1 %v9515_v55 }
 0x1ac   :  { %6221 = vmatpush1.bf16.msra.mxu0 %v8018_v49  ;;  %6247 = vmatpush3.bf16.msra.mxu1 %v8054_v12 }
 0x1ad   :  { %6223 = vmatprep.subr.bf16.mxu0 %v8024_v52  ;;  %6248 = vmatprep.subr.bf16.mxu1 %v9515_v55 }
 0x1b0   :  { %6225 = vmatpush1.bf16.msra.mxu0 %v8030_v58  ;;  %6250 = vmatpush3.bf16.msra.mxu1 %v8059_v17 }
 0x1b1   :  { %6227 = vmatprep.subr.bf16.mxu0 %v8036_v61  ;;  %6251 = vmatprep.subr.bf16.mxu1 %v9515_v55 }
 0x1b4   :  { %6229 = vmatpush1.bf16.msra.mxu0 %v8040_v2  ;;  %6253 = vmatpush3.bf16.msra.mxu1 %v8063_v20 }
 0x1b5   :  { %6255 = vmatprep.subr.bf16.mxu0 %v8071_v24  ;;  %6286 = vmatprep.subr.bf16.mxu1 %v9515_v55 }
 0x1b7   :  { %1048 = vmatmul.mubr.f32.vlgmr.msra.gmra.mrb[4].mxu0 %v8214_v48  ;;  %5293 = vmatmul.mubr.f32.vlgmr.msra.gmra.mrb[12].mxu1 %v8214_v48  ;;  %v9526_v48 = vld [vmem:[#allocation44_spill] sm:$0xff] }
 0x1b8   :  { %6257 = vmatpush1.bf16.msra.mxu0 %v8073_v29  ;;  %6288 = vmatpush3.bf16.msra.mxu1 %v8076_v32 }
 0x1b9   :  { %6259 = vmatprep.subr.bf16.mxu0 %v8080_v36  ;;  %6289 = vmatprep.subr.bf16.mxu1 %v9515_v55 }
 0x1ba   :  { %1250 = vmatprep.mubr.f32.mxu0 %v9517_v10  ;;  %5327 = vmatprep.mubr.msk.f32.mxu1 %vm7827_vm2, %v9517_v10 }
 0x1bc   :  { %6261 = vmatpush1.bf16.msra.mxu0 %v8083_v44  ;;  %6291 = vmatpush3.bf16.msra.mxu1 %v8086_v46 }
 0x1bd   :  { %6263 = vmatprep.subr.bf16.mxu0 %v8090_v50  ;;  %6292 = vmatprep.subr.bf16.mxu1 %v9515_v55 }
 0x1c0   :  { %6265 = vmatpush1.bf16.msra.mxu0 %v8093_v56  ;;  %6294 = vmatpush3.bf16.msra.mxu1 %v8096_v59 }
 0x1c1   :  { %6267 = vmatprep.subr.bf16.mxu0 %v8100_v1  ;;  %6295 = vmatprep.subr.bf16.mxu1 %v9515_v55 }
 0x1c4   :  { %6269 = vmatpush1.bf16.msra.mxu0 %v8103_v11  ;;  %6297 = vmatpush3.bf16.msra.mxu1 %v8106_v16 }
 0x1c5   :  { %6271 = vmatprep.subr.bf16.mxu0 %v8110_v21  ;;  %6298 = vmatprep.subr.bf16.mxu1 %v9515_v55 }
 0x1c8   :  { %6273 = vmatpush1.bf16.msra.mxu0 %v8113_v28  ;;  %6300 = vmatpush3.bf16.msra.mxu1 %v9526_v48  ;;  %v9538_v48 = vld [vmem:[#allocation56_spill] sm:$0xff] }
 0x1c9   :  { %6275 = vmatprep.subr.bf16.mxu0 %v9527_v13  ;;  %6301 = vmatprep.subr.bf16.mxu1 %v9515_v55  ;;  %v9536_v13 = vld [vmem:[#allocation54_spill] sm:$0xff] }
 0x1cc   :  { %6277 = vmatpush1.bf16.msra.mxu0 %v9528_v47  ;;  %6303 = vmatpush3.bf16.msra.mxu1 %v9529_v53 }
 0x1cd   :  { %6279 = vmatprep.subr.bf16.mxu0 %v9530_v26  ;;  %6304 = vmatprep.subr.bf16.mxu1 %v9515_v55 }
 0x1d0   :  { %6281 = vmatpush1.bf16.msra.mxu0 %v9531_v0  ;;  %6306 = vmatpush3.bf16.msra.mxu1 %v9532_v5  ;;  %v430_v0 = vld [vmem:[%s9307_s8] sm:$0x7] }
 0x1d1   :  { %6283 = vmatprep.subr.bf16.mxu0 %v9533_v45  ;;  %6307 = vmatprep.subr.bf16.mxu1 %v9515_v55  ;;  %v381_v45 = vld [vmem:[%s9306_s7] sm:$0x7] }
 0x1d2   :  { %v9537_v5 = vld [vmem:[#allocation55_spill] sm:$0xff] }
 0x1d3   :  { %v646_v47 = vrot.slane %v381_v45, %v9537_v5 }
 0x1d4   :  { %6285 = vmatpush1.bf16.msra.mxu0 %v9534_v63  ;;  %6309 = vmatpush3.bf16.msra.mxu1 %v9535_v38  ;;  %v809_v63 = vrot.slane %v430_v0, %v9537_v5  ;;  %v650_v38 = vrot.slane %v381_v45, %v9538_v48 }
 0x1d5   :  { %6311 = vmatprep.subr.bf16.mxu0 %v9536_v13  ;;  %6342 = vmatprep.subr.bf16.mxu1 %v9515_v55  ;;  %v813_v13 = vrot.slane %v430_v0, %v9538_v48  ;;  %v8384_v48 = vrot.slane %v430_v0, %v8186_v62 }
 0x1d6   :  { %v8377_v28 = vadd.f32 %v809_v63, %v646_v47  ;;  %v8387_v47 = vrot.slane %v381_v45, %v8186_v62 }
 0x1d7   :  { %v8379_v21 = vadd.f32 %v813_v13, %v650_v38  ;;  %9541 = vst [vmem:[#allocation82_spill] sm:$0xff] %v8384_v48 }
 0x1d8   :  { %9539 = vst [vmem:[#allocation55_spill] sm:$0xff] %v8377_v28  ;;  %9542 = vst [vmem:[#allocation83_spill] sm:$0xff] %v8387_v47 }
 0x1d9   :  { %9540 = vst [vmem:[#allocation56_spill] sm:$0xff] %v8379_v21 }
 0x24a   :  { %v801_v53 = vpop.f32.mrb[8].mxu1 }
 0x24b   :  { %v5224_v26 = vpop.f32.mrb[9].mxu1 }
 0x26a   :  { %v887_v26 = vpop.f32.mrb[2].mxu0  ;;  %v958_v16 = vpop.f32.mrb[10].mxu1 }
 0x26b   :  { %v7399_v11 = vadd.f32 %v8377_v28, %v887_v26  ;;  %v889_v1 = vpop.f32.mrb[3].mxu0  ;;  %v5259_v59 = vpop.f32.mrb[11].mxu1  ;;  %v959_v38 = vadd.f32 %v958_v16, %v8384_v48  ;;  %v9545_v16 = vld [vmem:[#allocation59_spill] sm:$0xff] }
 0x26c   :  { %v7401_v50 = vadd.f32 %v8379_v21, %v889_v1  ;;  %v9544_v21 = vld [vmem:[#allocation58_spill] sm:$0xff] }
 0x26d   :  { %v4677_v56 = vmul.f32 -1.442695, %v7399_v11  ;;  %v802_v11 = vadd.f32 %v801_v53, %v8387_v47 }
 0x26e   :  { %v4678_v46 = vmul.f32 -1.442695, %v7401_v50 }
 0x26f   :  { %7479 = vpow2.f32 %v4677_v56 }
 0x270   :  { %7481 = vpow2.f32 %v4678_v46 }
 0x279   :  { %v7480_v5 = vpop.eup %7479 }
 0x27a   :  { %v966_v44 = vadd.f32 1.0, %v7480_v5  ;;  %v7482_v13 = vpop.eup %7481 }
 0x27b   :  { %v973_v63 = vadd.f32 1.0, %v7482_v13 }
 0x27c   :  { %7483 = vrcp.f32 %v966_v44  ;;  %v9543_v44 = vld [vmem:[#allocation57_spill] sm:$0xff] }
 0x27d   :  { %7485 = vrcp.f32 %v973_v63 }
 0x286   :  { %v7484_v59 = vpop.eup %7483 }
 0x287   :  { %v976_v56 = vmul.f32 %v7484_v59, %v959_v38  ;;  %v7486_v38 = vpop.eup %7485 }
 0x289   :  { %v977_v50 = vadd.f32 %v976_v56, %v802_v11 }
 0x28a   :  { %v1049_v46 = vpop.f32.mrb[4].mxu0  ;;  %v1120_v1 = vpop.f32.mrb[12].mxu1 }
 0x28b   :  { %7487 = vtanh.f32 %v977_v50  ;;  %v1050_v26 = vadd.f32 %v1049_v46, %v9543_v44  ;;  %v1051_v0 = vpop.f32.mrb[5].mxu0  ;;  %v5294_v5 = vpop.f32.mrb[13].mxu1  ;;  %v979_v50 = vsub.f32 1.0, %v7486_v38 }
 0x28c   :  { %v1052_v28 = vadd.f32 %v1051_v0, %v9544_v21  ;;  %v981_v5 = vmul.f32 0.0, %v7486_v38 }
 0x28d   :  { %v1125_v62 = vrot.slane %v1050_v26, 7  ;;  %v1129_v45 = vadd.f32 %v1050_v26, %v8176_v19 }
 0x28e   :  { %v1143_v13 = vrot.slane %v1052_v28, 7  ;;  %v1147_v63 = vadd.f32 %v1052_v28, %v8182_v41  ;;  %v9549_v41 = vld [vmem:[#allocation67_spill] sm:$0xff] }
 0x28f   :  { %v1128_v48 = vadd.f32 %v1125_v62, %v9545_v16  ;;  %v4680_v36 = vmul.f32 -1.442695, %v1129_v45 }
 0x290   :  { %v1146_v53 = vadd.f32 %v1143_v13, %v8179_v31  ;;  %v4682_v56 = vmul.f32 -1.442695, %v1147_v63 }
 0x291   :  { %v4679_v59 = vmul.f32 -1.442695, %v1128_v48  ;;  %7489 = vpow2.f32 %v4680_v36  ;;  %v1121_v48 = vadd.f32 %v1120_v1, %v8189_v23 }
 0x292   :  { %v4681_v11 = vmul.f32 -1.442695, %v1146_v53 }
 0x293   :  { %7491 = vpow2.f32 %v4679_v59  ;;  %v1161_v59 = vrot.slane %v1121_v48, 7 }
 0x294   :  { %7493 = vpow2.f32 %v4681_v11 }
 0x295   :  { %v7488_v46 = vpop.eup %7487  ;;  %7495 = vpow2.f32 %v4682_v56  ;;  %v9546_v56 = vld [vmem:[#allocation66_spill] sm:$0xff] }
 0x296   :  { %v980_v0 = vmul.f32 %v7488_v46, %v979_v50  ;;  %v1174_v50 = vrot.slane %v9546_v56, 7 }
 0x298   :  { %v8397_v26 = vadd.f32 %v981_v5, %v980_v0  ;;  %v9547_v5 = vld [vmem:[#allocation65_spill] sm:$0xff] }
 0x29b   :  { %v7490_v62 = vpop.eup %7489 }
 0x29c   :  { %v1137_v45 = vadd.f32 1.0, %v7490_v62 }
 0x29d   :  { %v7492_v19 = vpop.eup %7491 }
 0x29e   :  { %v7494_v13 = vpop.eup %7493  ;;  %v1136_v31 = vadd.f32 1.0, %v7492_v19  ;;  %7497 = vrcp.f32 %v1137_v45  ;;  %v9548_v45 = vld [vmem:[#allocation64_spill] sm:$0xff] }
 0x29f   :  { %v1154_v28 = vadd.f32 1.0, %v7494_v13  ;;  %v7496_v36 = vpop.eup %7495 }
 0x2a0   :  { %7499 = vrcp.f32 %v1136_v31  ;;  %v1155_v53 = vadd.f32 1.0, %v7496_v36 }
 0x2a1   :  { %7501 = vrcp.f32 %v1154_v28 }
 0x2a2   :  { %7503 = vrcp.f32 %v1155_v53 }
 0x2a8   :  { %v7498_v63 = vpop.eup %7497 }
 0x2a9   :  { %v1165_v11 = vmul.f32 %v7498_v63, %v1121_v48  ;;  %v9550_v48 = vrot.slane %v9549_v41, 7  ;;  %v9552_v41 = vld [vmem:[#allocation69_spill] sm:$0xff] }
 0x2aa   :  { %v7500_v38 = vpop.eup %7499 }
 0x2ab   :  { %v7502_v46 = vpop.eup %7501  ;;  %v1164_v0 = vmul.f32 %v7500_v38, %v1161_v59  ;;  %v1167_v62 = vadd.f32 %v1165_v11, %v9547_v5 }
 0x2ac   :  { %v1177_v19 = vmul.f32 %v7502_v46, %v1174_v50  ;;  %v7504_v31 = vpop.eup %7503  ;;  %v1170_v36 = vsub.f32 1.0, %v7502_v46  ;;  %v9551_v50 = vld [vmem:[#allocation68_spill] sm:$0xff]  ;;  %v9553_v46 = vld [vmem:[#allocation70_spill] sm:$0xff] }
 0x2ad   :  { %v1166_v13 = vadd.f32 %v1164_v0, %v9548_v45  ;;  %7505 = vtanh.f32 %v1167_v62  ;;  %v1171_v28 = vsub.f32 1.0, %v7504_v31  ;;  %v1178_v53 = vmul.f32 %v7504_v31, %v9550_v48  ;;  %v9556_v0 = vld [vmem:[#allocation73_spill] sm:$0xff]  ;;  %v9557_v62 = vld [vmem:[#allocation74_spill] sm:$0xff] }
 0x2ae   :  { %v9560_v31 = vld [vmem:[#allocation77_spill] sm:$0xff] }
 0x2af   :  { %7507 = vtanh.f32 %v1166_v13  ;;  %v9559_v13 = vld [vmem:[#allocation76_spill] sm:$0xff]  ;;  %v9564_v48 = vld [vmem:[#allocation81_spill] sm:$0xff] }
 0x2b7   :  { %v7506_v1 = vpop.eup %7505 }
 0x2b8   :  { %v1173_v23 = vmul.f32 %v7506_v1, %v1171_v28  ;;  %v9561_v28 = vld [vmem:[#allocation78_spill] sm:$0xff]  ;;  %v9562_v1 = vld [vmem:[#allocation79_spill] sm:$0xff] }
 0x2b9   :  { %v7508_v63 = vpop.eup %7507 }
 0x2ba   :  { %v1172_v16 = vmul.f32 %v7508_v63, %v1170_v36  ;;  %v8405_v56 = vadd.f32 %v1178_v53, %v1173_v23  ;;  %v9554_v23 = vld [vmem:[#allocation71_spill] sm:$0xff]  ;;  %v9563_v36 = vld [vmem:[#allocation80_spill] sm:$0xff]  ;;  %v9565_v53 = vld [vmem:[#allocation33_spill] sm:$0xff] }
 0x2bb   :  { %v9566_v63 = vld [vmem:[#allocation34_spill] sm:$0xff] }
 0x2bc   :  { %v8407_v59 = vadd.f32 %v1177_v19, %v1172_v16  ;;  %v9555_v16 = vld [vmem:[#allocation72_spill] sm:$0xff]  ;;  %v9558_v19 = vld [vmem:[#allocation75_spill] sm:$0xff] }
 0x2be   :  { %v1183_v11 = vrot.slane %v8407_v59, 1 }
 0x2c0   :  { %v8412_v38 = vsel %vm661_vm3, %v8405_v56, %v1183_v11  ;;  %v9567_v11 = vld [vmem:[#allocation35_spill] sm:$0xff] }
 0x2c1   :  { %1251 = vmatmul.mubr.f32.vlgmr.msra.gmra.mrb[6].mxu0 %v8412_v38  ;;  %5328 = vmatmul.mubr.f32.vlgmr.msra.gmra.mrb[14].mxu1 %v8412_v38 }
 0x2c2   :  { %6313 = vmatpush1.bf16.msra.mxu0 %v9551_v50  ;;  %6344 = vmatpush3.bf16.msra.mxu1 %v9552_v41 }
 0x2c3   :  { %6315 = vmatprep.subr.bf16.mxu0 %v9553_v46  ;;  %6345 = vmatprep.subr.bf16.mxu1 %v9515_v55 }
 0x2c4   :  { %1391 = vmatprep.mubr.f32.mxu0 %v9517_v10  ;;  %5362 = vmatprep.mubr.msk.f32.mxu1 %vm7827_vm2, %v9517_v10 }
 0x2c6   :  { %6317 = vmatpush1.bf16.msra.mxu0 %v9554_v23  ;;  %6347 = vmatpush3.bf16.msra.mxu1 %v9555_v16 }
 0x2c7   :  { %6319 = vmatprep.subr.bf16.mxu0 %v9556_v0  ;;  %6348 = vmatprep.subr.bf16.mxu1 %v9515_v55 }
 0x2ca   :  { %6321 = vmatpush1.bf16.msra.mxu0 %v9557_v62  ;;  %6350 = vmatpush3.bf16.msra.mxu1 %v9558_v19 }
 0x2cb   :  { %6323 = vmatprep.subr.bf16.mxu0 %v9559_v13  ;;  %6351 = vmatprep.subr.bf16.mxu1 %v9515_v55 }
 0x2ce   :  { %6325 = vmatpush1.bf16.msra.mxu0 %v9560_v31  ;;  %6353 = vmatpush3.bf16.msra.mxu1 %v9561_v28 }
 0x2cf   :  { %6327 = vmatprep.subr.bf16.mxu0 %v9562_v1  ;;  %6354 = vmatprep.subr.bf16.mxu1 %v9515_v55 }
 0x2d2   :  { %6329 = vmatpush1.bf16.msra.mxu0 %v8253_v37  ;;  %6356 = vmatpush3.bf16.msra.mxu1 %v8255_v57 }
 0x2d3   :  { %6331 = vmatprep.subr.bf16.mxu0 %v9563_v36  ;;  %6357 = vmatprep.subr.bf16.mxu1 %v9515_v55 }
 0x2d6   :  { %6333 = vmatpush1.bf16.msra.mxu0 %v9564_v48  ;;  %6359 = vmatpush3.bf16.msra.mxu1 %v8265_v27 }
 0x2d7   :  { %6335 = vmatprep.subr.bf16.mxu0 %v8269_v54  ;;  %6360 = vmatprep.subr.bf16.mxu1 %v9515_v55 }
 0x2da   :  { %6337 = vmatpush1.bf16.msra.mxu0 %v8273_v6  ;;  %6362 = vmatpush3.bf16.msra.mxu1 %v8275_v18 }
 0x2db   :  { %6339 = vmatprep.subr.bf16.mxu0 %v8279_v34  ;;  %6363 = vmatprep.subr.bf16.mxu1 %v9515_v55 }
 0x2de   :  { %6341 = vmatpush1.bf16.msra.mxu0 %v8283_v35  ;;  %6365 = vmatpush3.bf16.msra.mxu1 %v8285_v39 }
 0x2df   :  { %6367 = vmatprep.subr.bf16.mxu0 %v7962_v4  ;;  %6398 = vmatprep.subr.bf16.mxu1 %v9515_v55 }
 0x2e1   :  { %1392 = vmatmul.mubr.f32.vlgmr.msra.gmra.mrb[6].mxu0 %v8397_v26  ;;  %5363 = vmatmul.mubr.f32.vlgmr.msra.gmra.mrb[16].mxu1 %v8397_v26 }
 0x2e2   :  { %6369 = vmatpush1.bf16.msra.mxu0 %v7964_v8  ;;  %6400 = vmatpush3.bf16.msra.mxu1 %v8011_v42 }
 0x2e3   :  { %6371 = vmatprep.subr.bf16.mxu0 %v7966_v9  ;;  %6401 = vmatprep.subr.bf16.mxu1 %v9515_v55 }
 0x2e4   :  { %1553 = vmatprep.mubr.f32.mxu0 %v9517_v10  ;;  %5397 = vmatprep.mubr.msk.f32.mxu1 %vm7827_vm2, %v9517_v10 }
 0x2e6   :  { %6373 = vmatpush1.bf16.msra.mxu0 %v7970_v14  ;;  %6403 = vmatpush3.bf16.msra.mxu1 %v8021_v51 }
 0x2e7   :  { %6375 = vmatprep.subr.bf16.mxu0 %v7973_v15  ;;  %6404 = vmatprep.subr.bf16.mxu1 %v9515_v55 }
 0x2ea   :  { %6377 = vmatpush1.bf16.msra.mxu0 %v7979_v22  ;;  %6406 = vmatpush3.bf16.msra.mxu1 %v8033_v60 }
 0x2eb   :  { %6379 = vmatprep.subr.bf16.mxu0 %v7988_v25  ;;  %6407 = vmatprep.subr.bf16.mxu1 %v9515_v55 }
 0x2ee   :  { %6381 = vmatpush1.bf16.msra.mxu0 %v7995_v30  ;;  %6409 = vmatpush3.bf16.msra.mxu1 %v8043_v3 }
 0x2ef   :  { %6383 = vmatprep.subr.bf16.mxu0 %v8002_v33  ;;  %6410 = vmatprep.subr.bf16.mxu1 %v9515_v55 }
 0x2f2   :  { %6385 = vmatpush1.bf16.msra.mxu0 %v8008_v40  ;;  %6412 = vmatpush3.bf16.msra.mxu1 %v8049_v7  ;;  %v9589_v7 = vld [vmem:[#allocation82_spill] sm:$0xff] }
 0x2f3   :  { %6387 = vmatprep.subr.bf16.mxu0 %v8014_v43  ;;  %6413 = vmatprep.subr.bf16.mxu1 %v9515_v55 }
 0x2f6   :  { %6389 = vmatpush1.bf16.msra.mxu0 %v8018_v49  ;;  %6415 = vmatpush3.bf16.msra.mxu1 %v8054_v12 }
 0x2f7   :  { %6391 = vmatprep.subr.bf16.mxu0 %v8024_v52  ;;  %6416 = vmatprep.subr.bf16.mxu1 %v9515_v55 }
 0x2fa   :  { %6393 = vmatpush1.bf16.msra.mxu0 %v8030_v58  ;;  %6418 = vmatpush3.bf16.msra.mxu1 %v8059_v17  ;;  %v9587_v17 = vld [vmem:[#allocation55_spill] sm:$0xff] }
 0x2fb   :  { %6395 = vmatprep.subr.bf16.mxu0 %v8036_v61  ;;  %6419 = vmatprep.subr.bf16.mxu1 %v9515_v55 }
 0x2fe   :  { %6397 = vmatpush1.bf16.msra.mxu0 %v8040_v2  ;;  %6421 = vmatpush3.bf16.msra.mxu1 %v8063_v20  ;;  %v9573_v20 = vld [vmem:[#allocation41_spill] sm:$0xff]  ;;  %v9574_v2 = vld [vmem:[#allocation42_spill] sm:$0xff] }
 0x2ff   :  { %6423 = vmatprep.subr.bf16.mxu0 %v8071_v24  ;;  %6454 = vmatprep.subr.bf16.mxu1 %v9515_v55  ;;  %v9568_v24 = vld [vmem:[#allocation36_spill] sm:$0xff] }
 0x301   :  { %1554 = vmatmul.mubr.f32.vlgmr.msra.gmra.mrb[8].mxu0 %v8412_v38  ;;  %5398 = vmatmul.mubr.f32.vlgmr.msra.gmra.mrb[18].mxu1 %v8412_v38  ;;  %v9569_v38 = vld [vmem:[#allocation37_spill] sm:$0xff] }
 0x302   :  { %6425 = vmatpush1.bf16.msra.mxu0 %v8073_v29  ;;  %6456 = vmatpush3.bf16.msra.mxu1 %v8076_v32  ;;  %v9570_v32 = vld [vmem:[#allocation38_spill] sm:$0xff]  ;;  %v9572_v29 = vld [vmem:[#allocation40_spill] sm:$0xff] }
 0x303   :  { %6427 = vmatprep.subr.bf16.mxu0 %v9565_v53  ;;  %6457 = vmatprep.subr.bf16.mxu1 %v9515_v55  ;;  %v9571_v53 = vld [vmem:[#allocation39_spill] sm:$0xff] }
 0x304   :  { %1761 = vmatprep.mubr.f32.mxu0 %v9517_v10  ;;  %5432 = vmatprep.mubr.msk.f32.mxu1 %vm7827_vm2, %v9517_v10 }
 0x306   :  { %6429 = vmatpush1.bf16.msra.mxu0 %v9566_v63  ;;  %6459 = vmatpush3.bf16.msra.mxu1 %v9567_v11  ;;  %v9575_v11 = vld [vmem:[#allocation43_spill] sm:$0xff]  ;;  %v9577_v63 = vld [vmem:[#allocation45_spill] sm:$0xff] }
 0x307   :  { %6431 = vmatprep.subr.bf16.mxu0 %v9568_v24  ;;  %6460 = vmatprep.subr.bf16.mxu1 %v9515_v55  ;;  %v9576_v24 = vld [vmem:[#allocation44_spill] sm:$0xff] }
 0x30a   :  { %6433 = vmatpush1.bf16.msra.mxu0 %v9569_v38  ;;  %6462 = vmatpush3.bf16.msra.mxu1 %v9570_v32  ;;  %v9578_v32 = vld [vmem:[#allocation46_spill] sm:$0xff]  ;;  %v9580_v38 = vld [vmem:[#allocation48_spill] sm:$0xff] }
 0x30b   :  { %6435 = vmatprep.subr.bf16.mxu0 %v9571_v53  ;;  %6463 = vmatprep.subr.bf16.mxu1 %v9515_v55  ;;  %v9579_v53 = vld [vmem:[#allocation47_spill] sm:$0xff] }
 0x30e   :  { %6437 = vmatpush1.bf16.msra.mxu0 %v9572_v29  ;;  %6465 = vmatpush3.bf16.msra.mxu1 %v9573_v20  ;;  %v9581_v20 = vld [vmem:[#allocation49_spill] sm:$0xff]  ;;  %v9583_v29 = vld [vmem:[#allocation51_spill] sm:$0xff] }
 0x30f   :  { %6439 = vmatprep.subr.bf16.mxu0 %v9574_v2  ;;  %6466 = vmatprep.subr.bf16.mxu1 %v9515_v55  ;;  %v9582_v2 = vld [vmem:[#allocation50_spill] sm:$0xff] }
 0x312   :  { %6441 = vmatpush1.bf16.msra.mxu0 %v9575_v11  ;;  %6468 = vmatpush3.bf16.msra.mxu1 %v9576_v24  ;;  %v9584_v24 = vld [vmem:[#allocation52_spill] sm:$0xff]  ;;  %v9586_v11 = vld [vmem:[#allocation54_spill] sm:$0xff] }
 0x313   :  { %6443 = vmatprep.subr.bf16.mxu0 %v9577_v63  ;;  %6469 = vmatprep.subr.bf16.mxu1 %v9515_v55  ;;  %v9585_v63 = vld [vmem:[#allocation53_spill] sm:$0xff] }
 0x316   :  { %6445 = vmatpush1.bf16.msra.mxu0 %v9578_v32  ;;  %6471 = vmatpush3.bf16.msra.mxu1 %v9579_v53 }
 0x317   :  { %6447 = vmatprep.subr.bf16.mxu0 %v9580_v38  ;;  %6472 = vmatprep.subr.bf16.mxu1 %v9515_v55 }
 0x31a   :  { %6449 = vmatpush1.bf16.msra.mxu0 %v9581_v20  ;;  %6474 = vmatpush3.bf16.msra.mxu1 %v9582_v2 }
 0x31b   :  { %6451 = vmatprep.subr.bf16.mxu0 %v9583_v29  ;;  %6475 = vmatprep.subr.bf16.mxu1 %v9515_v55  ;;  %v9588_v29 = vld [vmem:[#allocation56_spill] sm:$0xff] }
 0x31e   :  { %6453 = vmatpush1.bf16.msra.mxu0 %v9584_v24  ;;  %6477 = vmatpush3.bf16.msra.mxu1 %v9585_v63 }
 0x31f   :  { %6479 = vmatprep.subr.bf16.mxu0 %v9586_v11  ;;  %6510 = vmatprep.subr.bf16.mxu1 %v9515_v55 }
 0x394   :  { %v1323_v53 = vpop.f32.mrb[14].mxu1 }
 0x395   :  { %v5329_v38 = vpop.f32.mrb[15].mxu1  ;;  %v1324_v33 = vadd.f32 %v1323_v53, %v8387_v47 }
 0x3b4   :  { %v1393_v32 = vpop.f32.mrb[6].mxu0  ;;  %v1464_v61 = vpop.f32.mrb[16].mxu1 }
 0x3b5   :  { %v7403_v20 = vadd.f32 %v9587_v17, %v1393_v32  ;;  %v1395_v58 = vpop.f32.mrb[7].mxu0  ;;  %v5364_v2 = vpop.f32.mrb[17].mxu1  ;;  %v1465_v40 = vadd.f32 %v1464_v61, %v9589_v7  ;;  %v9590_v61 = vld [vmem:[#allocation59_spill] sm:$0xff]  ;;  %v9591_v17 = vld [vmem:[#allocation60_spill] sm:$0xff] }
 0x3b6   :  { %v7405_v12 = vadd.f32 %v9588_v29, %v1395_v58 }
 0x3b7   :  { %v4683_v52 = vmul.f32 -1.442695, %v7403_v20 }
 0x3b8   :  { %v4684_v49 = vmul.f32 -1.442695, %v7405_v12 }
 0x3b9   :  { %7509 = vpow2.f32 %v4683_v52 }
 0x3ba   :  { %7511 = vpow2.f32 %v4684_v49 }
 0x3c3   :  { %v7510_v24 = vpop.eup %7509 }
 0x3c4   :  { %v1472_v63 = vadd.f32 1.0, %v7510_v24  ;;  %v7512_v11 = vpop.eup %7511 }
 0x3c5   :  { %v1479_v43 = vadd.f32 1.0, %v7512_v11 }
 0x3c6   :  { %7513 = vrcp.f32 %v1472_v63 }
 0x3c7   :  { %7515 = vrcp.f32 %v1479_v43 }
 0x3d0   :  { %v7514_v38 = vpop.eup %7513 }
 0x3d1   :  { %v1482_v3 = vmul.f32 %v7514_v38, %v1465_v40  ;;  %v9592_v40 = vld [vmem:[#allocation61_spill] sm:$0xff]  ;;  %v7516_v38 = vpop.eup %7515 }
 0x3d3   :  { %v1483_v32 = vadd.f32 %v1482_v3, %v1324_v33  ;;  %v9593_v33 = vld [vmem:[#allocation62_spill] sm:$0xff] }
 0x3d4   :  { %v1555_v2 = vpop.f32.mrb[8].mxu0  ;;  %v1626_v20 = vpop.f32.mrb[18].mxu1 }
 0x3d5   :  { %7517 = vtanh.f32 %v1483_v32  ;;  %v1556_v52 = vadd.f32 %v1555_v2, %v9543_v44  ;;  %v1557_v58 = vpop.f32.mrb[9].mxu0  ;;  %v5399_v49 = vpop.f32.mrb[19].mxu1 }
 0x3d6   :  { %v1558_v12 = vadd.f32 %v1557_v58, %v9544_v21  ;;  %v1485_v58 = vsub.f32 1.0, %v7516_v38 }
 0x3d7   :  { %v1631_v24 = vrot.slane %v1556_v52, 6  ;;  %v1632_v63 = vrot.slane %v1556_v52, 7 }
 0x3d8   :  { %v1650_v11 = vrot.slane %v1558_v12, 6  ;;  %v1651_v29 = vrot.slane %v1558_v12, 7  ;;  %v1487_v12 = vmul.f32 %v7516_v38, %v8397_v26  ;;  %v1683_v38 = vrot.slane %v8407_v59, 7 }
 0x3d9   :  { %v1635_v7 = vadd.f32 %v1631_v24, %v9590_v61  ;;  %v1636_v53 = vadd.f32 %v1632_v63, %v9591_v17 }
 0x3da   :  { %v1654_v43 = vadd.f32 %v1650_v11, %v9592_v40  ;;  %v1655_v3 = vadd.f32 %v1651_v29, %v9593_v33 }
 0x3db   :  { %v4685_v32 = vmul.f32 -1.442695, %v1635_v7  ;;  %v4686_v47 = vmul.f32 -1.442695, %v1636_v53 }
 0x3dc   :  { %v4687_v2 = vmul.f32 -1.442695, %v1654_v43  ;;  %v4688_v44 = vmul.f32 -1.442695, %v1655_v3 }
 0x3dd   :  { %7519 = vpow2.f32 %v4685_v32 }
 0x3de   :  { %7521 = vpow2.f32 %v4686_v47  ;;  %v9594_v47 = vld [vmem:[#allocation63_spill] sm:$0xff] }
 0x3df   :  { %v7518_v49 = vpop.eup %7517  ;;  %7523 = vpow2.f32 %v4687_v2  ;;  %v1627_v3 = vadd.f32 %v1626_v20, %v9594_v47 }
 0x3e0   :  { %7525 = vpow2.f32 %v4688_v44  ;;  %v1486_v52 = vmul.f32 %v7518_v49, %v1485_v58 }
 0x3e1   :  { %v1669_v44 = vrot.slane %v1627_v3, 6  ;;  %v1670_v2 = vrot.slane %v1627_v3, 7 }
 0x3e2   :  { %v8536_v24 = vadd.f32 %v1487_v12, %v1486_v52  ;;  %v1684_v52 = vrot.slane %v8405_v56, 7 }
 0x3e7   :  { %v7520_v63 = vpop.eup %7519 }
 0x3e8   :  { %v7522_v11 = vpop.eup %7521  ;;  %v1643_v40 = vadd.f32 1.0, %v7520_v63 }
 0x3e9   :  { %v7524_v29 = vpop.eup %7523  ;;  %v1644_v33 = vadd.f32 1.0, %v7522_v11 }
 0x3ea   :  { %v7526_v7 = vpop.eup %7525  ;;  %7527 = vrcp.f32 %v1643_v40  ;;  %v1662_v53 = vadd.f32 1.0, %v7524_v29 }
 0x3eb   :  { %7529 = vrcp.f32 %v1644_v33  ;;  %v1663_v43 = vadd.f32 1.0, %v7526_v7 }
 0x3ec   :  { %7531 = vrcp.f32 %v1662_v53 }
 0x3ed   :  { %7533 = vrcp.f32 %v1663_v43 }
 0x3f4   :  { %v7528_v32 = vpop.eup %7527 }
 0x3f5   :  { %v7530_v26 = vpop.eup %7529  ;;  %v1673_v58 = vmul.f32 %v7528_v32, %v1669_v44 }
 0x3f6   :  { %v7532_v49 = vpop.eup %7531  ;;  %v1674_v12 = vmul.f32 %v7530_v26, %v1670_v2 }
 0x3f7   :  { %v7534_v63 = vpop.eup %7533  ;;  %v1675_v40 = vadd.f32 %v1673_v58, %v9548_v45  ;;  %v1687_v33 = vmul.f32 %v7532_v49, %v1683_v38  ;;  %v1679_v20 = vsub.f32 1.0, %v7532_v49  ;;  %v9595_v38 = vld [vmem:[#allocation25_spill] sm:$0xff]  ;;  %v9597_v49 = vld [vmem:[#allocation18_spill] sm:$0xff] }
 0x3f8   :  { %v1676_v11 = vadd.f32 %v1674_v12, %v9547_v5  ;;  %v1688_v29 = vmul.f32 %v7534_v63, %v1684_v52  ;;  %v1680_v53 = vsub.f32 1.0, %v7534_v63  ;;  %v9596_v58 = vld [vmem:[#allocation17_spill] sm:$0xff]  ;;  %v9598_v52 = vld [vmem:[#allocation26_spill] sm:$0xff]  ;;  %v9599_v12 = vld [vmem:[#allocation19_spill] sm:$0xff] }
 0x3f9   :  { %7535 = vtanh.f32 %v1675_v40  ;;  %v9600_v63 = vld [vmem:[#allocation20_spill] sm:$0xff]  ;;  %v9601_v40 = vld [vmem:[#allocation27_spill] sm:$0xff] }
 0x3fa   :  { %7537 = vtanh.f32 %v1676_v11  ;;  %v9603_v11 = vld [vmem:[#allocation22_spill] sm:$0xff] }
 0x403   :  { %v7536_v7 = vpop.eup %7535 }
 0x404   :  { %v7538_v43 = vpop.eup %7537  ;;  %v1681_v3 = vmul.f32 %v7536_v7, %v1679_v20  ;;  %v9605_v20 = vld [vmem:[#allocation23_spill] sm:$0xff]  ;;  %v9606_v7 = vld [vmem:[#allocation24_spill] sm:$0xff] }
 0x405   :  { %v1682_v59 = vmul.f32 %v7538_v43, %v1680_v53  ;;  %v9607_v53 = vld [vmem:[#allocation29_spill] sm:$0xff]  ;;  %v9608_v43 = vld [vmem:[#allocation30_spill] sm:$0xff] }
 0x406   :  { %v8543_v44 = vadd.f32 %v1687_v33, %v1681_v3  ;;  %v9602_v33 = vld [vmem:[#allocation21_spill] sm:$0xff]  ;;  %v9609_v3 = vld [vmem:[#allocation31_spill] sm:$0xff] }
 0x407   :  { %v8545_v32 = vadd.f32 %v1688_v29, %v1682_v59  ;;  %v9604_v29 = vld [vmem:[#allocation28_spill] sm:$0xff] }
 0x408   :  { %v1693_v56 = vrot.slane %v8543_v44, 2  ;;  %v9610_v59 = vld [vmem:[#allocation32_spill] sm:$0xff] }
 0x409   :  { %v1694_v2 = vrot.slane %v8545_v32, 1 }
 0x40b   :  { %v8550_v26 = vsel %vm661_vm3, %v1694_v2, %v1693_v56  ;;  %v9611_v56 = vld [vmem:[#allocation33_spill] sm:$0xff]  ;;  %v9612_v2 = vld [vmem:[#allocation34_spill] sm:$0xff] }
 0x40c   :  { %1762 = vmatmul.mubr.f32.vlgmr.msra.gmra.mrb[10].mxu0 %v8550_v26  ;;  %5433 = vmatmul.mubr.f32.vlgmr.msra.gmra.mrb[20].mxu1 %v8550_v26 }
 0x40d   :  { %6481 = vmatpush1.bf16.msra.mxu0 %v9551_v50  ;;  %6512 = vmatpush3.bf16.msra.mxu1 %v9552_v41 }
 0x40e   :  { %6483 = vmatprep.subr.bf16.mxu0 %v9553_v46  ;;  %6513 = vmatprep.subr.bf16.mxu1 %v9515_v55 }
 0x40f   :  { %1902 = vmatprep.mubr.f32.mxu0 %v9517_v10  ;;  %5467 = vmatprep.mubr.msk.f32.mxu1 %vm7827_vm2, %v9517_v10 }
 0x411   :  { %6485 = vmatpush1.bf16.msra.mxu0 %v9554_v23  ;;  %6515 = vmatpush3.bf16.msra.mxu1 %v9555_v16 }
 0x412   :  { %6487 = vmatprep.subr.bf16.mxu0 %v9556_v0  ;;  %6516 = vmatprep.subr.bf16.mxu1 %v9515_v55 }
 0x415   :  { %6489 = vmatpush1.bf16.msra.mxu0 %v9557_v62  ;;  %6518 = vmatpush3.bf16.msra.mxu1 %v9558_v19 }
 0x416   :  { %6491 = vmatprep.subr.bf16.mxu0 %v9559_v13  ;;  %6519 = vmatprep.subr.bf16.mxu1 %v9515_v55 }
 0x419   :  { %6493 = vmatpush1.bf16.msra.mxu0 %v9560_v31  ;;  %6521 = vmatpush3.bf16.msra.mxu1 %v9561_v28 }
 0x41a   :  { %6495 = vmatprep.subr.bf16.mxu0 %v9562_v1  ;;  %6522 = vmatprep.subr.bf16.mxu1 %v9515_v55 }
 0x41d   :  { %6497 = vmatpush1.bf16.msra.mxu0 %v8253_v37  ;;  %6524 = vmatpush3.bf16.msra.mxu1 %v8255_v57 }
 0x41e   :  { %6499 = vmatprep.subr.bf16.mxu0 %v9563_v36  ;;  %6525 = vmatprep.subr.bf16.mxu1 %v9515_v55 }
 0x421   :  { %6501 = vmatpush1.bf16.msra.mxu0 %v9564_v48  ;;  %6527 = vmatpush3.bf16.msra.mxu1 %v8265_v27 }
 0x422   :  { %6503 = vmatprep.subr.bf16.mxu0 %v8269_v54  ;;  %6528 = vmatprep.subr.bf16.mxu1 %v9515_v55 }
 0x425   :  { %6505 = vmatpush1.bf16.msra.mxu0 %v8273_v6  ;;  %6530 = vmatpush3.bf16.msra.mxu1 %v8275_v18 }
 0x426   :  { %6507 = vmatprep.subr.bf16.mxu0 %v8279_v34  ;;  %6531 = vmatprep.subr.bf16.mxu1 %v9515_v55 }
 0x429   :  { %6509 = vmatpush1.bf16.msra.mxu0 %v8283_v35  ;;  %6533 = vmatpush3.bf16.msra.mxu1 %v8285_v39 }
 0x42a   :  { %6535 = vmatprep.subr.bf16.mxu0 %v7962_v4  ;;  %6566 = vmatprep.subr.bf16.mxu1 %v9515_v55 }
 0x42c   :  { %1903 = vmatmul.mubr.f32.vlgmr.msra.gmra.mrb[10].mxu0 %v8536_v24  ;;  %5468 = vmatmul.mubr.f32.vlgmr.msra.gmra.mrb[22].mxu1 %v8536_v24 }
 0x42d   :  { %6537 = vmatpush1.bf16.msra.mxu0 %v7964_v8  ;;  %6568 = vmatpush3.bf16.msra.mxu1 %v8011_v42 }
 0x42e   :  { %6539 = vmatprep.subr.bf16.mxu0 %v7966_v9  ;;  %6569 = vmatprep.subr.bf16.mxu1 %v9515_v55 }
 0x42f   :  { %2064 = vmatprep.mubr.f32.mxu0 %v9517_v10  ;;  %5502 = vmatprep.mubr.msk.f32.mxu1 %vm7827_vm2, %v9517_v10 }
 0x431   :  { %6541 = vmatpush1.bf16.msra.mxu0 %v7970_v14  ;;  %6571 = vmatpush3.bf16.msra.mxu1 %v8021_v51 }
 0x432   :  { %6543 = vmatprep.subr.bf16.mxu0 %v7973_v15  ;;  %6572 = vmatprep.subr.bf16.mxu1 %v9515_v55 }
 0x435   :  { %6545 = vmatpush1.bf16.msra.mxu0 %v7979_v22  ;;  %6574 = vmatpush3.bf16.msra.mxu1 %v8033_v60 }
 0x436   :  { %6547 = vmatprep.subr.bf16.mxu0 %v7988_v25  ;;  %6575 = vmatprep.subr.bf16.mxu1 %v9515_v55 }
 0x439   :  { %6549 = vmatpush1.bf16.msra.mxu0 %v7995_v30  ;;  %6577 = vmatpush3.bf16.msra.mxu1 %v9595_v38  ;;  %v9636_v38 = vld [vmem:[#allocation83_spill] sm:$0xff] }
 0x43a   :  { %6551 = vmatprep.subr.bf16.mxu0 %v9596_v58  ;;  %6578 = vmatprep.subr.bf16.mxu1 %v9515_v55 }
 0x43d   :  { %6553 = vmatpush1.bf16.msra.mxu0 %v9597_v49  ;;  %6580 = vmatpush3.bf16.msra.mxu1 %v9598_v52  ;;  %v9635_v49 = vld [vmem:[#allocation82_spill] sm:$0xff] }
 0x43e   :  { %6555 = vmatprep.subr.bf16.mxu0 %v9599_v12  ;;  %6581 = vmatprep.subr.bf16.mxu1 %v9515_v55 }
 0x441   :  { %6557 = vmatpush1.bf16.msra.mxu0 %v9600_v63  ;;  %6583 = vmatpush3.bf16.msra.mxu1 %v9601_v40 }
 0x442   :  { %6559 = vmatprep.subr.bf16.mxu0 %v9602_v33  ;;  %6584 = vmatprep.subr.bf16.mxu1 %v9515_v55 }
 0x445   :  { %6561 = vmatpush1.bf16.msra.mxu0 %v9603_v11  ;;  %6586 = vmatpush3.bf16.msra.mxu1 %v9604_v29  ;;  %v9633_v11 = vld [vmem:[#allocation55_spill] sm:$0xff] }
 0x446   :  { %6563 = vmatprep.subr.bf16.mxu0 %v9605_v20  ;;  %6587 = vmatprep.subr.bf16.mxu1 %v9515_v55  ;;  %v9620_v20 = vld [vmem:[#allocation42_spill] sm:$0xff] }
 0x449   :  { %6565 = vmatpush1.bf16.msra.mxu0 %v9606_v7  ;;  %6589 = vmatpush3.bf16.msra.mxu1 %v9607_v53  ;;  %v9614_v53 = vld [vmem:[#allocation36_spill] sm:$0xff]  ;;  %v9619_v7 = vld [vmem:[#allocation41_spill] sm:$0xff] }
 0x44a   :  { %6591 = vmatprep.subr.bf16.mxu0 %v9608_v43  ;;  %6622 = vmatprep.subr.bf16.mxu1 %v9515_v55  ;;  %v9613_v43 = vld [vmem:[#allocation35_spill] sm:$0xff] }
 0x44c   :  { %2065 = vmatmul.mubr.f32.vlgmr.msra.gmra.mrb[12].mxu0 %v8550_v26  ;;  %5503 = vmatmul.mubr.f32.vlgmr.msra.gmra.mrb[24].mxu1 %v8550_v26  ;;  %v9615_v26 = vld [vmem:[#allocation37_spill] sm:$0xff] }
 0x44d   :  { %6593 = vmatpush1.bf16.msra.mxu0 %v9609_v3  ;;  %6624 = vmatpush3.bf16.msra.mxu1 %v9610_v59  ;;  %v9616_v59 = vld [vmem:[#allocation38_spill] sm:$0xff]  ;;  %v9618_v3 = vld [vmem:[#allocation40_spill] sm:$0xff] }
 0x44e   :  { %6595 = vmatprep.subr.bf16.mxu0 %v9611_v56  ;;  %6625 = vmatprep.subr.bf16.mxu1 %v9515_v55  ;;  %v9617_v56 = vld [vmem:[#allocation39_spill] sm:$0xff] }
 0x44f   :  { %2272 = vmatprep.mubr.f32.mxu0 %v9517_v10  ;;  %5537 = vmatprep.mubr.msk.f32.mxu1 %vm7827_vm2, %v9517_v10 }
 0x451   :  { %6597 = vmatpush1.bf16.msra.mxu0 %v9612_v2  ;;  %6627 = vmatpush3.bf16.msra.mxu1 %v9613_v43  ;;  %v9621_v43 = vld [vmem:[#allocation43_spill] sm:$0xff]  ;;  %v9623_v2 = vld [vmem:[#allocation45_spill] sm:$0xff] }
 0x452   :  { %6599 = vmatprep.subr.bf16.mxu0 %v9614_v53  ;;  %6628 = vmatprep.subr.bf16.mxu1 %v9515_v55  ;;  %v9622_v53 = vld [vmem:[#allocation44_spill] sm:$0xff] }
 0x455   :  { %6601 = vmatpush1.bf16.msra.mxu0 %v9615_v26  ;;  %6630 = vmatpush3.bf16.msra.mxu1 %v9616_v59  ;;  %v9624_v59 = vld [vmem:[#allocation46_spill] sm:$0xff]  ;;  %v9626_v26 = vld [vmem:[#allocation48_spill] sm:$0xff] }
 0x456   :  { %6603 = vmatprep.subr.bf16.mxu0 %v9617_v56  ;;  %6631 = vmatprep.subr.bf16.mxu1 %v9515_v55  ;;  %v9625_v56 = vld [vmem:[#allocation47_spill] sm:$0xff] }
 0x459   :  { %6605 = vmatpush1.bf16.msra.mxu0 %v9618_v3  ;;  %6633 = vmatpush3.bf16.msra.mxu1 %v9619_v7  ;;  %v9627_v7 = vld [vmem:[#allocation49_spill] sm:$0xff]  ;;  %v9629_v3 = vld [vmem:[#allocation51_spill] sm:$0xff] }
 0x45a   :  { %6607 = vmatprep.subr.bf16.mxu0 %v9620_v20  ;;  %6634 = vmatprep.subr.bf16.mxu1 %v9515_v55  ;;  %v9628_v20 = vld [vmem:[#allocation50_spill] sm:$0xff] }
 0x45d   :  { %6609 = vmatpush1.bf16.msra.mxu0 %v9621_v43  ;;  %6636 = vmatpush3.bf16.msra.mxu1 %v9622_v53  ;;  %v9630_v53 = vld [vmem:[#allocation52_spill] sm:$0xff]  ;;  %v9632_v43 = vld [vmem:[#allocation54_spill] sm:$0xff] }
 0x45e   :  { %6611 = vmatprep.subr.bf16.mxu0 %v9623_v2  ;;  %6637 = vmatprep.subr.bf16.mxu1 %v9515_v55  ;;  %v9631_v2 = vld [vmem:[#allocation53_spill] sm:$0xff] }
 0x461   :  { %6613 = vmatpush1.bf16.msra.mxu0 %v9624_v59  ;;  %6639 = vmatpush3.bf16.msra.mxu1 %v9625_v56 }
 0x462   :  { %6615 = vmatprep.subr.bf16.mxu0 %v9626_v26  ;;  %6640 = vmatprep.subr.bf16.mxu1 %v9515_v55 }
 0x465   :  { %6617 = vmatpush1.bf16.msra.mxu0 %v9627_v7  ;;  %6642 = vmatpush3.bf16.msra.mxu1 %v9628_v20 }
 0x466   :  { %6619 = vmatprep.subr.bf16.mxu0 %v9629_v3  ;;  %6643 = vmatprep.subr.bf16.mxu1 %v9515_v55  ;;  %v9634_v3 = vld [vmem:[#allocation56_spill] sm:$0xff] }
 0x469   :  { %6621 = vmatpush1.bf16.msra.mxu0 %v9630_v53  ;;  %6645 = vmatpush3.bf16.msra.mxu1 %v9631_v2 }
 0x46a   :  { %6647 = vmatprep.subr.bf16.mxu0 %v9632_v43  ;;  %6678 = vmatprep.subr.bf16.mxu1 %v9515_v55 }
 0x4df   :  { %v1834_v56 = vpop.f32.mrb[20].mxu1 }
 0x4e0   :  { %v5434_v26 = vpop.f32.mrb[21].mxu1  ;;  %v1835_v30 = vadd.f32 %v1834_v56, %v9636_v38 }
 0x4ff   :  { %v1904_v59 = vpop.f32.mrb[10].mxu0  ;;  %v1975_v29 = vpop.f32.mrb[22].mxu1 }
 0x500   :  { %v7407_v7 = vadd.f32 %v9633_v11, %v1904_v59  ;;  %v1906_v33 = vpop.f32.mrb[11].mxu0  ;;  %v5469_v20 = vpop.f32.mrb[23].mxu1  ;;  %v1976_v58 = vadd.f32 %v1975_v29, %v9635_v49 }
 0x501   :  { %v7409_v63 = vadd.f32 %v9634_v3, %v1906_v33  ;;  %v9637_v33 = vld [vmem:[#allocation57_spill] sm:$0xff] }
 0x502   :  { %v4689_v40 = vmul.f32 -1.442695, %v7407_v7 }
 0x503   :  { %v4690_v12 = vmul.f32 -1.442695, %v7409_v63 }
 0x504   :  { %7539 = vpow2.f32 %v4689_v40 }
 0x505   :  { %7541 = vpow2.f32 %v4690_v12 }
 0x50e   :  { %v7540_v53 = vpop.eup %7539 }
 0x50f   :  { %v1983_v2 = vadd.f32 1.0, %v7540_v53  ;;  %v7542_v43 = vpop.eup %7541 }
 0x510   :  { %v1990_v52 = vadd.f32 1.0, %v7542_v43 }
 0x511   :  { %7543 = vrcp.f32 %v1983_v2 }
 0x512   :  { %7545 = vrcp.f32 %v1990_v52 }
 0x51b   :  { %v7544_v26 = vpop.eup %7543 }
 0x51c   :  { %v1993_v25 = vmul.f32 %v7544_v26, %v1976_v58  ;;  %v9638_v58 = vld [vmem:[#allocation61_spill] sm:$0xff]  ;;  %v7546_v26 = vpop.eup %7545 }
 0x51e   :  { %v1994_v59 = vadd.f32 %v1993_v25, %v1835_v30  ;;  %v9639_v25 = vld [vmem:[#allocation62_spill] sm:$0xff] }
 0x51f   :  { %v2066_v20 = vpop.f32.mrb[12].mxu0  ;;  %v2137_v7 = vpop.f32.mrb[24].mxu1 }
 0x520   :  { %7547 = vtanh.f32 %v1994_v59  ;;  %v2067_v40 = vadd.f32 %v2066_v20, %v9637_v33  ;;  %v2068_v63 = vpop.f32.mrb[13].mxu0  ;;  %v5504_v12 = vpop.f32.mrb[25].mxu1 }
 0x521   :  { %v2069_v53 = vadd.f32 %v2068_v63, %v9544_v21  ;;  %v1996_v63 = vsub.f32 1.0, %v7546_v26 }
 0x522   :  { %v2142_v2 = vrot.slane %v2067_v40, 5  ;;  %v2143_v3 = vrot.slane %v2067_v40, 6 }
 0x523   :  { %v2161_v43 = vrot.slane %v2069_v53, 5  ;;  %v2162_v11 = vrot.slane %v2069_v53, 6  ;;  %v1998_v53 = vmul.f32 %v7546_v26, %v8536_v24  ;;  %v2194_v26 = vrot.slane %v8543_v44, 7 }
 0x524   :  { %v2146_v29 = vadd.f32 %v2142_v2, %v9590_v61  ;;  %v2147_v56 = vadd.f32 %v2143_v3, %v9591_v17 }
 0x525   :  { %v2165_v52 = vadd.f32 %v2161_v43, %v9638_v58  ;;  %v2166_v30 = vadd.f32 %v2162_v11, %v9639_v25 }
 0x526   :  { %v4691_v59 = vmul.f32 -1.442695, %v2146_v29  ;;  %v4692_v38 = vmul.f32 -1.442695, %v2147_v56 }
 0x527   :  { %v4693_v20 = vmul.f32 -1.442695, %v2165_v52  ;;  %v4694_v33 = vmul.f32 -1.442695, %v2166_v30 }
 0x528   :  { %7549 = vpow2.f32 %v4691_v59 }
 0x529   :  { %7551 = vpow2.f32 %v4692_v38  ;;  %v2138_v38 = vadd.f32 %v2137_v7, %v9594_v47 }
 0x52a   :  { %v7548_v12 = vpop.eup %7547  ;;  %7553 = vpow2.f32 %v4693_v20 }
 0x52b   :  { %7555 = vpow2.f32 %v4694_v33  ;;  %v1997_v40 = vmul.f32 %v7548_v12, %v1996_v63  ;;  %v2180_v33 = vrot.slane %v2138_v38, 5  ;;  %v2181_v59 = vrot.slane %v2138_v38, 6 }
 0x52c   :  { %v2195_v12 = vrot.slane %v8545_v32, 7 }
 0x52d   :  { %v8674_v2 = vadd.f32 %v1998_v53, %v1997_v40 }
 0x532   :  { %v7550_v3 = vpop.eup %7549 }
 0x533   :  { %v7552_v43 = vpop.eup %7551  ;;  %v2154_v58 = vadd.f32 1.0, %v7550_v3 }
 0x534   :  { %v7554_v11 = vpop.eup %7553  ;;  %v2155_v25 = vadd.f32 1.0, %v7552_v43 }
 0x535   :  { %v7556_v29 = vpop.eup %7555  ;;  %7557 = vrcp.f32 %v2154_v58  ;;  %v2173_v56 = vadd.f32 1.0, %v7554_v11 }
 0x536   :  { %7559 = vrcp.f32 %v2155_v25  ;;  %v2174_v52 = vadd.f32 1.0, %v7556_v29 }
 0x537   :  { %7561 = vrcp.f32 %v2173_v56 }
 0x538   :  { %7563 = vrcp.f32 %v2174_v52 }
 0x53f   :  { %v7558_v30 = vpop.eup %7557 }
 0x540   :  { %v7560_v24 = vpop.eup %7559  ;;  %v2184_v20 = vmul.f32 %v7558_v30, %v2180_v33 }
 0x541   :  { %v7562_v63 = vpop.eup %7561  ;;  %v2185_v40 = vmul.f32 %v7560_v24, %v2181_v59  ;;  %v9640_v24 = vld [vmem:[#allocation15_spill] sm:$0xff] }
 0x542   :  { %v7564_v53 = vpop.eup %7563  ;;  %v2186_v58 = vadd.f32 %v2184_v20, %v9548_v45  ;;  %v2198_v25 = vmul.f32 %v7562_v63, %v2194_v26  ;;  %v2190_v7 = vsub.f32 1.0, %v7562_v63  ;;  %v9641_v26 = vld [vmem:[#allocation16_spill] sm:$0xff]  ;;  %v9642_v20 = vld [vmem:[#allocation25_spill] sm:$0xff] }
 0x543   :  { %v2187_v3 = vadd.f32 %v2185_v40, %v9547_v5  ;;  %v2199_v43 = vmul.f32 %v7564_v53, %v2195_v12  ;;  %v2191_v29 = vsub.f32 1.0, %v7564_v53  ;;  %v9643_v63 = vld [vmem:[#allocation17_spill] sm:$0xff]  ;;  %v9644_v12 = vld [vmem:[#allocation18_spill] sm:$0xff]  ;;  %v9646_v53 = vld [vmem:[#allocation19_spill] sm:$0xff] }
 0x544   :  { %7565 = vtanh.f32 %v2186_v58  ;;  %v9645_v40 = vld [vmem:[#allocation26_spill] sm:$0xff]  ;;  %v9647_v58 = vld [vmem:[#allocation20_spill] sm:$0xff] }
 0x545   :  { %7567 = vtanh.f32 %v2187_v3  ;;  %v9649_v3 = vld [vmem:[#allocation21_spill] sm:$0xff] }
 0x54e   :  { %v7566_v11 = vpop.eup %7565 }
 0x54f   :  { %v7568_v56 = vpop.eup %7567  ;;  %v2192_v52 = vmul.f32 %v7566_v11, %v2190_v7  ;;  %v9651_v7 = vld [vmem:[#allocation28_spill] sm:$0xff]  ;;  %v9652_v11 = vld [vmem:[#allocation23_spill] sm:$0xff] }
 0x550   :  { %v2193_v44 = vmul.f32 %v7568_v56, %v2191_v29  ;;  %v9653_v29 = vld [vmem:[#allocation24_spill] sm:$0xff]  ;;  %v9654_v56 = vld [vmem:[#allocation29_spill] sm:$0xff] }
 0x551   :  { %v8681_v38 = vadd.f32 %v2198_v25, %v2192_v52  ;;  %v9648_v25 = vld [vmem:[#allocation27_spill] sm:$0xff]  ;;  %v9655_v52 = vld [vmem:[#allocation30_spill] sm:$0xff] }
 0x552   :  { %v8683_v33 = vadd.f32 %v2199_v43, %v2193_v44  ;;  %v9650_v43 = vld [vmem:[#allocation22_spill] sm:$0xff]  ;;  %v9656_v44 = vld [vmem:[#allocation31_spill] sm:$0xff] }
 0x553   :  { %v2204_v32 = vrot.slane %v8681_v38, 3 }
 0x554   :  { %v2205_v30 = vrot.slane %v8683_v33, 2 }
 0x556   :  { %v8688_v59 = vsel %vm661_vm3, %v2205_v30, %v2204_v32  ;;  %v9657_v32 = vld [vmem:[#allocation32_spill] sm:$0xff]  ;;  %v9658_v30 = vld [vmem:[#allocation33_spill] sm:$0xff] }
 0x557   :  { %2273 = vmatmul.mubr.f32.vlgmr.msra.gmra.mrb[14].mxu0 %v8688_v59  ;;  %5538 = vmatmul.mubr.f32.vlgmr.msra.gmra.mrb[26].mxu1 %v8688_v59 }
 0x558   :  { %6649 = vmatpush1.bf16.msra.mxu0 %v9551_v50  ;;  %6680 = vmatpush3.bf16.msra.mxu1 %v9552_v41 }
 0x559   :  { %6651 = vmatprep.subr.bf16.mxu0 %v9553_v46  ;;  %6681 = vmatprep.subr.bf16.mxu1 %v9515_v55 }
 0x55a   :  { %2413 = vmatprep.mubr.f32.mxu0 %v9517_v10  ;;  %5572 = vmatprep.mubr.msk.f32.mxu1 %vm7827_vm2, %v9517_v10 }
 0x55c   :  { %6653 = vmatpush1.bf16.msra.mxu0 %v9554_v23  ;;  %6683 = vmatpush3.bf16.msra.mxu1 %v9555_v16 }
 0x55d   :  { %6655 = vmatprep.subr.bf16.mxu0 %v9556_v0  ;;  %6684 = vmatprep.subr.bf16.mxu1 %v9515_v55 }
 0x560   :  { %6657 = vmatpush1.bf16.msra.mxu0 %v9557_v62  ;;  %6686 = vmatpush3.bf16.msra.mxu1 %v9558_v19 }
 0x561   :  { %6659 = vmatprep.subr.bf16.mxu0 %v9559_v13  ;;  %6687 = vmatprep.subr.bf16.mxu1 %v9515_v55 }
 0x564   :  { %6661 = vmatpush1.bf16.msra.mxu0 %v9560_v31  ;;  %6689 = vmatpush3.bf16.msra.mxu1 %v9561_v28 }
 0x565   :  { %6663 = vmatprep.subr.bf16.mxu0 %v9562_v1  ;;  %6690 = vmatprep.subr.bf16.mxu1 %v9515_v55 }
 0x568   :  { %6665 = vmatpush1.bf16.msra.mxu0 %v8253_v37  ;;  %6692 = vmatpush3.bf16.msra.mxu1 %v8255_v57 }
 0x569   :  { %6667 = vmatprep.subr.bf16.mxu0 %v9563_v36  ;;  %6693 = vmatprep.subr.bf16.mxu1 %v9515_v55 }
 0x56c   :  { %6669 = vmatpush1.bf16.msra.mxu0 %v9564_v48  ;;  %6695 = vmatpush3.bf16.msra.mxu1 %v8265_v27 }
 0x56d   :  { %6671 = vmatprep.subr.bf16.mxu0 %v8269_v54  ;;  %6696 = vmatprep.subr.bf16.mxu1 %v9515_v55 }
 0x570   :  { %6673 = vmatpush1.bf16.msra.mxu0 %v8273_v6  ;;  %6698 = vmatpush3.bf16.msra.mxu1 %v8275_v18 }
 0x571   :  { %6675 = vmatprep.subr.bf16.mxu0 %v8279_v34  ;;  %6699 = vmatprep.subr.bf16.mxu1 %v9515_v55 }
 0x574   :  { %6677 = vmatpush1.bf16.msra.mxu0 %v8283_v35  ;;  %6701 = vmatpush3.bf16.msra.mxu1 %v8285_v39 }
 0x575   :  { %6703 = vmatprep.subr.bf16.mxu0 %v7962_v4  ;;  %6734 = vmatprep.subr.bf16.mxu1 %v9515_v55 }
 0x577   :  { %2414 = vmatmul.mubr.f32.vlgmr.msra.gmra.mrb[14].mxu0 %v8674_v2  ;;  %5573 = vmatmul.mubr.f32.vlgmr.msra.gmra.mrb[28].mxu1 %v8674_v2 }
 0x578   :  { %6705 = vmatpush1.bf16.msra.mxu0 %v7964_v8  ;;  %6736 = vmatpush3.bf16.msra.mxu1 %v8011_v42 }
 0x579   :  { %6707 = vmatprep.subr.bf16.mxu0 %v7966_v9  ;;  %6737 = vmatprep.subr.bf16.mxu1 %v9515_v55 }
 0x57a   :  { %2575 = vmatprep.mubr.f32.mxu0 %v9517_v10  ;;  %5607 = vmatprep.mubr.msk.f32.mxu1 %vm7827_vm2, %v9517_v10 }
 0x57c   :  { %6709 = vmatpush1.bf16.msra.mxu0 %v7970_v14  ;;  %6739 = vmatpush3.bf16.msra.mxu1 %v8021_v51 }
 0x57d   :  { %6711 = vmatprep.subr.bf16.mxu0 %v7973_v15  ;;  %6740 = vmatprep.subr.bf16.mxu1 %v9515_v55 }
 0x580   :  { %6713 = vmatpush1.bf16.msra.mxu0 %v7979_v22  ;;  %6742 = vmatpush3.bf16.msra.mxu1 %v8033_v60 }
 0x581   :  { %6715 = vmatprep.subr.bf16.mxu0 %v9640_v24  ;;  %6743 = vmatprep.subr.bf16.mxu1 %v9515_v55 }
 0x584   :  { %6717 = vmatpush1.bf16.msra.mxu0 %v9641_v26  ;;  %6745 = vmatpush3.bf16.msra.mxu1 %v9642_v20  ;;  %v9682_v20 = vld [vmem:[#allocation83_spill] sm:$0xff] }
 0x585   :  { %6719 = vmatprep.subr.bf16.mxu0 %v9643_v63  ;;  %6746 = vmatprep.subr.bf16.mxu1 %v9515_v55 }
 0x588   :  { %6721 = vmatpush1.bf16.msra.mxu0 %v9644_v12  ;;  %6748 = vmatpush3.bf16.msra.mxu1 %v9645_v40 }
 0x589   :  { %6723 = vmatprep.subr.bf16.mxu0 %v9646_v53  ;;  %6749 = vmatprep.subr.bf16.mxu1 %v9515_v55 }
 0x58c   :  { %6725 = vmatpush1.bf16.msra.mxu0 %v9647_v58  ;;  %6751 = vmatpush3.bf16.msra.mxu1 %v9648_v25 }
 0x58d   :  { %6727 = vmatprep.subr.bf16.mxu0 %v9649_v3  ;;  %6752 = vmatprep.subr.bf16.mxu1 %v9515_v55  ;;  %v9680_v3 = vld [vmem:[#allocation55_spill] sm:$0xff] }
 0x590   :  { %6729 = vmatpush1.bf16.msra.mxu0 %v9650_v43  ;;  %6754 = vmatpush3.bf16.msra.mxu1 %v9651_v7  ;;  %v9667_v7 = vld [vmem:[#allocation42_spill] sm:$0xff] }
 0x591   :  { %6731 = vmatprep.subr.bf16.mxu0 %v9652_v11  ;;  %6755 = vmatprep.subr.bf16.mxu1 %v9515_v55  ;;  %v9666_v11 = vld [vmem:[#allocation41_spill] sm:$0xff] }
 0x594   :  { %6733 = vmatpush1.bf16.msra.mxu0 %v9653_v29  ;;  %6757 = vmatpush3.bf16.msra.mxu1 %v9654_v56  ;;  %v9660_v56 = vld [vmem:[#allocation35_spill] sm:$0xff]  ;;  %v9661_v29 = vld [vmem:[#allocation36_spill] sm:$0xff] }
 0x595   :  { %6759 = vmatprep.subr.bf16.mxu0 %v9655_v52  ;;  %6790 = vmatprep.subr.bf16.mxu1 %v9515_v55  ;;  %v9659_v52 = vld [vmem:[#allocation34_spill] sm:$0xff] }
 0x597   :  { %2576 = vmatmul.mubr.f32.vlgmr.msra.gmra.mrb[16].mxu0 %v8688_v59  ;;  %5608 = vmatmul.mubr.f32.vlgmr.msra.gmra.mrb[30].mxu1 %v8688_v59  ;;  %v9662_v59 = vld [vmem:[#allocation37_spill] sm:$0xff] }
 0x598   :  { %6761 = vmatpush1.bf16.msra.mxu0 %v9656_v44  ;;  %6792 = vmatpush3.bf16.msra.mxu1 %v9657_v32  ;;  %v9663_v32 = vld [vmem:[#allocation38_spill] sm:$0xff]  ;;  %v9665_v44 = vld [vmem:[#allocation40_spill] sm:$0xff] }
 0x599   :  { %6763 = vmatprep.subr.bf16.mxu0 %v9658_v30  ;;  %6793 = vmatprep.subr.bf16.mxu1 %v9515_v55  ;;  %v9664_v30 = vld [vmem:[#allocation39_spill] sm:$0xff] }
 0x59a   :  { %2783 = vmatprep.mubr.f32.mxu0 %v9517_v10  ;;  %5642 = vmatprep.mubr.msk.f32.mxu1 %vm7827_vm2, %v9517_v10 }
 0x59c   :  { %6765 = vmatpush1.bf16.msra.mxu0 %v9659_v52  ;;  %6795 = vmatpush3.bf16.msra.mxu1 %v9660_v56  ;;  %v9668_v56 = vld [vmem:[#allocation43_spill] sm:$0xff]  ;;  %v9670_v52 = vld [vmem:[#allocation45_spill] sm:$0xff] }
 0x59d   :  { %6767 = vmatprep.subr.bf16.mxu0 %v9661_v29  ;;  %6796 = vmatprep.subr.bf16.mxu1 %v9515_v55  ;;  %v9669_v29 = vld [vmem:[#allocation44_spill] sm:$0xff] }
 0x5a0   :  { %6769 = vmatpush1.bf16.msra.mxu0 %v9662_v59  ;;  %6798 = vmatpush3.bf16.msra.mxu1 %v9663_v32  ;;  %v9671_v32 = vld [vmem:[#allocation46_spill] sm:$0xff]  ;;  %v9673_v59 = vld [vmem:[#allocation48_spill] sm:$0xff] }
 0x5a1   :  { %6771 = vmatprep.subr.bf16.mxu0 %v9664_v30  ;;  %6799 = vmatprep.subr.bf16.mxu1 %v9515_v55  ;;  %v9672_v30 = vld [vmem:[#allocation47_spill] sm:$0xff] }
 0x5a4   :  { %6773 = vmatpush1.bf16.msra.mxu0 %v9665_v44  ;;  %6801 = vmatpush3.bf16.msra.mxu1 %v9666_v11  ;;  %v9674_v11 = vld [vmem:[#allocation49_spill] sm:$0xff]  ;;  %v9676_v44 = vld [vmem:[#allocation51_spill] sm:$0xff] }
 0x5a5   :  { %6775 = vmatprep.subr.bf16.mxu0 %v9667_v7  ;;  %6802 = vmatprep.subr.bf16.mxu1 %v9515_v55  ;;  %v9675_v7 = vld [vmem:[#allocation50_spill] sm:$0xff] }
 0x5a8   :  { %6777 = vmatpush1.bf16.msra.mxu0 %v9668_v56  ;;  %6804 = vmatpush3.bf16.msra.mxu1 %v9669_v29  ;;  %v9677_v29 = vld [vmem:[#allocation52_spill] sm:$0xff]  ;;  %v9679_v56 = vld [vmem:[#allocation54_spill] sm:$0xff] }
 0x5a9   :  { %6779 = vmatprep.subr.bf16.mxu0 %v9670_v52  ;;  %6805 = vmatprep.subr.bf16.mxu1 %v9515_v55  ;;  %v9678_v52 = vld [vmem:[#allocation53_spill] sm:$0xff] }
 0x5ac   :  { %6781 = vmatpush1.bf16.msra.mxu0 %v9671_v32  ;;  %6807 = vmatpush3.bf16.msra.mxu1 %v9672_v30 }
 0x5ad   :  { %6783 = vmatprep.subr.bf16.mxu0 %v9673_v59  ;;  %6808 = vmatprep.subr.bf16.mxu1 %v9515_v55 }
 0x5b0   :  { %6785 = vmatpush1.bf16.msra.mxu0 %v9674_v11  ;;  %6810 = vmatpush3.bf16.msra.mxu1 %v9675_v7 }
 0x5b1   :  { %6787 = vmatprep.subr.bf16.mxu0 %v9676_v44  ;;  %6811 = vmatprep.subr.bf16.mxu1 %v9515_v55  ;;  %v9681_v44 = vld [vmem:[#allocation56_spill] sm:$0xff] }
 0x5b4   :  { %6789 = vmatpush1.bf16.msra.mxu0 %v9677_v29  ;;  %6813 = vmatpush3.bf16.msra.mxu1 %v9678_v52 }
 0x5b5   :  { %6815 = vmatprep.subr.bf16.mxu0 %v9679_v56  ;;  %6846 = vmatprep.subr.bf16.mxu1 %v9515_v55 }
 0x62a   :  { %v2345_v30 = vpop.f32.mrb[26].mxu1 }
 0x62b   :  { %v5539_v59 = vpop.f32.mrb[27].mxu1  ;;  %v2346_v26 = vadd.f32 %v2345_v30, %v9682_v20 }
 0x64a   :  { %v2415_v32 = vpop.f32.mrb[14].mxu0  ;;  %v2486_v43 = vpop.f32.mrb[28].mxu1 }
 0x64b   :  { %v7411_v11 = vadd.f32 %v9680_v3, %v2415_v32  ;;  %v2417_v25 = vpop.f32.mrb[15].mxu0  ;;  %v5574_v7 = vpop.f32.mrb[29].mxu1  ;;  %v2487_v63 = vadd.f32 %v2486_v43, %v9635_v49 }
 0x64c   :  { %v7413_v53 = vadd.f32 %v9681_v44, %v2417_v25  ;;  %v9683_v25 = vld [vmem:[#allocation57_spill] sm:$0xff] }
 0x64d   :  { %v4695_v58 = vmul.f32 -1.442695, %v7411_v11 }
 0x64e   :  { %v4696_v40 = vmul.f32 -1.442695, %v7413_v53 }
 0x64f   :  { %7569 = vpow2.f32 %v4695_v58 }
 0x650   :  { %7571 = vpow2.f32 %v4696_v40 }
 0x659   :  { %v7570_v29 = vpop.eup %7569 }
 0x65a   :  { %v2494_v52 = vadd.f32 1.0, %v7570_v29  ;;  %v7572_v56 = vpop.eup %7571 }
 0x65b   :  { %v2501_v12 = vadd.f32 1.0, %v7572_v56 }
 0x65c   :  { %7573 = vrcp.f32 %v2494_v52 }
 0x65d   :  { %7575 = vrcp.f32 %v2501_v12 }
 0x666   :  { %v7574_v59 = vpop.eup %7573 }
 0x667   :  { %v2504_v24 = vmul.f32 %v7574_v59, %v2487_v63  ;;  %v9684_v63 = vld [vmem:[#allocation61_spill] sm:$0xff]  ;;  %v7576_v59 = vpop.eup %7575 }
 0x669   :  { %v2505_v32 = vadd.f32 %v2504_v24, %v2346_v26  ;;  %v9685_v24 = vld [vmem:[#allocation62_spill] sm:$0xff] }
 0x66a   :  { %v2577_v7 = vpop.f32.mrb[16].mxu0  ;;  %v2648_v11 = vpop.f32.mrb[30].mxu1 }
 0x66b   :  { %7577 = vtanh.f32 %v2505_v32  ;;  %v2578_v58 = vadd.f32 %v2577_v7, %v9683_v25  ;;  %v2579_v53 = vpop.f32.mrb[17].mxu0  ;;  %v5609_v40 = vpop.f32.mrb[31].mxu1 }
 0x66c   :  { %v2580_v29 = vadd.f32 %v2579_v53, %v9544_v21  ;;  %v2507_v53 = vsub.f32 1.0, %v7576_v59 }
 0x66d   :  { %v2653_v52 = vrot.slane %v2578_v58, 4  ;;  %v2654_v44 = vrot.slane %v2578_v58, 5 }
 0x66e   :  { %v2672_v56 = vrot.slane %v2580_v29, 4  ;;  %v2673_v3 = vrot.slane %v2580_v29, 5  ;;  %v2509_v29 = vmul.f32 %v7576_v59, %v8674_v2  ;;  %v2705_v59 = vrot.slane %v8681_v38, 7 }
 0x66f   :  { %v2657_v43 = vadd.f32 %v2653_v52, %v9590_v61  ;;  %v2658_v30 = vadd.f32 %v2654_v44, %v9591_v17 }
 0x670   :  { %v2676_v12 = vadd.f32 %v2672_v56, %v9684_v63  ;;  %v2677_v26 = vadd.f32 %v2673_v3, %v9685_v24 }
 0x671   :  { %v4697_v32 = vmul.f32 -1.442695, %v2657_v43  ;;  %v4698_v20 = vmul.f32 -1.442695, %v2658_v30 }
 0x672   :  { %v4699_v7 = vmul.f32 -1.442695, %v2676_v12  ;;  %v4700_v25 = vmul.f32 -1.442695, %v2677_v26 }
 0x673   :  { %7579 = vpow2.f32 %v4697_v32 }
 0x674   :  { %7581 = vpow2.f32 %v4698_v20  ;;  %v2649_v20 = vadd.f32 %v2648_v11, %v9594_v47 }
 0x675   :  { %v7578_v40 = vpop.eup %7577  ;;  %7583 = vpow2.f32 %v4699_v7 }
 0x676   :  { %7585 = vpow2.f32 %v4700_v25  ;;  %v2508_v58 = vmul.f32 %v7578_v40, %v2507_v53  ;;  %v2691_v25 = vrot.slane %v2649_v20, 4  ;;  %v2692_v32 = vrot.slane %v2649_v20, 5 }
 0x677   :  { %v2706_v40 = vrot.slane %v8683_v33, 7 }
 0x678   :  { %v8812_v52 = vadd.f32 %v2509_v29, %v2508_v58 }
 0x67d   :  { %v7580_v44 = vpop.eup %7579 }
 0x67e   :  { %v7582_v56 = vpop.eup %7581  ;;  %v2665_v63 = vadd.f32 1.0, %v7580_v44 }
 0x67f   :  { %v7584_v3 = vpop.eup %7583  ;;  %v2666_v24 = vadd.f32 1.0, %v7582_v56 }
 0x680   :  { %v7586_v43 = vpop.eup %7585  ;;  %7587 = vrcp.f32 %v2665_v63  ;;  %v2684_v30 = vadd.f32 1.0, %v7584_v3 }
 0x681   :  { %7589 = vrcp.f32 %v2666_v24  ;;  %v2685_v12 = vadd.f32 1.0, %v7586_v43 }
 0x682   :  { %7591 = vrcp.f32 %v2684_v30 }
 0x683   :  { %7593 = vrcp.f32 %v2685_v12 }
 0x68a   :  { %v7588_v26 = vpop.eup %7587 }
 0x68b   :  { %v7590_v2 = vpop.eup %7589  ;;  %v2695_v7 = vmul.f32 %v7588_v26, %v2691_v25 }
 0x68c   :  { %v7592_v53 = vpop.eup %7591  ;;  %v2696_v58 = vmul.f32 %v7590_v2, %v2692_v32  ;;  %v9686_v2 = vld [vmem:[#allocation15_spill] sm:$0xff] }
 0x68d   :  { %v7594_v29 = vpop.eup %7593  ;;  %v2697_v63 = vadd.f32 %v2695_v7, %v9548_v45  ;;  %v2709_v24 = vmul.f32 %v7592_v53, %v2705_v59  ;;  %v2701_v11 = vsub.f32 1.0, %v7592_v53  ;;  %v9687_v59 = vld [vmem:[#allocation16_spill] sm:$0xff]  ;;  %v9688_v7 = vld [vmem:[#allocation25_spill] sm:$0xff] }
 0x68e   :  { %v2698_v44 = vadd.f32 %v2696_v58, %v9547_v5  ;;  %v2710_v56 = vmul.f32 %v7594_v29, %v2706_v40  ;;  %v2702_v43 = vsub.f32 1.0, %v7594_v29  ;;  %v9689_v53 = vld [vmem:[#allocation17_spill] sm:$0xff]  ;;  %v9690_v40 = vld [vmem:[#allocation18_spill] sm:$0xff]  ;;  %v9692_v29 = vld [vmem:[#allocation19_spill] sm:$0xff] }
 0x68f   :  { %7595 = vtanh.f32 %v2697_v63  ;;  %v9691_v58 = vld [vmem:[#allocation26_spill] sm:$0xff]  ;;  %v9693_v63 = vld [vmem:[#allocation20_spill] sm:$0xff] }
 0x690   :  { %7597 = vtanh.f32 %v2698_v44  ;;  %v9695_v44 = vld [vmem:[#allocation21_spill] sm:$0xff] }
 0x699   :  { %v7596_v3 = vpop.eup %7595 }
 0x69a   :  { %v7598_v30 = vpop.eup %7597  ;;  %v2703_v12 = vmul.f32 %v7596_v3, %v2701_v11  ;;  %v9697_v11 = vld [vmem:[#allocation28_spill] sm:$0xff]  ;;  %v9698_v3 = vld [vmem:[#allocation23_spill] sm:$0xff] }
 0x69b   :  { %v2704_v38 = vmul.f32 %v7598_v30, %v2702_v43  ;;  %v9699_v43 = vld [vmem:[#allocation24_spill] sm:$0xff]  ;;  %v9700_v30 = vld [vmem:[#allocation29_spill] sm:$0xff] }
 0x69c   :  { %v8819_v20 = vadd.f32 %v2709_v24, %v2703_v12  ;;  %v9694_v24 = vld [vmem:[#allocation27_spill] sm:$0xff]  ;;  %v9701_v12 = vld [vmem:[#allocation30_spill] sm:$0xff] }
 0x69d   :  { %v8821_v25 = vadd.f32 %v2710_v56, %v2704_v38  ;;  %v9696_v56 = vld [vmem:[#allocation22_spill] sm:$0xff]  ;;  %v9702_v38 = vld [vmem:[#allocation31_spill] sm:$0xff] }
 0x69e   :  { %v2715_v33 = vrot.slane %v8819_v20, 4 }
 0x69f   :  { %v2716_v26 = vrot.slane %v8821_v25, 3 }
 0x6a1   :  { %v8826_v32 = vsel %vm661_vm3, %v2716_v26, %v2715_v33  ;;  %v9703_v33 = vld [vmem:[#allocation32_spill] sm:$0xff]  ;;  %v9704_v26 = vld [vmem:[#allocation33_spill] sm:$0xff] }
 0x6a2   :  { %2784 = vmatmul.mubr.f32.vlgmr.msra.gmra.mrb[18].mxu0 %v8826_v32  ;;  %5643 = vmatmul.mubr.f32.vlgmr.msra.gmra.mrb[32].mxu1 %v8826_v32 }
 0x6a3   :  { %6817 = vmatpush1.bf16.msra.mxu0 %v9551_v50  ;;  %6848 = vmatpush3.bf16.msra.mxu1 %v9552_v41 }
 0x6a4   :  { %6819 = vmatprep.subr.bf16.mxu0 %v9553_v46  ;;  %6849 = vmatprep.subr.bf16.mxu1 %v9515_v55 }
 0x6a5   :  { %2924 = vmatprep.mubr.f32.mxu0 %v9517_v10  ;;  %5677 = vmatprep.mubr.msk.f32.mxu1 %vm7827_vm2, %v9517_v10 }
 0x6a7   :  { %6821 = vmatpush1.bf16.msra.mxu0 %v9554_v23  ;;  %6851 = vmatpush3.bf16.msra.mxu1 %v9555_v16 }
 0x6a8   :  { %6823 = vmatprep.subr.bf16.mxu0 %v9556_v0  ;;  %6852 = vmatprep.subr.bf16.mxu1 %v9515_v55 }
 0x6ab   :  { %6825 = vmatpush1.bf16.msra.mxu0 %v9557_v62  ;;  %6854 = vmatpush3.bf16.msra.mxu1 %v9558_v19 }
 0x6ac   :  { %6827 = vmatprep.subr.bf16.mxu0 %v9559_v13  ;;  %6855 = vmatprep.subr.bf16.mxu1 %v9515_v55 }
 0x6af   :  { %6829 = vmatpush1.bf16.msra.mxu0 %v9560_v31  ;;  %6857 = vmatpush3.bf16.msra.mxu1 %v9561_v28 }
 0x6b0   :  { %6831 = vmatprep.subr.bf16.mxu0 %v9562_v1  ;;  %6858 = vmatprep.subr.bf16.mxu1 %v9515_v55 }
 0x6b3   :  { %6833 = vmatpush1.bf16.msra.mxu0 %v8253_v37  ;;  %6860 = vmatpush3.bf16.msra.mxu1 %v8255_v57 }
 0x6b4   :  { %6835 = vmatprep.subr.bf16.mxu0 %v9563_v36  ;;  %6861 = vmatprep.subr.bf16.mxu1 %v9515_v55 }
 0x6b7   :  { %6837 = vmatpush1.bf16.msra.mxu0 %v9564_v48  ;;  %6863 = vmatpush3.bf16.msra.mxu1 %v8265_v27 }
 0x6b8   :  { %6839 = vmatprep.subr.bf16.mxu0 %v8269_v54  ;;  %6864 = vmatprep.subr.bf16.mxu1 %v9515_v55 }
 0x6bb   :  { %6841 = vmatpush1.bf16.msra.mxu0 %v8273_v6  ;;  %6866 = vmatpush3.bf16.msra.mxu1 %v8275_v18 }
 0x6bc   :  { %6843 = vmatprep.subr.bf16.mxu0 %v8279_v34  ;;  %6867 = vmatprep.subr.bf16.mxu1 %v9515_v55 }
 0x6bf   :  { %6845 = vmatpush1.bf16.msra.mxu0 %v8283_v35  ;;  %6869 = vmatpush3.bf16.msra.mxu1 %v8285_v39 }
 0x6c0   :  { %6871 = vmatprep.subr.bf16.mxu0 %v7962_v4  ;;  %6902 = vmatprep.subr.bf16.mxu1 %v9515_v55 }
 0x6c2   :  { %2925 = vmatmul.mubr.f32.vlgmr.msra.gmra.mrb[18].mxu0 %v8812_v52  ;;  %5678 = vmatmul.mubr.f32.vlgmr.msra.gmra.mrb[34].mxu1 %v8812_v52 }
 0x6c3   :  { %6873 = vmatpush1.bf16.msra.mxu0 %v7964_v8  ;;  %6904 = vmatpush3.bf16.msra.mxu1 %v8011_v42 }
 0x6c4   :  { %6875 = vmatprep.subr.bf16.mxu0 %v7966_v9  ;;  %6905 = vmatprep.subr.bf16.mxu1 %v9515_v55 }
 0x6c5   :  { %3086 = vmatprep.mubr.f32.mxu0 %v9517_v10  ;;  %5712 = vmatprep.mubr.msk.f32.mxu1 %vm7827_vm2, %v9517_v10 }
 0x6c7   :  { %6877 = vmatpush1.bf16.msra.mxu0 %v7970_v14  ;;  %6907 = vmatpush3.bf16.msra.mxu1 %v8021_v51 }
 0x6c8   :  { %6879 = vmatprep.subr.bf16.mxu0 %v7973_v15  ;;  %6908 = vmatprep.subr.bf16.mxu1 %v9515_v55 }
 0x6cb   :  { %6881 = vmatpush1.bf16.msra.mxu0 %v7979_v22  ;;  %6910 = vmatpush3.bf16.msra.mxu1 %v8033_v60 }
 0x6cc   :  { %6883 = vmatprep.subr.bf16.mxu0 %v9686_v2  ;;  %6911 = vmatprep.subr.bf16.mxu1 %v9515_v55 }
 0x6cf   :  { %6885 = vmatpush1.bf16.msra.mxu0 %v9687_v59  ;;  %6913 = vmatpush3.bf16.msra.mxu1 %v9688_v7  ;;  %v9728_v7 = vld [vmem:[#allocation83_spill] sm:$0xff] }
 0x6d0   :  { %6887 = vmatprep.subr.bf16.mxu0 %v9689_v53  ;;  %6914 = vmatprep.subr.bf16.mxu1 %v9515_v55 }
 0x6d3   :  { %6889 = vmatpush1.bf16.msra.mxu0 %v9690_v40  ;;  %6916 = vmatpush3.bf16.msra.mxu1 %v9691_v58 }
 0x6d4   :  { %6891 = vmatprep.subr.bf16.mxu0 %v9692_v29  ;;  %6917 = vmatprep.subr.bf16.mxu1 %v9515_v55 }
 0x6d7   :  { %6893 = vmatpush1.bf16.msra.mxu0 %v9693_v63  ;;  %6919 = vmatpush3.bf16.msra.mxu1 %v9694_v24 }
 0x6d8   :  { %6895 = vmatprep.subr.bf16.mxu0 %v9695_v44  ;;  %6920 = vmatprep.subr.bf16.mxu1 %v9515_v55  ;;  %v9726_v44 = vld [vmem:[#allocation55_spill] sm:$0xff] }
 0x6db   :  { %6897 = vmatpush1.bf16.msra.mxu0 %v9696_v56  ;;  %6922 = vmatpush3.bf16.msra.mxu1 %v9697_v11  ;;  %v9713_v11 = vld [vmem:[#allocation42_spill] sm:$0xff] }
 0x6dc   :  { %6899 = vmatprep.subr.bf16.mxu0 %v9698_v3  ;;  %6923 = vmatprep.subr.bf16.mxu1 %v9515_v55  ;;  %v9712_v3 = vld [vmem:[#allocation41_spill] sm:$0xff] }
 0x6df   :  { %6901 = vmatpush1.bf16.msra.mxu0 %v9699_v43  ;;  %6925 = vmatpush3.bf16.msra.mxu1 %v9700_v30  ;;  %v9706_v30 = vld [vmem:[#allocation35_spill] sm:$0xff]  ;;  %v9707_v43 = vld [vmem:[#allocation36_spill] sm:$0xff] }
 0x6e0   :  { %6927 = vmatprep.subr.bf16.mxu0 %v9701_v12  ;;  %6958 = vmatprep.subr.bf16.mxu1 %v9515_v55  ;;  %v9705_v12 = vld [vmem:[#allocation34_spill] sm:$0xff] }
 0x6e2   :  { %3087 = vmatmul.mubr.f32.vlgmr.msra.gmra.mrb[20].mxu0 %v8826_v32  ;;  %5713 = vmatmul.mubr.f32.vlgmr.msra.gmra.mrb[36].mxu1 %v8826_v32  ;;  %v9708_v32 = vld [vmem:[#allocation37_spill] sm:$0xff] }
 0x6e3   :  { %6929 = vmatpush1.bf16.msra.mxu0 %v9702_v38  ;;  %6960 = vmatpush3.bf16.msra.mxu1 %v9703_v33  ;;  %v9709_v33 = vld [vmem:[#allocation38_spill] sm:$0xff]  ;;  %v9711_v38 = vld [vmem:[#allocation40_spill] sm:$0xff] }
 0x6e4   :  { %6931 = vmatprep.subr.bf16.mxu0 %v9704_v26  ;;  %6961 = vmatprep.subr.bf16.mxu1 %v9515_v55  ;;  %v9710_v26 = vld [vmem:[#allocation39_spill] sm:$0xff] }
 0x6e5   :  { %3294 = vmatprep.mubr.f32.mxu0 %v9517_v10  ;;  %5747 = vmatprep.mubr.msk.f32.mxu1 %vm7827_vm2, %v9517_v10 }
 0x6e7   :  { %6933 = vmatpush1.bf16.msra.mxu0 %v9705_v12  ;;  %6963 = vmatpush3.bf16.msra.mxu1 %v9706_v30  ;;  %v9714_v30 = vld [vmem:[#allocation43_spill] sm:$0xff]  ;;  %v9716_v12 = vld [vmem:[#allocation45_spill] sm:$0xff] }
 0x6e8   :  { %6935 = vmatprep.subr.bf16.mxu0 %v9707_v43  ;;  %6964 = vmatprep.subr.bf16.mxu1 %v9515_v55  ;;  %v9715_v43 = vld [vmem:[#allocation44_spill] sm:$0xff] }
 0x6eb   :  { %6937 = vmatpush1.bf16.msra.mxu0 %v9708_v32  ;;  %6966 = vmatpush3.bf16.msra.mxu1 %v9709_v33  ;;  %v9717_v33 = vld [vmem:[#allocation46_spill] sm:$0xff]  ;;  %v9719_v32 = vld [vmem:[#allocation48_spill] sm:$0xff] }
 0x6ec   :  { %6939 = vmatprep.subr.bf16.mxu0 %v9710_v26  ;;  %6967 = vmatprep.subr.bf16.mxu1 %v9515_v55  ;;  %v9718_v26 = vld [vmem:[#allocation47_spill] sm:$0xff] }
 0x6ef   :  { %6941 = vmatpush1.bf16.msra.mxu0 %v9711_v38  ;;  %6969 = vmatpush3.bf16.msra.mxu1 %v9712_v3  ;;  %v9720_v3 = vld [vmem:[#allocation49_spill] sm:$0xff]  ;;  %v9722_v38 = vld [vmem:[#allocation51_spill] sm:$0xff] }
 0x6f0   :  { %6943 = vmatprep.subr.bf16.mxu0 %v9713_v11  ;;  %6970 = vmatprep.subr.bf16.mxu1 %v9515_v55  ;;  %v9721_v11 = vld [vmem:[#allocation50_spill] sm:$0xff] }
 0x6f3   :  { %6945 = vmatpush1.bf16.msra.mxu0 %v9714_v30  ;;  %6972 = vmatpush3.bf16.msra.mxu1 %v9715_v43  ;;  %v9723_v43 = vld [vmem:[#allocation52_spill] sm:$0xff]  ;;  %v9725_v30 = vld [vmem:[#allocation54_spill] sm:$0xff] }
 0x6f4   :  { %6947 = vmatprep.subr.bf16.mxu0 %v9716_v12  ;;  %6973 = vmatprep.subr.bf16.mxu1 %v9515_v55  ;;  %v9724_v12 = vld [vmem:[#allocation53_spill] sm:$0xff] }
 0x6f7   :  { %6949 = vmatpush1.bf16.msra.mxu0 %v9717_v33  ;;  %6975 = vmatpush3.bf16.msra.mxu1 %v9718_v26 }
 0x6f8   :  { %6951 = vmatprep.subr.bf16.mxu0 %v9719_v32  ;;  %6976 = vmatprep.subr.bf16.mxu1 %v9515_v55 }
 0x6fb   :  { %6953 = vmatpush1.bf16.msra.mxu0 %v9720_v3  ;;  %6978 = vmatpush3.bf16.msra.mxu1 %v9721_v11 }
 0x6fc   :  { %6955 = vmatprep.subr.bf16.mxu0 %v9722_v38  ;;  %6979 = vmatprep.subr.bf16.mxu1 %v9515_v55  ;;  %v9727_v38 = vld [vmem:[#allocation56_spill] sm:$0xff] }
 0x6ff   :  { %6957 = vmatpush1.bf16.msra.mxu0 %v9723_v43  ;;  %6981 = vmatpush3.bf16.msra.mxu1 %v9724_v12 }
 0x700   :  { %6983 = vmatprep.subr.bf16.mxu0 %v9725_v30  ;;  %7014 = vmatprep.subr.bf16.mxu1 %v9515_v55 }
 0x775   :  { %v2856_v26 = vpop.f32.mrb[32].mxu1 }
 0x776   :  { %v5644_v32 = vpop.f32.mrb[33].mxu1  ;;  %v2857_v59 = vadd.f32 %v2856_v26, %v9728_v7 }
 0x795   :  { %v2926_v33 = vpop.f32.mrb[18].mxu0  ;;  %v2997_v56 = vpop.f32.mrb[34].mxu1 }
 0x796   :  { %v7415_v3 = vadd.f32 %v9726_v44, %v2926_v33  ;;  %v2928_v24 = vpop.f32.mrb[19].mxu0  ;;  %v5679_v11 = vpop.f32.mrb[35].mxu1  ;;  %v2998_v53 = vadd.f32 %v2997_v56, %v9635_v49 }
 0x797   :  { %v7417_v29 = vadd.f32 %v9727_v38, %v2928_v24  ;;  %v9729_v24 = vld [vmem:[#allocation57_spill] sm:$0xff] }
 0x798   :  { %v4701_v63 = vmul.f32 -1.442695, %v7415_v3 }
 0x799   :  { %v4702_v58 = vmul.f32 -1.442695, %v7417_v29 }
 0x79a   :  { %7599 = vpow2.f32 %v4701_v63 }
 0x79b   :  { %7601 = vpow2.f32 %v4702_v58 }
 0x7a4   :  { %v7600_v43 = vpop.eup %7599 }
 0x7a5   :  { %v3005_v12 = vadd.f32 1.0, %v7600_v43  ;;  %v7602_v30 = vpop.eup %7601 }
 0x7a6   :  { %v3012_v40 = vadd.f32 1.0, %v7602_v30 }
 0x7a7   :  { %7603 = vrcp.f32 %v3005_v12 }
 0x7a8   :  { %7605 = vrcp.f32 %v3012_v40 }
 0x7b1   :  { %v7604_v32 = vpop.eup %7603 }
 0x7b2   :  { %v3015_v2 = vmul.f32 %v7604_v32, %v2998_v53  ;;  %v9730_v53 = vld [vmem:[#allocation61_spill] sm:$0xff]  ;;  %v7606_v32 = vpop.eup %7605 }
 0x7b4   :  { %v3016_v33 = vadd.f32 %v3015_v2, %v2857_v59  ;;  %v9731_v2 = vld [vmem:[#allocation62_spill] sm:$0xff] }
 0x7b5   :  { %v3088_v11 = vpop.f32.mrb[20].mxu0  ;;  %v3159_v3 = vpop.f32.mrb[36].mxu1 }
 0x7b6   :  { %7607 = vtanh.f32 %v3016_v33  ;;  %v3089_v63 = vadd.f32 %v3088_v11, %v9729_v24  ;;  %v3090_v29 = vpop.f32.mrb[21].mxu0  ;;  %v5714_v58 = vpop.f32.mrb[37].mxu1 }
 0x7b7   :  { %v3091_v43 = vadd.f32 %v3090_v29, %v9544_v21  ;;  %v3018_v29 = vsub.f32 1.0, %v7606_v32 }
 0x7b8   :  { %v3164_v12 = vrot.slane %v3089_v63, 3  ;;  %v3165_v38 = vrot.slane %v3089_v63, 4 }
 0x7b9   :  { %v3183_v30 = vrot.slane %v3091_v43, 3  ;;  %v3184_v44 = vrot.slane %v3091_v43, 4  ;;  %v3020_v43 = vmul.f32 %v7606_v32, %v8812_v52  ;;  %v3216_v32 = vrot.slane %v8819_v20, 7 }
 0x7ba   :  { %v3168_v56 = vadd.f32 %v3164_v12, %v9590_v61  ;;  %v3169_v26 = vadd.f32 %v3165_v38, %v9591_v17 }
 0x7bb   :  { %v3187_v40 = vadd.f32 %v3183_v30, %v9730_v53  ;;  %v3188_v59 = vadd.f32 %v3184_v44, %v9731_v2 }
 0x7bc   :  { %v4703_v33 = vmul.f32 -1.442695, %v3168_v56  ;;  %v4704_v7 = vmul.f32 -1.442695, %v3169_v26 }
 0x7bd   :  { %v4705_v11 = vmul.f32 -1.442695, %v3187_v40  ;;  %v4706_v24 = vmul.f32 -1.442695, %v3188_v59 }
 0x7be   :  { %7609 = vpow2.f32 %v4703_v33 }
 0x7bf   :  { %7611 = vpow2.f32 %v4704_v7  ;;  %v3160_v7 = vadd.f32 %v3159_v3, %v9594_v47 }
 0x7c0   :  { %v7608_v58 = vpop.eup %7607  ;;  %7613 = vpow2.f32 %v4705_v11 }
 0x7c1   :  { %7615 = vpow2.f32 %v4706_v24  ;;  %v3019_v63 = vmul.f32 %v7608_v58, %v3018_v29  ;;  %v3202_v24 = vrot.slane %v3160_v7, 3  ;;  %v3203_v33 = vrot.slane %v3160_v7, 4 }
 0x7c2   :  { %v3217_v58 = vrot.slane %v8821_v25, 7 }
 0x7c3   :  { %v8950_v12 = vadd.f32 %v3020_v43, %v3019_v63 }
 0x7c8   :  { %v7610_v38 = vpop.eup %7609 }
 0x7c9   :  { %v7612_v30 = vpop.eup %7611  ;;  %v3176_v53 = vadd.f32 1.0, %v7610_v38 }
 0x7ca   :  { %v7614_v44 = vpop.eup %7613  ;;  %v3177_v2 = vadd.f32 1.0, %v7612_v30 }
 0x7cb   :  { %v7616_v56 = vpop.eup %7615  ;;  %7617 = vrcp.f32 %v3176_v53  ;;  %v3195_v26 = vadd.f32 1.0, %v7614_v44 }
 0x7cc   :  { %7619 = vrcp.f32 %v3177_v2  ;;  %v3196_v40 = vadd.f32 1.0, %v7616_v56 }
 0x7cd   :  { %7621 = vrcp.f32 %v3195_v26 }
 0x7ce   :  { %7623 = vrcp.f32 %v3196_v40 }
 0x7d5   :  { %v7618_v59 = vpop.eup %7617 }
 0x7d6   :  { %v7620_v52 = vpop.eup %7619  ;;  %v3206_v11 = vmul.f32 %v7618_v59, %v3202_v24 }
 0x7d7   :  { %v7622_v29 = vpop.eup %7621  ;;  %v3207_v63 = vmul.f32 %v7620_v52, %v3203_v33  ;;  %v9732_v52 = vld [vmem:[#allocation15_spill] sm:$0xff] }
 0x7d8   :  { %v7624_v43 = vpop.eup %7623  ;;  %v3208_v53 = vadd.f32 %v3206_v11, %v9548_v45  ;;  %v3220_v2 = vmul.f32 %v7622_v29, %v3216_v32  ;;  %v3212_v3 = vsub.f32 1.0, %v7622_v29  ;;  %v9733_v32 = vld [vmem:[#allocation16_spill] sm:$0xff]  ;;  %v9734_v11 = vld [vmem:[#allocation25_spill] sm:$0xff] }
 0x7d9   :  { %v3209_v38 = vadd.f32 %v3207_v63, %v9547_v5  ;;  %v3221_v30 = vmul.f32 %v7624_v43, %v3217_v58  ;;  %v3213_v56 = vsub.f32 1.0, %v7624_v43  ;;  %v9735_v29 = vld [vmem:[#allocation17_spill] sm:$0xff]  ;;  %v9736_v58 = vld [vmem:[#allocation18_spill] sm:$0xff]  ;;  %v9738_v43 = vld [vmem:[#allocation19_spill] sm:$0xff] }
 0x7da   :  { %7625 = vtanh.f32 %v3208_v53  ;;  %v9737_v63 = vld [vmem:[#allocation26_spill] sm:$0xff]  ;;  %v9739_v53 = vld [vmem:[#allocation20_spill] sm:$0xff] }
 0x7db   :  { %7627 = vtanh.f32 %v3209_v38  ;;  %v9741_v38 = vld [vmem:[#allocation21_spill] sm:$0xff] }
 0x7e4   :  { %v7626_v44 = vpop.eup %7625 }
 0x7e5   :  { %v7628_v26 = vpop.eup %7627  ;;  %v3214_v40 = vmul.f32 %v7626_v44, %v3212_v3  ;;  %v9743_v3 = vld [vmem:[#allocation28_spill] sm:$0xff]  ;;  %v9744_v44 = vld [vmem:[#allocation23_spill] sm:$0xff] }
 0x7e6   :  { %v3215_v20 = vmul.f32 %v7628_v26, %v3213_v56  ;;  %v9745_v56 = vld [vmem:[#allocation24_spill] sm:$0xff]  ;;  %v9746_v26 = vld [vmem:[#allocation29_spill] sm:$0xff] }
 0x7e7   :  { %v8957_v7 = vadd.f32 %v3220_v2, %v3214_v40  ;;  %v9740_v2 = vld [vmem:[#allocation27_spill] sm:$0xff]  ;;  %v9747_v40 = vld [vmem:[#allocation30_spill] sm:$0xff] }
 0x7e8   :  { %v8959_v24 = vadd.f32 %v3221_v30, %v3215_v20  ;;  %v9742_v30 = vld [vmem:[#allocation22_spill] sm:$0xff]  ;;  %v9748_v20 = vld [vmem:[#allocation31_spill] sm:$0xff] }
 0x7e9   :  { %v3226_v25 = vrot.slane %v8957_v7, 5 }
 0x7ea   :  { %v3227_v59 = vrot.slane %v8959_v24, 4 }
 0x7ec   :  { %v8964_v33 = vsel %vm661_vm3, %v3227_v59, %v3226_v25  ;;  %v9749_v25 = vld [vmem:[#allocation32_spill] sm:$0xff]  ;;  %v9750_v59 = vld [vmem:[#allocation33_spill] sm:$0xff] }
 0x7ed   :  { %3295 = vmatmul.mubr.f32.vlgmr.msra.gmra.mrb[22].mxu0 %v8964_v33  ;;  %5748 = vmatmul.mubr.f32.vlgmr.msra.gmra.mrb[38].mxu1 %v8964_v33 }
 0x7ee   :  { %6985 = vmatpush1.bf16.msra.mxu0 %v9551_v50  ;;  %7016 = vmatpush3.bf16.msra.mxu1 %v9552_v41 }
 0x7ef   :  { %6987 = vmatprep.subr.bf16.mxu0 %v9553_v46  ;;  %7017 = vmatprep.subr.bf16.mxu1 %v9515_v55 }
 0x7f0   :  { %3435 = vmatprep.mubr.f32.mxu0 %v9517_v10  ;;  %5782 = vmatprep.mubr.msk.f32.mxu1 %vm7827_vm2, %v9517_v10 }
 0x7f2   :  { %6989 = vmatpush1.bf16.msra.mxu0 %v9554_v23  ;;  %7019 = vmatpush3.bf16.msra.mxu1 %v9555_v16 }
 0x7f3   :  { %6991 = vmatprep.subr.bf16.mxu0 %v9556_v0  ;;  %7020 = vmatprep.subr.bf16.mxu1 %v9515_v55 }
 0x7f6   :  { %6993 = vmatpush1.bf16.msra.mxu0 %v9557_v62  ;;  %7022 = vmatpush3.bf16.msra.mxu1 %v9558_v19 }
 0x7f7   :  { %6995 = vmatprep.subr.bf16.mxu0 %v9559_v13  ;;  %7023 = vmatprep.subr.bf16.mxu1 %v9515_v55 }
 0x7fa   :  { %6997 = vmatpush1.bf16.msra.mxu0 %v9560_v31  ;;  %7025 = vmatpush3.bf16.msra.mxu1 %v9561_v28 }
 0x7fb   :  { %6999 = vmatprep.subr.bf16.mxu0 %v9562_v1  ;;  %7026 = vmatprep.subr.bf16.mxu1 %v9515_v55 }
 0x7fe   :  { %7001 = vmatpush1.bf16.msra.mxu0 %v8253_v37  ;;  %7028 = vmatpush3.bf16.msra.mxu1 %v8255_v57 }
 0x7ff   :  { %7003 = vmatprep.subr.bf16.mxu0 %v9563_v36  ;;  %7029 = vmatprep.subr.bf16.mxu1 %v9515_v55 }
 0x802   :  { %7005 = vmatpush1.bf16.msra.mxu0 %v9564_v48  ;;  %7031 = vmatpush3.bf16.msra.mxu1 %v8265_v27 }
 0x803   :  { %7007 = vmatprep.subr.bf16.mxu0 %v8269_v54  ;;  %7032 = vmatprep.subr.bf16.mxu1 %v9515_v55 }
 0x806   :  { %7009 = vmatpush1.bf16.msra.mxu0 %v8273_v6  ;;  %7034 = vmatpush3.bf16.msra.mxu1 %v8275_v18 }
 0x807   :  { %7011 = vmatprep.subr.bf16.mxu0 %v8279_v34  ;;  %7035 = vmatprep.subr.bf16.mxu1 %v9515_v55 }
 0x80a   :  { %7013 = vmatpush1.bf16.msra.mxu0 %v8283_v35  ;;  %7037 = vmatpush3.bf16.msra.mxu1 %v8285_v39 }
 0x80b   :  { %7039 = vmatprep.subr.bf16.mxu0 %v7962_v4  ;;  %7070 = vmatprep.subr.bf16.mxu1 %v9515_v55 }
 0x80d   :  { %3436 = vmatmul.mubr.f32.vlgmr.msra.gmra.mrb[22].mxu0 %v8950_v12  ;;  %5783 = vmatmul.mubr.f32.vlgmr.msra.gmra.mrb[40].mxu1 %v8950_v12 }
 0x80e   :  { %7041 = vmatpush1.bf16.msra.mxu0 %v7964_v8  ;;  %7072 = vmatpush3.bf16.msra.mxu1 %v8011_v42 }
 0x80f   :  { %7043 = vmatprep.subr.bf16.mxu0 %v7966_v9  ;;  %7073 = vmatprep.subr.bf16.mxu1 %v9515_v55 }
 0x810   :  { %3597 = vmatprep.mubr.f32.mxu0 %v9517_v10  ;;  %5817 = vmatprep.mubr.msk.f32.mxu1 %vm7827_vm2, %v9517_v10 }
 0x812   :  { %7045 = vmatpush1.bf16.msra.mxu0 %v7970_v14  ;;  %7075 = vmatpush3.bf16.msra.mxu1 %v8021_v51 }
 0x813   :  { %7047 = vmatprep.subr.bf16.mxu0 %v7973_v15  ;;  %7076 = vmatprep.subr.bf16.mxu1 %v9515_v55 }
 0x816   :  { %7049 = vmatpush1.bf16.msra.mxu0 %v7979_v22  ;;  %7078 = vmatpush3.bf16.msra.mxu1 %v8033_v60 }
 0x817   :  { %7051 = vmatprep.subr.bf16.mxu0 %v9732_v52  ;;  %7079 = vmatprep.subr.bf16.mxu1 %v9515_v55 }
 0x81a   :  { %7053 = vmatpush1.bf16.msra.mxu0 %v9733_v32  ;;  %7081 = vmatpush3.bf16.msra.mxu1 %v9734_v11  ;;  %v9774_v11 = vld [vmem:[#allocation83_spill] sm:$0xff] }
 0x81b   :  { %7055 = vmatprep.subr.bf16.mxu0 %v9735_v29  ;;  %7082 = vmatprep.subr.bf16.mxu1 %v9515_v55 }
 0x81e   :  { %7057 = vmatpush1.bf16.msra.mxu0 %v9736_v58  ;;  %7084 = vmatpush3.bf16.msra.mxu1 %v9737_v63 }
 0x81f   :  { %7059 = vmatprep.subr.bf16.mxu0 %v9738_v43  ;;  %7085 = vmatprep.subr.bf16.mxu1 %v9515_v55 }
 0x822   :  { %7061 = vmatpush1.bf16.msra.mxu0 %v9739_v53  ;;  %7087 = vmatpush3.bf16.msra.mxu1 %v9740_v2 }
 0x823   :  { %7063 = vmatprep.subr.bf16.mxu0 %v9741_v38  ;;  %7088 = vmatprep.subr.bf16.mxu1 %v9515_v55  ;;  %v9772_v38 = vld [vmem:[#allocation55_spill] sm:$0xff] }
 0x826   :  { %7065 = vmatpush1.bf16.msra.mxu0 %v9742_v30  ;;  %7090 = vmatpush3.bf16.msra.mxu1 %v9743_v3  ;;  %v9759_v3 = vld [vmem:[#allocation42_spill] sm:$0xff] }
 0x827   :  { %7067 = vmatprep.subr.bf16.mxu0 %v9744_v44  ;;  %7091 = vmatprep.subr.bf16.mxu1 %v9515_v55  ;;  %v9758_v44 = vld [vmem:[#allocation41_spill] sm:$0xff] }
 0x82a   :  { %7069 = vmatpush1.bf16.msra.mxu0 %v9745_v56  ;;  %7093 = vmatpush3.bf16.msra.mxu1 %v9746_v26  ;;  %v9752_v26 = vld [vmem:[#allocation35_spill] sm:$0xff]  ;;  %v9753_v56 = vld [vmem:[#allocation36_spill] sm:$0xff] }
 0x82b   :  { %7095 = vmatprep.subr.bf16.mxu0 %v9747_v40  ;;  %7126 = vmatprep.subr.bf16.mxu1 %v9515_v55  ;;  %v9751_v40 = vld [vmem:[#allocation34_spill] sm:$0xff] }
 0x82d   :  { %3598 = vmatmul.mubr.f32.vlgmr.msra.gmra.mrb[24].mxu0 %v8964_v33  ;;  %5818 = vmatmul.mubr.f32.vlgmr.msra.gmra.mrb[42].mxu1 %v8964_v33  ;;  %v9754_v33 = vld [vmem:[#allocation37_spill] sm:$0xff] }
 0x82e   :  { %7097 = vmatpush1.bf16.msra.mxu0 %v9748_v20  ;;  %7128 = vmatpush3.bf16.msra.mxu1 %v9749_v25  ;;  %v9755_v25 = vld [vmem:[#allocation38_spill] sm:$0xff]  ;;  %v9757_v20 = vld [vmem:[#allocation40_spill] sm:$0xff] }
 0x82f   :  { %7099 = vmatprep.subr.bf16.mxu0 %v9750_v59  ;;  %7129 = vmatprep.subr.bf16.mxu1 %v9515_v55  ;;  %v9756_v59 = vld [vmem:[#allocation39_spill] sm:$0xff] }
 0x830   :  { %3805 = vmatprep.mubr.f32.mxu0 %v9517_v10  ;;  %5852 = vmatprep.mubr.msk.f32.mxu1 %vm7827_vm2, %v9517_v10 }
 0x832   :  { %7101 = vmatpush1.bf16.msra.mxu0 %v9751_v40  ;;  %7131 = vmatpush3.bf16.msra.mxu1 %v9752_v26  ;;  %v9760_v26 = vld [vmem:[#allocation43_spill] sm:$0xff]  ;;  %v9762_v40 = vld [vmem:[#allocation45_spill] sm:$0xff] }
 0x833   :  { %7103 = vmatprep.subr.bf16.mxu0 %v9753_v56  ;;  %7132 = vmatprep.subr.bf16.mxu1 %v9515_v55  ;;  %v9761_v56 = vld [vmem:[#allocation44_spill] sm:$0xff] }
 0x836   :  { %7105 = vmatpush1.bf16.msra.mxu0 %v9754_v33  ;;  %7134 = vmatpush3.bf16.msra.mxu1 %v9755_v25  ;;  %v9763_v25 = vld [vmem:[#allocation46_spill] sm:$0xff]  ;;  %v9765_v33 = vld [vmem:[#allocation48_spill] sm:$0xff] }
 0x837   :  { %7107 = vmatprep.subr.bf16.mxu0 %v9756_v59  ;;  %7135 = vmatprep.subr.bf16.mxu1 %v9515_v55  ;;  %v9764_v59 = vld [vmem:[#allocation47_spill] sm:$0xff] }
 0x83a   :  { %7109 = vmatpush1.bf16.msra.mxu0 %v9757_v20  ;;  %7137 = vmatpush3.bf16.msra.mxu1 %v9758_v44  ;;  %v9766_v44 = vld [vmem:[#allocation49_spill] sm:$0xff]  ;;  %v9768_v20 = vld [vmem:[#allocation51_spill] sm:$0xff] }
 0x83b   :  { %7111 = vmatprep.subr.bf16.mxu0 %v9759_v3  ;;  %7138 = vmatprep.subr.bf16.mxu1 %v9515_v55  ;;  %v9767_v3 = vld [vmem:[#allocation50_spill] sm:$0xff] }
 0x83e   :  { %7113 = vmatpush1.bf16.msra.mxu0 %v9760_v26  ;;  %7140 = vmatpush3.bf16.msra.mxu1 %v9761_v56  ;;  %v9769_v56 = vld [vmem:[#allocation52_spill] sm:$0xff]  ;;  %v9771_v26 = vld [vmem:[#allocation54_spill] sm:$0xff] }
 0x83f   :  { %7115 = vmatprep.subr.bf16.mxu0 %v9762_v40  ;;  %7141 = vmatprep.subr.bf16.mxu1 %v9515_v55  ;;  %v9770_v40 = vld [vmem:[#allocation53_spill] sm:$0xff] }
 0x842   :  { %7117 = vmatpush1.bf16.msra.mxu0 %v9763_v25  ;;  %7143 = vmatpush3.bf16.msra.mxu1 %v9764_v59 }
 0x843   :  { %7119 = vmatprep.subr.bf16.mxu0 %v9765_v33  ;;  %7144 = vmatprep.subr.bf16.mxu1 %v9515_v55 }
 0x846   :  { %7121 = vmatpush1.bf16.msra.mxu0 %v9766_v44  ;;  %7146 = vmatpush3.bf16.msra.mxu1 %v9767_v3 }
 0x847   :  { %7123 = vmatprep.subr.bf16.mxu0 %v9768_v20  ;;  %7147 = vmatprep.subr.bf16.mxu1 %v9515_v55  ;;  %v9773_v20 = vld [vmem:[#allocation56_spill] sm:$0xff] }
 0x84a   :  { %7125 = vmatpush1.bf16.msra.mxu0 %v9769_v56  ;;  %7149 = vmatpush3.bf16.msra.mxu1 %v9770_v40 }
 0x84b   :  { %7151 = vmatprep.subr.bf16.mxu0 %v9771_v26  ;;  %7182 = vmatprep.subr.bf16.mxu1 %v9515_v55 }
 0x8c0   :  { %v3367_v59 = vpop.f32.mrb[38].mxu1 }
 0x8c1   :  { %v5749_v33 = vpop.f32.mrb[39].mxu1  ;;  %v3368_v32 = vadd.f32 %v3367_v59, %v9774_v11 }
 0x8e0   :  { %v3437_v25 = vpop.f32.mrb[22].mxu0  ;;  %v3508_v30 = vpop.f32.mrb[40].mxu1 }
 0x8e1   :  { %v7419_v44 = vadd.f32 %v9772_v38, %v3437_v25  ;;  %v3439_v2 = vpop.f32.mrb[23].mxu0  ;;  %v5784_v3 = vpop.f32.mrb[41].mxu1  ;;  %v3509_v29 = vadd.f32 %v3508_v30, %v9635_v49 }
 0x8e2   :  { %v7421_v43 = vadd.f32 %v9773_v20, %v3439_v2  ;;  %v9775_v2 = vld [vmem:[#allocation57_spill] sm:$0xff] }
 0x8e3   :  { %v4707_v53 = vmul.f32 -1.442695, %v7419_v44 }
 0x8e4   :  { %v4708_v63 = vmul.f32 -1.442695, %v7421_v43 }
 0x8e5   :  { %7629 = vpow2.f32 %v4707_v53 }
 0x8e6   :  { %7631 = vpow2.f32 %v4708_v63 }
 0x8ef   :  { %v7630_v56 = vpop.eup %7629 }
 0x8f0   :  { %v3516_v40 = vadd.f32 1.0, %v7630_v56  ;;  %v7632_v26 = vpop.eup %7631 }
 0x8f1   :  { %v3523_v58 = vadd.f32 1.0, %v7632_v26 }
 0x8f2   :  { %7633 = vrcp.f32 %v3516_v40 }
 0x8f3   :  { %7635 = vrcp.f32 %v3523_v58 }
 0x8fc   :  { %v7634_v33 = vpop.eup %7633 }
 0x8fd   :  { %v3526_v52 = vmul.f32 %v7634_v33, %v3509_v29  ;;  %v9776_v29 = vld [vmem:[#allocation61_spill] sm:$0xff]  ;;  %v7636_v33 = vpop.eup %7635 }
 0x8ff   :  { %v3527_v25 = vadd.f32 %v3526_v52, %v3368_v32  ;;  %v9777_v52 = vld [vmem:[#allocation62_spill] sm:$0xff] }
 0x900   :  { %v3599_v3 = vpop.f32.mrb[24].mxu0  ;;  %v3670_v44 = vpop.f32.mrb[42].mxu1 }
 0x901   :  { %7637 = vtanh.f32 %v3527_v25  ;;  %v3600_v53 = vadd.f32 %v3599_v3, %v9775_v2  ;;  %v3601_v43 = vpop.f32.mrb[25].mxu0  ;;  %v5819_v63 = vpop.f32.mrb[43].mxu1 }
 0x902   :  { %v3602_v56 = vadd.f32 %v3601_v43, %v9544_v21  ;;  %v3529_v43 = vsub.f32 1.0, %v7636_v33 }
 0x903   :  { %v3675_v40 = vrot.slane %v3600_v53, 2  ;;  %v3676_v20 = vrot.slane %v3600_v53, 3 }
 0x904   :  { %v3694_v26 = vrot.slane %v3602_v56, 2  ;;  %v3695_v38 = vrot.slane %v3602_v56, 3  ;;  %v3531_v56 = vmul.f32 %v7636_v33, %v8950_v12  ;;  %v3727_v33 = vrot.slane %v8957_v7, 7 }
 0x905   :  { %v3679_v30 = vadd.f32 %v3675_v40, %v9590_v61  ;;  %v3680_v59 = vadd.f32 %v3676_v20, %v9591_v17 }
 0x906   :  { %v3698_v58 = vadd.f32 %v3694_v26, %v9776_v29  ;;  %v3699_v32 = vadd.f32 %v3695_v38, %v9777_v52 }
 0x907   :  { %v4709_v25 = vmul.f32 -1.442695, %v3679_v30  ;;  %v4710_v11 = vmul.f32 -1.442695, %v3680_v59 }
 0x908   :  { %v4711_v3 = vmul.f32 -1.442695, %v3698_v58  ;;  %v4712_v2 = vmul.f32 -1.442695, %v3699_v32 }
 0x909   :  { %7639 = vpow2.f32 %v4709_v25 }
 0x90a   :  { %7641 = vpow2.f32 %v4710_v11  ;;  %v3671_v11 = vadd.f32 %v3670_v44, %v9594_v47 }
 0x90b   :  { %v7638_v63 = vpop.eup %7637  ;;  %7643 = vpow2.f32 %v4711_v3 }
 0x90c   :  { %7645 = vpow2.f32 %v4712_v2  ;;  %v3530_v53 = vmul.f32 %v7638_v63, %v3529_v43  ;;  %v3713_v2 = vrot.slane %v3671_v11, 2  ;;  %v3714_v25 = vrot.slane %v3671_v11, 3 }
 0x90d   :  { %v3728_v63 = vrot.slane %v8959_v24, 7 }
 0x90e   :  { %v9088_v40 = vadd.f32 %v3531_v56, %v3530_v53 }
 0x913   :  { %v7640_v20 = vpop.eup %7639 }
 0x914   :  { %v7642_v26 = vpop.eup %7641  ;;  %v3687_v29 = vadd.f32 1.0, %v7640_v20 }
 0x915   :  { %v7644_v38 = vpop.eup %7643  ;;  %v3688_v52 = vadd.f32 1.0, %v7642_v26 }
 0x916   :  { %v7646_v30 = vpop.eup %7645  ;;  %7647 = vrcp.f32 %v3687_v29  ;;  %v3706_v59 = vadd.f32 1.0, %v7644_v38 }
 0x917   :  { %7649 = vrcp.f32 %v3688_v52  ;;  %v3707_v58 = vadd.f32 1.0, %v7646_v30 }
 0x918   :  { %7651 = vrcp.f32 %v3706_v59 }
 0x919   :  { %7653 = vrcp.f32 %v3707_v58 }
 0x920   :  { %v7648_v32 = vpop.eup %7647 }
 0x921   :  { %v7650_v12 = vpop.eup %7649  ;;  %v3717_v3 = vmul.f32 %v7648_v32, %v3713_v2 }
 0x922   :  { %v7652_v43 = vpop.eup %7651  ;;  %v3718_v53 = vmul.f32 %v7650_v12, %v3714_v25  ;;  %v9787_v12 = vld [vmem:[#allocation21_spill] sm:$0xff] }
 0x923   :  { %v7654_v56 = vpop.eup %7653  ;;  %v3719_v29 = vadd.f32 %v3717_v3, %v9548_v45  ;;  %v3731_v52 = vmul.f32 %v7652_v43, %v3727_v33  ;;  %v3723_v44 = vsub.f32 1.0, %v7652_v43  ;;  %v9788_v33 = vld [vmem:[#allocation22_spill] sm:$0xff]  ;;  %v9789_v3 = vld [vmem:[#allocation28_spill] sm:$0xff]  ;;  %v9790_v43 = vld [vmem:[#allocation23_spill] sm:$0xff] }
 0x924   :  { %v3720_v20 = vadd.f32 %v3718_v53, %v9547_v5  ;;  %v3732_v26 = vmul.f32 %v7654_v56, %v3728_v63  ;;  %v3724_v30 = vsub.f32 1.0, %v7654_v56  ;;  %v9791_v63 = vld [vmem:[#allocation24_spill] sm:$0xff]  ;;  %v9792_v53 = vld [vmem:[#allocation29_spill] sm:$0xff]  ;;  %v9793_v56 = vld [vmem:[#allocation30_spill] sm:$0xff] }
 0x925   :  { %7655 = vtanh.f32 %v3719_v29  ;;  %v9794_v29 = vld [vmem:[#allocation31_spill] sm:$0xff] }
 0x926   :  { %7657 = vtanh.f32 %v3720_v20  ;;  %v9796_v20 = vld [vmem:[#allocation33_spill] sm:$0xff] }
 0x92f   :  { %v7656_v38 = vpop.eup %7655 }
 0x930   :  { %v7658_v59 = vpop.eup %7657  ;;  %v3725_v58 = vmul.f32 %v7656_v38, %v3723_v44  ;;  %v9798_v44 = vld [vmem:[#allocation35_spill] sm:$0xff]  ;;  %v9799_v38 = vld [vmem:[#allocation36_spill] sm:$0xff] }
 0x931   :  { %v3726_v7 = vmul.f32 %v7658_v59, %v3724_v30  ;;  %v9800_v30 = vld [vmem:[#allocation37_spill] sm:$0xff]  ;;  %v9801_v59 = vld [vmem:[#allocation38_spill] sm:$0xff] }
 0x932   :  { %v9095_v11 = vadd.f32 %v3731_v52, %v3725_v58  ;;  %v9795_v52 = vld [vmem:[#allocation32_spill] sm:$0xff]  ;;  %v9802_v58 = vld [vmem:[#allocation39_spill] sm:$0xff] }
 0x933   :  { %v9097_v2 = vadd.f32 %v3732_v26, %v3726_v7  ;;  %v9797_v26 = vld [vmem:[#allocation34_spill] sm:$0xff]  ;;  %v9803_v7 = vld [vmem:[#allocation40_spill] sm:$0xff] }
 0x934   :  { %v3737_v24 = vrot.slane %v9095_v11, 6 }
 0x935   :  { %v3738_v32 = vrot.slane %v9097_v2, 5 }
 0x937   :  { %v9102_v25 = vsel %vm661_vm3, %v3738_v32, %v3737_v24  ;;  %v9804_v24 = vld [vmem:[#allocation41_spill] sm:$0xff]  ;;  %v9805_v32 = vld [vmem:[#allocation42_spill] sm:$0xff] }
 0x938   :  { %3806 = vmatmul.mubr.f32.vlgmr.msra.gmra.mrb[26].mxu0 %v9102_v25  ;;  %5853 = vmatmul.mubr.f32.vlgmr.msra.gmra.mrb[44].mxu1 %v9102_v25 }
 0x939   :  { %7153 = vmatpush1.bf16.msra.mxu0 %v9551_v50  ;;  %7184 = vmatpush3.bf16.msra.mxu1 %v9552_v41 }
 0x93a   :  { %7155 = vmatprep.subr.bf16.mxu0 %v9553_v46  ;;  %7185 = vmatprep.subr.bf16.mxu1 %v9515_v55 }
 0x93b   :  { %3946 = vmatprep.mubr.f32.mxu0 %v9517_v10  ;;  %5887 = vmatprep.mubr.msk.f32.mxu1 %vm7827_vm2, %v9517_v10 }
 0x93d   :  { %7157 = vmatpush1.bf16.msra.mxu0 %v9554_v23  ;;  %7187 = vmatpush3.bf16.msra.mxu1 %v9555_v16 }
 0x93e   :  { %7159 = vmatprep.subr.bf16.mxu0 %v9556_v0  ;;  %7188 = vmatprep.subr.bf16.mxu1 %v9515_v55 }
 0x941   :  { %7161 = vmatpush1.bf16.msra.mxu0 %v9557_v62  ;;  %7190 = vmatpush3.bf16.msra.mxu1 %v9558_v19 }
 0x942   :  { %7163 = vmatprep.subr.bf16.mxu0 %v9559_v13  ;;  %7191 = vmatprep.subr.bf16.mxu1 %v9515_v55 }
 0x945   :  { %7165 = vmatpush1.bf16.msra.mxu0 %v9560_v31  ;;  %7193 = vmatpush3.bf16.msra.mxu1 %v9561_v28 }
 0x946   :  { %7167 = vmatprep.subr.bf16.mxu0 %v9562_v1  ;;  %7194 = vmatprep.subr.bf16.mxu1 %v9515_v55 }
 0x949   :  { %7169 = vmatpush1.bf16.msra.mxu0 %v8253_v37  ;;  %7196 = vmatpush3.bf16.msra.mxu1 %v8255_v57 }
 0x94a   :  { %7171 = vmatprep.subr.bf16.mxu0 %v9563_v36  ;;  %7197 = vmatprep.subr.bf16.mxu1 %v9515_v55 }
 0x94d   :  { %7173 = vmatpush1.bf16.msra.mxu0 %v9564_v48  ;;  %7199 = vmatpush3.bf16.msra.mxu1 %v8265_v27 }
 0x94e   :  { %7175 = vmatprep.subr.bf16.mxu0 %v8269_v54  ;;  %7200 = vmatprep.subr.bf16.mxu1 %v9515_v55 }
 0x951   :  { %7177 = vmatpush1.bf16.msra.mxu0 %v8273_v6  ;;  %7202 = vmatpush3.bf16.msra.mxu1 %v8275_v18 }
 0x952   :  { %7179 = vmatprep.subr.bf16.mxu0 %v8279_v34  ;;  %7203 = vmatprep.subr.bf16.mxu1 %v9515_v55 }
 0x955   :  { %7181 = vmatpush1.bf16.msra.mxu0 %v8283_v35  ;;  %7205 = vmatpush3.bf16.msra.mxu1 %v8285_v39 }
 0x956   :  { %7207 = vmatprep.subr.bf16.mxu0 %v7962_v4  ;;  %7238 = vmatprep.subr.bf16.mxu1 %v9515_v55  ;;  %v9778_v4 = vld [vmem:[#allocation15_spill] sm:$0xff] }
 0x958   :  { %3947 = vmatmul.mubr.f32.vlgmr.msra.gmra.mrb[26].mxu0 %v9088_v40  ;;  %5888 = vmatmul.mubr.f32.vlgmr.msra.gmra.mrb[46].mxu1 %v9088_v40 }
 0x959   :  { %7209 = vmatpush1.bf16.msra.mxu0 %v7964_v8  ;;  %7240 = vmatpush3.bf16.msra.mxu1 %v8011_v42  ;;  %v9779_v8 = vld [vmem:[#allocation16_spill] sm:$0xff]  ;;  %v9781_v42 = vld [vmem:[#allocation17_spill] sm:$0xff] }
 0x95a   :  { %7211 = vmatprep.subr.bf16.mxu0 %v7966_v9  ;;  %7241 = vmatprep.subr.bf16.mxu1 %v9515_v55  ;;  %v9780_v9 = vld [vmem:[#allocation25_spill] sm:$0xff] }
 0x95b   :  { %4108 = vmatprep.mubr.f32.mxu0 %v9517_v10  ;;  %5922 = vmatprep.mubr.msk.f32.mxu1 %vm7827_vm2, %v9517_v10 }
 0x95d   :  { %7213 = vmatpush1.bf16.msra.mxu0 %v7970_v14  ;;  %7243 = vmatpush3.bf16.msra.mxu1 %v8021_v51  ;;  %v9782_v14 = vld [vmem:[#allocation18_spill] sm:$0xff]  ;;  %v9784_v51 = vld [vmem:[#allocation19_spill] sm:$0xff] }
 0x95e   :  { %7215 = vmatprep.subr.bf16.mxu0 %v7973_v15  ;;  %7244 = vmatprep.subr.bf16.mxu1 %v9515_v55  ;;  %v9783_v15 = vld [vmem:[#allocation26_spill] sm:$0xff] }
 0x961   :  { %7217 = vmatpush1.bf16.msra.mxu0 %v7979_v22  ;;  %7246 = vmatpush3.bf16.msra.mxu1 %v8033_v60  ;;  %v9785_v22 = vld [vmem:[#allocation20_spill] sm:$0xff]  ;;  %v9786_v60 = vld [vmem:[#allocation27_spill] sm:$0xff] }
 0x962   :  { %7219 = vmatprep.subr.bf16.mxu0 %v9778_v4  ;;  %7247 = vmatprep.subr.bf16.mxu1 %v9515_v55  ;;  %v9807_v4 = vld [vmem:[#allocation44_spill] sm:$0xff] }
 0x965   :  { %7221 = vmatpush1.bf16.msra.mxu0 %v9779_v8  ;;  %7249 = vmatpush3.bf16.msra.mxu1 %v9780_v9  ;;  %v9808_v8 = vld [vmem:[#allocation45_spill] sm:$0xff]  ;;  %v9809_v9 = vld [vmem:[#allocation46_spill] sm:$0xff] }
 0x966   :  { %7223 = vmatprep.subr.bf16.mxu0 %v9781_v42  ;;  %7250 = vmatprep.subr.bf16.mxu1 %v9515_v55  ;;  %v9810_v42 = vld [vmem:[#allocation47_spill] sm:$0xff] }
 0x969   :  { %7225 = vmatpush1.bf16.msra.mxu0 %v9782_v14  ;;  %7252 = vmatpush3.bf16.msra.mxu1 %v9783_v15  ;;  %v9811_v14 = vld [vmem:[#allocation48_spill] sm:$0xff]  ;;  %v9812_v15 = vld [vmem:[#allocation49_spill] sm:$0xff] }
 0x96a   :  { %7227 = vmatprep.subr.bf16.mxu0 %v9784_v51  ;;  %7253 = vmatprep.subr.bf16.mxu1 %v9515_v55  ;;  %v9813_v51 = vld [vmem:[#allocation50_spill] sm:$0xff] }
 0x96d   :  { %7229 = vmatpush1.bf16.msra.mxu0 %v9785_v22  ;;  %7255 = vmatpush3.bf16.msra.mxu1 %v9786_v60  ;;  %v9814_v22 = vld [vmem:[#allocation51_spill] sm:$0xff]  ;;  %v9815_v60 = vld [vmem:[#allocation52_spill] sm:$0xff] }
 0x96e   :  { %7231 = vmatprep.subr.bf16.mxu0 %v9787_v12  ;;  %7256 = vmatprep.subr.bf16.mxu1 %v9515_v55  ;;  %v9816_v12 = vld [vmem:[#allocation53_spill] sm:$0xff] }
 0x971   :  { %7233 = vmatpush1.bf16.msra.mxu0 %v9788_v33  ;;  %7258 = vmatpush3.bf16.msra.mxu1 %v9789_v3  ;;  %v9817_v33 = vld [vmem:[#allocation54_spill] sm:$0xff] }
 0x972   :  { %7235 = vmatprep.subr.bf16.mxu0 %v9790_v43  ;;  %7259 = vmatprep.subr.bf16.mxu1 %v9515_v55 }
 0x975   :  { %7237 = vmatpush1.bf16.msra.mxu0 %v9791_v63  ;;  %7261 = vmatpush3.bf16.msra.mxu1 %v9792_v53 }
 0x976   :  { %7263 = vmatprep.subr.bf16.mxu0 %v9793_v56  ;;  %7294 = vmatprep.subr.bf16.mxu1 %v9515_v55  ;;  %v9818_v56 = vld [vmem:[#allocation55_spill] sm:$0xff] }
 0x978   :  { %4109 = vmatmul.mubr.f32.vlgmr.msra.gmra.mrb[28].mxu0 %v9102_v25  ;;  %5923 = vmatmul.mubr.f32.vlgmr.msra.gmra.mrb[48].mxu1 %v9102_v25  ;;  %v9806_v25 = vld [vmem:[#allocation43_spill] sm:$0xff] }
 0x979   :  { %7265 = vmatpush1.bf16.msra.mxu0 %v9794_v29  ;;  %7296 = vmatpush3.bf16.msra.mxu1 %v9795_v52 }
 0x97a   :  { %7267 = vmatprep.subr.bf16.mxu0 %v9796_v20  ;;  %7297 = vmatprep.subr.bf16.mxu1 %v9515_v55 }
 0x97b   :  { %4316 = vmatprep.mubr.f32.mxu0 %v9517_v10  ;;  %5957 = vmatprep.mubr.msk.f32.mxu1 %vm7827_vm2, %v9517_v10 }
 0x97d   :  { %7269 = vmatpush1.bf16.msra.mxu0 %v9797_v26  ;;  %7299 = vmatpush3.bf16.msra.mxu1 %v9798_v44  ;;  %v9819_v44 = vld [vmem:[#allocation56_spill] sm:$0xff] }
 0x97e   :  { %7271 = vmatprep.subr.bf16.mxu0 %v9799_v38  ;;  %7300 = vmatprep.subr.bf16.mxu1 %v9515_v55 }
 0x981   :  { %7273 = vmatpush1.bf16.msra.mxu0 %v9800_v30  ;;  %7302 = vmatpush3.bf16.msra.mxu1 %v9801_v59 }
 0x982   :  { %7275 = vmatprep.subr.bf16.mxu0 %v9802_v58  ;;  %7303 = vmatprep.subr.bf16.mxu1 %v9515_v55 }
 0x985   :  { %7277 = vmatpush1.bf16.msra.mxu0 %v9803_v7  ;;  %7305 = vmatpush3.bf16.msra.mxu1 %v9804_v24 }
 0x986   :  { %7279 = vmatprep.subr.bf16.mxu0 %v9805_v32  ;;  %7306 = vmatprep.subr.bf16.mxu1 %v9515_v55 }
 0x989   :  { %7281 = vmatpush1.bf16.msra.mxu0 %v9806_v25  ;;  %7308 = vmatpush3.bf16.msra.mxu1 %v9807_v4  ;;  %v9820_v4 = vld [vmem:[#allocation83_spill] sm:$0xff] }
 0x98a   :  { %7283 = vmatprep.subr.bf16.mxu0 %v9808_v8  ;;  %7309 = vmatprep.subr.bf16.mxu1 %v9515_v55 }
 0x98d   :  { %7285 = vmatpush1.bf16.msra.mxu0 %v9809_v9  ;;  %7311 = vmatpush3.bf16.msra.mxu1 %v9810_v42 }
 0x98e   :  { %7287 = vmatprep.subr.bf16.mxu0 %v9811_v14  ;;  %7312 = vmatprep.subr.bf16.mxu1 %v9515_v55 }
 0x991   :  { %7289 = vmatpush1.bf16.msra.mxu0 %v9812_v15  ;;  %7314 = vmatpush3.bf16.msra.mxu1 %v9813_v51  ;;  %v9821_v51 = vld [vmem:[#allocation57_spill] sm:$0xff] }
 0x992   :  { %7291 = vmatprep.subr.bf16.mxu0 %v9814_v22  ;;  %7315 = vmatprep.subr.bf16.mxu1 %v9515_v55 }
 0x995   :  { %7293 = vmatpush1.bf16.msra.mxu0 %v9815_v60  ;;  %7317 = vmatpush3.bf16.msra.mxu1 %v9816_v12 }
 0x996   :  { %7319 = vmatprep.subr.bf16.mxu0 %v9817_v33  ;;  %7350 = vmatprep.subr.bf16.mxu1 %v9515_v55 }
 0xa0b   :  { %v3878_v3 = vpop.f32.mrb[44].mxu1 }
 0xa0c   :  { %v5854_v43 = vpop.f32.mrb[45].mxu1  ;;  %v3879_v8 = vadd.f32 %v3878_v3, %v9820_v4 }
 0xa2b   :  { %v3948_v63 = vpop.f32.mrb[26].mxu0  ;;  %v4019_v53 = vpop.f32.mrb[46].mxu1 }
 0xa2c   :  { %v7423_v29 = vadd.f32 %v9818_v56, %v3948_v63  ;;  %v3950_v52 = vpop.f32.mrb[27].mxu0  ;;  %v5889_v20 = vpop.f32.mrb[47].mxu1  ;;  %v4020_v32 = vadd.f32 %v4019_v53, %v9635_v49 }
 0xa2d   :  { %v7425_v38 = vadd.f32 %v9819_v44, %v3950_v52  ;;  %v9822_v20 = vld [vmem:[#allocation61_spill] sm:$0xff] }
 0xa2e   :  { %v4713_v26 = vmul.f32 -1.442695, %v7423_v29 }
 0xa2f   :  { %v4714_v30 = vmul.f32 -1.442695, %v7425_v38  ;;  %v9823_v38 = vld [vmem:[#allocation62_spill] sm:$0xff] }
 0xa30   :  { %7659 = vpow2.f32 %v4713_v26 }
 0xa31   :  { %7661 = vpow2.f32 %v4714_v30 }
 0xa3a   :  { %v7660_v59 = vpop.eup %7659 }
 0xa3b   :  { %v4027_v58 = vadd.f32 1.0, %v7660_v59  ;;  %v7662_v7 = vpop.eup %7661 }
 0xa3c   :  { %v4034_v24 = vadd.f32 1.0, %v7662_v7 }
 0xa3d   :  { %7663 = vrcp.f32 %v4027_v58 }
 0xa3e   :  { %7665 = vrcp.f32 %v4034_v24 }
 0xa47   :  { %v7664_v25 = vpop.eup %7663 }
 0xa48   :  { %v4037_v9 = vmul.f32 %v7664_v25, %v4020_v32  ;;  %v7666_v59 = vpop.eup %7665 }
 0xa4a   :  { %v4038_v42 = vadd.f32 %v4037_v9, %v3879_v8 }
 0xa4b   :  { %v4110_v14 = vpop.f32.mrb[28].mxu0  ;;  %v4181_v15 = vpop.f32.mrb[48].mxu1 }
 0xa4c   :  { %7667 = vtanh.f32 %v4038_v42  ;;  %v4111_v22 = vadd.f32 %v4110_v14, %v9821_v51  ;;  %v4112_v60 = vpop.f32.mrb[29].mxu0  ;;  %v5924_v12 = vpop.f32.mrb[49].mxu1 }
 0xa4d   :  { %v4113_v33 = vadd.f32 %v4112_v60, %v9544_v21  ;;  %v4040_v21 = vsub.f32 1.0, %v7666_v59 }
 0xa4e   :  { %v4186_v43 = vrot.slane %v4111_v22, 1  ;;  %v4187_v63 = vrot.slane %v4111_v22, 2 }
 0xa4f   :  { %v4205_v29 = vrot.slane %v4113_v33, 1  ;;  %v4206_v52 = vrot.slane %v4113_v33, 2 }
 0xa50   :  { %v4190_v53 = vadd.f32 %v4186_v43, %v9590_v61  ;;  %v4191_v3 = vadd.f32 %v4187_v63, %v9591_v17  ;;  %v4042_v61 = vmul.f32 %v7666_v59, %v9088_v40  ;;  %v4182_v43 = vadd.f32 %v4181_v15, %v9594_v47 }
 0xa51   :  { %v4209_v26 = vadd.f32 %v4205_v29, %v9822_v20  ;;  %v4210_v30 = vadd.f32 %v4206_v52, %v9823_v38 }
 0xa52   :  { %v4715_v58 = vmul.f32 -1.442695, %v4190_v53  ;;  %v4716_v7 = vmul.f32 -1.442695, %v4191_v3  ;;  %v4224_v63 = vrot.slane %v4182_v43, 1  ;;  %v4225_v52 = vrot.slane %v4182_v43, 2 }
 0xa53   :  { %v4717_v24 = vmul.f32 -1.442695, %v4209_v26  ;;  %v4718_v32 = vmul.f32 -1.442695, %v4210_v30  ;;  %v4238_v53 = vrot.slane %v9095_v11, 7  ;;  %v4239_v26 = vrot.slane %v9097_v2, 7 }
 0xa54   :  { %7669 = vpow2.f32 %v4715_v58 }
 0xa55   :  { %7671 = vpow2.f32 %v4716_v7 }
 0xa56   :  { %v7668_v25 = vpop.eup %7667  ;;  %7673 = vpow2.f32 %v4717_v24 }
 0xa57   :  { %7675 = vpow2.f32 %v4718_v32  ;;  %v4041_v8 = vmul.f32 %v7668_v25, %v4040_v21 }
 0xa59   :  { %v9226_v9 = vadd.f32 %v4042_v61, %v4041_v8 }
 0xa5e   :  { %v7670_v17 = vpop.eup %7669 }
 0xa5f   :  { %v7672_v42 = vpop.eup %7671  ;;  %v4198_v14 = vadd.f32 1.0, %v7670_v17 }
 0xa60   :  { %v7674_v51 = vpop.eup %7673  ;;  %v4199_v22 = vadd.f32 1.0, %v7672_v42 }
 0xa61   :  { %v7676_v60 = vpop.eup %7675  ;;  %7677 = vrcp.f32 %v4198_v14  ;;  %v4217_v12 = vadd.f32 1.0, %v7674_v51 }
 0xa62   :  { %7679 = vrcp.f32 %v4199_v22  ;;  %v4218_v33 = vadd.f32 1.0, %v7676_v60 }
 0xa63   :  { %7681 = vrcp.f32 %v4217_v12 }
 0xa64   :  { %7683 = vrcp.f32 %v4218_v33 }
 0xa6b   :  { %v7678_v29 = vpop.eup %7677 }
 0xa6c   :  { %v7680_v40 = vpop.eup %7679  ;;  %v4228_v3 = vmul.f32 %v7678_v29, %v4224_v63 }
 0xa6d   :  { %v7682_v20 = vpop.eup %7681  ;;  %v4229_v38 = vmul.f32 %v7680_v40, %v4225_v52 }
 0xa6e   :  { %v7684_v30 = vpop.eup %7683  ;;  %v4230_v59 = vadd.f32 %v4228_v3, %v9548_v45  ;;  %v4242_v58 = vmul.f32 %v7682_v20, %v4238_v53  ;;  %v4234_v47 = vsub.f32 1.0, %v7682_v20 }
 0xa6f   :  { %v4231_v7 = vadd.f32 %v4229_v38, %v9547_v5  ;;  %v4243_v24 = vmul.f32 %v7684_v30, %v4239_v26  ;;  %v4235_v32 = vsub.f32 1.0, %v7684_v30  ;;  %v4561_v5 = vld [vmem:[#allocation8 + $0x30] sm:$0xff] }
 0xa70   :  { %7685 = vtanh.f32 %v4230_v59 }
 0xa71   :  { %7687 = vtanh.f32 %v4231_v7 }
 0xa7a   :  { %v7686_v15 = vpop.eup %7685 }
 0xa7b   :  { %v7688_v21 = vpop.eup %7687  ;;  %v4236_v25 = vmul.f32 %v7686_v15, %v4234_v47 }
 0xa7c   :  { %v4237_v11 = vmul.f32 %v7688_v21, %v4235_v32 }
 0xa7d   :  { %v4244_v8 = vadd.f32 %v4242_v58, %v4236_v25 }
 0xa7e   :  { %v4245_v61 = vadd.f32 %v4243_v24, %v4237_v11  ;;  %v4721_v24 = vld [vmem:[%s9309_s10] ss:$0 sm:$0xff] }
 0xa7f   :  { %v4248_v17 = vrot.slane %v4244_v8, 7 }
 0xa80   :  { %v4249_v2 = vrot.slane %v4245_v61, 6 }
 0xa82   :  { %v4250_v42 = vsel %vm661_vm3, %v4249_v2, %v4248_v17 }
 0xa83   :  { %4317 = vmatmul.mubr.f32.vlgmr.msra.gmra.mrb[30].mxu0 %v4250_v42  ;;  %5958 = vmatmul.mubr.f32.vlgmr.msra.gmra.mrb[50].mxu1 %v4250_v42 }
 0xa84   :  { %7321 = vmatpush1.bf16.msra.mxu0 %v9551_v50  ;;  %7352 = vmatpush3.bf16.msra.mxu1 %v9552_v41  ;;  %v4563_v50 = vld [vmem:[#allocation8 + $0x40] sm:$0xff]  ;;  %v4564_v41 = vld [vmem:[#allocation8 + $0x48] sm:$0xff] }
 0xa85   :  { %7323 = vmatprep.subr.bf16.mxu0 %v9553_v46  ;;  %7353 = vmatprep.subr.bf16.mxu1 %v9515_v55  ;;  %v7387_v46 = vpack.c.bf16 %v4564_v41, %v4563_v50 }
 0xa86   :  { %4457 = vmatprep.mubr.f32.mxu0 %v9517_v10  ;;  %5992 = vmatprep.mubr.msk.f32.mxu1 %vm7827_vm2, %v9517_v10 }
 0xa88   :  { %7325 = vmatpush1.bf16.msra.mxu0 %v9554_v23  ;;  %7355 = vmatpush3.bf16.msra.mxu1 %v9555_v16  ;;  %v4565_v23 = vld [vmem:[#allocation8 + $0x50] sm:$0xff]  ;;  %v4566_v16 = vld [vmem:[#allocation8 + $0x58] sm:$0xff] }
 0xa89   :  { %7327 = vmatprep.subr.bf16.mxu0 %v9556_v0  ;;  %7356 = vmatprep.subr.bf16.mxu1 %v9515_v55  ;;  %v7390_v0 = vpack.c.bf16 %v4566_v16, %v4565_v23 }
 0xa8c   :  { %7329 = vmatpush1.bf16.msra.mxu0 %v9557_v62  ;;  %7358 = vmatpush3.bf16.msra.mxu1 %v9558_v19  ;;  %v4567_v62 = vld [vmem:[#allocation8 + $0x60] sm:$0xff]  ;;  %v4568_v19 = vld [vmem:[#allocation8 + $0x68] sm:$0xff] }
 0xa8d   :  { %7331 = vmatprep.subr.bf16.mxu0 %v9559_v13  ;;  %7359 = vmatprep.subr.bf16.mxu1 %v9515_v55  ;;  %v7393_v13 = vpack.c.bf16 %v4568_v19, %v4567_v62 }
 0xa90   :  { %7333 = vmatpush1.bf16.msra.mxu0 %v9560_v31  ;;  %7361 = vmatpush3.bf16.msra.mxu1 %v9561_v28  ;;  %v4569_v31 = vld [vmem:[#allocation8 + $0x70] sm:$0xff]  ;;  %v4570_v28 = vld [vmem:[#allocation8 + $0x78] sm:$0xff] }
 0xa91   :  { %7335 = vmatprep.subr.bf16.mxu0 %v9562_v1  ;;  %7362 = vmatprep.subr.bf16.mxu1 %v9515_v55  ;;  %v7396_v1 = vpack.c.bf16 %v4570_v28, %v4569_v31 }
 0xa94   :  { %7337 = vmatpush1.bf16.msra.mxu0 %v8253_v37  ;;  %7364 = vmatpush3.bf16.msra.mxu1 %v8255_v57  ;;  %v4555_v37 = vld [vmem:[#allocation8] sm:$0xff]  ;;  %v4556_v57 = vld [vmem:[#allocation8 + $0x8] sm:$0xff] }
 0xa95   :  { %7339 = vmatprep.subr.bf16.mxu0 %v9563_v36  ;;  %7365 = vmatprep.subr.bf16.mxu1 %v9515_v55 }
 0xa98   :  { %7341 = vmatpush1.bf16.msra.mxu0 %v9564_v48  ;;  %7367 = vmatpush3.bf16.msra.mxu1 %v8265_v27  ;;  %v7375_v27 = vpack.c.bf16 %v4556_v57, %v4555_v37 }
 0xa99   :  { %7343 = vmatprep.subr.bf16.mxu0 %v8269_v54  ;;  %7368 = vmatprep.subr.bf16.mxu1 %v9515_v55  ;;  %v4557_v54 = vld [vmem:[#allocation8 + $0x10] sm:$0xff] }
 0xa9c   :  { %7345 = vmatpush1.bf16.msra.mxu0 %v8273_v6  ;;  %7370 = vmatpush3.bf16.msra.mxu1 %v8275_v18  ;;  %v4558_v6 = vld [vmem:[#allocation8 + $0x18] sm:$0xff]  ;;  %v4559_v18 = vld [vmem:[#allocation8 + $0x20] sm:$0xff] }
 0xa9d   :  { %7347 = vmatprep.subr.bf16.mxu0 %v8279_v34  ;;  %7371 = vmatprep.subr.bf16.mxu1 %v9515_v55  ;;  %v4560_v34 = vld [vmem:[#allocation8 + $0x28] sm:$0xff] }
 0xaa0   :  { %7349 = vmatpush1.bf16.msra.mxu0 %v8283_v35  ;;  %7373 = vmatpush3.bf16.msra.mxu1 %v8285_v39  ;;  %v7378_v35 = vpack.c.bf16 %v4558_v6, %v4557_v54  ;;  %v7381_v39 = vpack.c.bf16 %v4560_v34, %v4559_v18 }
 0xaa1   :  { %7374 = vmatprep.subr.bf16.mxu0 %v9515_v55 }
 0xaa3   :  { %4458 = vmatmul.mubr.f32.vlgmr.msra.gmra.mrb[30].mxu0 %v9226_v9  ;;  %5993 = vmatmul.mubr.f32.vlgmr.msra.gmra.mrb[52].mxu1 %v9226_v9 }
 0xaa4   :  { %6027 = vmatprep.mubr.msk.f32.mxu0 %vm7827_vm2, %v9517_v10  ;;  %7376 = vmatpush3.bf16.msra.mxu0 %v7375_v27  ;;  %v4562_v10 = vld [vmem:[#allocation8 + $0x38] sm:$0xff] }
 0xaa5   :  { %7377 = vmatprep.subr.bf16.mxu0 %v9515_v55  ;;  %v7384_v45 = vpack.c.bf16 %v4562_v10, %v4561_v5 }
 0xaa8   :  { %7379 = vmatpush3.bf16.msra.mxu0 %v7378_v35 }
 0xaa9   :  { %7380 = vmatprep.subr.bf16.mxu0 %v9515_v55 }
 0xaac   :  { %7382 = vmatpush3.bf16.msra.mxu0 %v7381_v39 }
 0xaad   :  { %7383 = vmatprep.subr.bf16.mxu0 %v9515_v55 }
 0xab0   :  { %7385 = vmatpush3.bf16.msra.mxu0 %v7384_v45 }
 0xab1   :  { %7386 = vmatprep.subr.bf16.mxu0 %v9515_v55 }
 0xab4   :  { %7388 = vmatpush3.bf16.msra.mxu0 %v7387_v46 }
 0xab5   :  { %7389 = vmatprep.subr.bf16.mxu0 %v9515_v55 }
 0xab8   :  { %7391 = vmatpush3.bf16.msra.mxu0 %v7390_v0 }
 0xab9   :  { %7392 = vmatprep.subr.bf16.mxu0 %v9515_v55 }
 0xabc   :  { %7394 = vmatpush3.bf16.msra.mxu0 %v7393_v13 }
 0xabd   :  { %7395 = vmatprep.subr.bf16.mxu0 %v9515_v55 }
 0xac0   :  { %7397 = vmatpush3.bf16.msra.mxu0 %v7396_v1 }
 0xb56   :  { %v4389_v36 = vpop.f32.mrb[50].mxu1 }
 0xb57   :  { %v5959_v48 = vpop.f32.mrb[51].mxu1  ;;  %v4390_v20 = vadd.f32 %v4389_v36, %v9820_v4 }
 0xb76   :  { %v4459_v14 = vpop.f32.mrb[30].mxu0  ;;  %v4530_v51 = vpop.f32.mrb[52].mxu1 }
 0xb77   :  { %v7427_v22 = vadd.f32 %v9818_v56, %v4459_v14  ;;  %v4461_v60 = vpop.f32.mrb[31].mxu0  ;;  %v5994_v12 = vpop.f32.mrb[53].mxu1  ;;  %v4531_v53 = vadd.f32 %v4530_v51, %v9635_v49 }
 0xb78   :  { %v7429_v43 = vadd.f32 %v9819_v44, %v4461_v60 }
 0xb79   :  { %v4719_v33 = vmul.f32 -1.442695, %v7427_v22 }
 0xb7a   :  { %v4720_v63 = vmul.f32 -1.442695, %v7429_v43 }
 0xb7b   :  { %7689 = vpow2.f32 %v4719_v33 }
 0xb7c   :  { %7691 = vpow2.f32 %v4720_v63 }
 0xb85   :  { %v7690_v29 = vpop.eup %7689 }
 0xb86   :  { %v4538_v52 = vadd.f32 1.0, %v7690_v29  ;;  %v7692_v40 = vpop.eup %7691 }
 0xb87   :  { %v4545_v55 = vadd.f32 1.0, %v7692_v40 }
 0xb88   :  { %7693 = vrcp.f32 %v4538_v52 }
 0xb89   :  { %7695 = vrcp.f32 %v4545_v55 }
 0xb92   :  { %v7694_v3 = vpop.eup %7693 }
 0xb93   :  { %v4548_v26 = vmul.f32 %v7694_v3, %v4531_v53  ;;  %v7696_v38 = vpop.eup %7695 }
 0xb94   :  { %v4551_v30 = vsub.f32 1.0, %v7696_v38  ;;  %v4553_v58 = vmul.f32 %v7696_v38, %v9226_v9 }
 0xb95   :  { %v4549_v56 = vadd.f32 %v4548_v26, %v4390_v20 }
 0xb97   :  { %7697 = vtanh.f32 %v4549_v56 }
 0xba1   :  { %v7698_v44 = vpop.eup %7697 }
 0xba2   :  { %v4552_v59 = vmul.f32 %v7698_v44, %v4551_v30 }
 0xba4   :  { %v4554_v7 = vadd.f32 %v4553_v58, %v4552_v59 }
 0xba6   :  { %6028 = vmatmul.mubr.f32.vlgmr.msra.gmra.mrb[32].mxu0 %v4554_v7 }
 0xc79   :  { %v4644_v49 = vpop.f32.mrb[32].mxu0 }
 0xc7a   :  { %v4645_v4 = vadd.f32 %v4721_v24, %v4644_v49  ;;  %v6029_v47 = vpop.f32.mrb[33].mxu0 }
 0xc7c   :  { %4648 = vst [vmem:[#allocation10] sm:$0x3] %v4645_v4 }
 0xc7d   :  { %7798 = shalt.err (!%p7795_p8)
}
 0xc7e   :  { %s7799_s26 = scalar_lea.hbm %s9310_s11, 32 }
 0xc7f   :  { %p7800_p9 = scmp.ne.s32.totalorder %s9310_s11, %s7799_s26  ;;  %p7803_p10 = scmp.lt.u32.totalorder %s7799_s26, %s9310_s11 }
 0xc81   :  { %p7805_p11 = pnand %p7803_p10, %p7800_p9 }
 0xc83   :  { %7808 = shalt.err (!%p7805_p11)
}
 0xc84   :  { %4658 = dma.vmem_to_hbm [thread:$0]  %s4656_s23, 32, %s9310_s11, [#allocation4]  }
 0xc85   :  { %7815 = dma.done.wait [#allocation4], 32  }
 0xc86   :  { %7816 = vsyncadd [#allocation4], 4294967264 }
 0xc87   :  { %4662 = vsyncpa [#allocation3], 1 }
 0xc88   :  { %4663 = vsyncpa [#allocation6], 1 }
 0xc89   :  { %4664 = vsyncpa [#allocation9], 1 }
 0xc8a   :  { %4665 = vsyncpa [#allocation4], 1 }

</bundles_post_ra>
